<compile_context>
chip_gen: v6e
topology: v6e:2x2x1
jax: 0.10.0
libtpu: 0.0.40
codegen_flags: <defaults>
</compile_context>

<pallas_src>
import jax
import jax.numpy as jnp
from jax.experimental import pallas as pl
from jax.experimental.pallas import tpu as pltpu

NEG_SLOPE = 0.01  # nn.LeakyReLU() default

SLAB = 512                # lanes per sub-slab (one independent matmul chain)
SUBSLABS = 8              # unrolled sub-slabs per grid step (=> 8-sublane out block)
TB = SLAB * SUBSLABS      # 4096 batch elements per grid step

# Row offsets of each layer inside the packed parameter block (sublane-aligned).
_R_EMBED, _R_L1, _R_L2, _R_L3, _R_LIN1, _R_TAIL = 0, 8, 16, 24, 32, 64
_PK_ROWS, _PK_COLS = 96, 9   # 9 = widest MXU layer "in" (8) + 1 bias column


def _leaky_relu(v):
    return jnp.where(v >= 0, v, NEG_SLOPE * v)


def simple_multiple_kernel(x_ref, pk_ref, out_ref):
    """x_ref: (2, TB) feature-major batch block; pk_ref: (96, 9) packed params;
    out_ref: (SUBSLABS, SLAB) lane/sublane-dense output block."""
    f32 = jnp.float32

    # ---- hoisted, loop-invariant parameter loads (static ref slices, tiny) ----
    we0 = pk_ref[_R_EMBED:_R_EMBED + 8, 0:1]          # embed col for x[:,0]   (8,1)
    we1 = pk_ref[_R_EMBED:_R_EMBED + 8, 1:2]          # embed col for x[:,1]   (8,1)
    be = pk_ref[_R_EMBED:_R_EMBED + 8, 2:3]           # embed bias             (8,1)
    w1 = pk_ref[_R_L1:_R_L1 + 8, 0:8]
    b1 = pk_ref[_R_L1:_R_L1 + 8, 8:9]
    w2 = pk_ref[_R_L2:_R_L2 + 8, 0:8]
    b2 = pk_ref[_R_L2:_R_L2 + 8, 8:9]
    w3 = pk_ref[_R_L3:_R_L3 + 8, 0:8]
    b3 = pk_ref[_R_L3:_R_L3 + 8, 8:9]
    wl1 = pk_ref[_R_LIN1:_R_LIN1 + 32, 0:8]           # (32, 8)
    bl1 = pk_ref[_R_LIN1:_R_LIN1 + 32, 8:9]           # (32, 1)
    wt = pk_ref[_R_TAIL:_R_TAIL + 32, 0:1]            # fused linear2∘head W   (32,1)
    bt = pk_ref[_R_TAIL:_R_TAIL + 1, 1:2]             # fused bias             (1,1)

    def mm(w, v, b):
        # (dout, din) @ (din, SLAB) on the MXU, f32 accumulate, lane-bcast bias.
        return jnp.dot(w, v, preferred_element_type=f32) + b

    # Static unroll (== lax.fori_loop(..., unroll=True)): 8 independent chains
    # the scheduler can interleave to keep the MXU/vex slot busy.
    for s in range(SUBSLABS):
        lo = s * SLAB
        x0 = x_ref[0:1, lo:lo + SLAB]                  # (1, SLAB)
        x1 = x_ref[1:2, lo:lo + SLAB]                  # (1, SLAB)

        # embed (K=2) on the VPU instead of the MXU.
        h = we0 * x0 + we1 * x1 + be                   # (8, SLAB)

        wx1 = mm(w1, h, b1)                            # l1(x)
        x2 = _leaky_relu(wx1 * h) + wx1
        wx2 = mm(w2, x2, b2)                           # l2(x2)
        x3 = wx2 * h
        wx3 = mm(w2, x3, b2)                           # l2(x3)  (l2 reused, as in PyTorch)
        x4 = _leaky_relu(wx3 * h) + wx3
        wx4 = mm(w3, x4, b3)                           # l3(x4)  (l4 unused in forward)
        o = _leaky_relu(mm(wl1, wx4, bl1))             # linear1 + act        (32, SLAB)

        # fused linear2∘head (32 -> 1) as VPU multiply + XLU sublane-reduce.
        r = jnp.sum(o * wt, axis=0, keepdims=True) + bt   # (1, SLAB)
        out_ref[s:s + 1, :] = r.astype(out_ref.dtype)


def pack_params(p):
    """Pack all (pre-transposed) weights/biases into one (96, 9) f32 block.
    MXU layers: rows [r0, r0+dout): W^T in cols [0,din), bias in col din.
    The fused linear2∘head tail is stored COLUMN-wise (32 rows, col 0 = weight,
    [_R_TAIL,1] = bias) so the kernel's VPU/XLU reduce can use it directly."""
    wl2h = p["wl2"] @ p["wh"]                 # (32, 1)
    bl2h = p["bl2"] @ p["wh"] + p["bh"]       # (1, 1)

    pk = jnp.zeros((_PK_ROWS, _PK_COLS), jnp.float32)

    def put(pk, r0, w, b):                    # w: (din, dout), b: (1, dout)
        din, dout = w.shape
        pk = pk.at[r0:r0 + dout, 0:din].set(w.T)
        pk = pk.at[r0:r0 + dout, din:din + 1].set(b.T)
        return pk

    pk = put(pk, _R_EMBED, p["we"], p["be"])
    pk = put(pk, _R_L1, p["w1"], p["b1"])
    pk = put(pk, _R_L2, p["w2"], p["b2"])
    pk = put(pk, _R_L3, p["w3"], p["b3"])
    pk = put(pk, _R_LIN1, p["wl1"], p["bl1"])
    pk = pk.at[_R_TAIL:_R_TAIL + 32, 0:1].set(wl2h)
    pk = pk.at[_R_TAIL, 1].set(bl2h[0, 0])
    return pk


def simple_multiple_forward(x, params, *, x_is_feature_major=False):
    """x: (N, 2) f32 (or (2, N) if x_is_feature_major) -> (N, 1) f32."""
    pk = pack_params(params)

    if x_is_feature_major:
        xt = x.astype(jnp.float32)                         # (2, N), no transpose pass
    else:
        N, din = x.shape
        assert din == 2
        xt = x.T.astype(jnp.float32)                       # the one remaining wrapper pass

    n = xt.shape[1]
    n_pad = pl.cdiv(n, TB) * TB
    if n_pad != n:
        xt = jnp.pad(xt, ((0, 0), (0, n_pad - n)))

    out2d = pl.pallas_call(
        simple_multiple_kernel,
        out_shape=jax.ShapeDtypeStruct((n_pad // SLAB, SLAB), jnp.float32),
        grid_spec=pltpu.PrefetchScalarGridSpec(
            num_scalar_prefetch=0,
            grid=(n_pad // TB,),
            in_specs=[
                pl.BlockSpec((2, TB), lambda i: (0, i)),                # x block
                pl.BlockSpec((_PK_ROWS, _PK_COLS), lambda i: (0, 0)),   # packed params
            ],
            out_specs=pl.BlockSpec((SUBSLABS, SLAB), lambda i: (i, 0)),
        ),
        compiler_params=pltpu.CompilerParams(
            dimension_semantics=("parallel",),   # v7x: shards grid steps across both TCs
        ),
    )(xt, pk)

    # (n_pad//SLAB, SLAB) row-major == flat batch order: reshape is free, slice is tiny.
    return out2d.reshape(-1)[:n, None]


def init_params(key):
    """Deterministic init matching the nn.Linear shapes (stored as (in, out) / (1, out))."""
    dims = {
        "embed": (2, 8), "l1": (8, 8), "l2": (8, 8), "l3": (8, 8),
        "linear1": (8, 32), "linear2": (32, 8), "head": (8, 1),
    }
    names = {"embed": ("we", "be"), "l1": ("w1", "b1"), "l2": ("w2", "b2"),
             "l3": ("w3", "b3"), "linear1": ("wl1", "bl1"),
             "linear2": ("wl2", "bl2"), "head": ("wh", "bh")}
    params = {}
    for layer, (din, dout) in dims.items():
        key, kw, kb = jax.random.split(key, 3)
        bound = 1.0 / jnp.sqrt(din)  # PyTorch nn.Linear default uniform bound
        wname, bname = names[layer]
        params[wname] = jax.random.uniform(kw, (din, dout), jnp.float32, -bound, bound)
        params[bname] = jax.random.uniform(kb, (1, dout), jnp.float32, -bound, bound)
    return params


def reference_forward(x, p):
    """Plain-JAX reference of the PyTorch forward (unfused), for a sanity check."""
    lr = _leaky_relu
    h = x @ p["we"] + p["be"]
    wx1 = h @ p["w1"] + p["b1"]
    x2 = lr(wx1 * h) + wx1
    wx2 = x2 @ p["w2"] + p["b2"]
    x3 = wx2 * h
    wx3 = x3 @ p["w2"] + p["b2"]
    x4 = lr(wx3 * h) + wx3
    wx4 = x4 @ p["w3"] + p["b3"]
    out = lr(wx4 @ p["wl1"] + p["bl1"])
    out = out @ p["wl2"] + p["bl2"]
    return out @ p["wh"] + p["bh"]


if __name__ == "__main__":
    key = jax.random.PRNGKey(0)
    kx, kp = jax.random.split(key)

    # N=16000 pads to 16384 -> 4 even "parallel" grid steps (good v7x balance)
    # and still exercises the padding path.  Data is tiny (128 KB).
    N = 16000
    x = jax.random.normal(kx, (N, 2), jnp.float32)
    params = init_params(kp)

    out = simple_multiple_forward(x, params)
    out = jax.block_until_ready(out)

    ref = reference_forward(x, params)
    assert out.shape == (N, 1)
    assert jnp.allclose(out, ref, atol=1e-5, rtol=1e-5)

    print("KERNEL_OK")
</pallas_src>

<mosaic_0001>
module attributes {stable_mosaic.version = 11 : i64} {
  func.func @simple_multiple_kernel(%arg0: i32, %arg1: memref<2x4096xf32, #tpu.memory_space<vmem>>, %arg2: memref<96x9xf32, #tpu.memory_space<vmem>>, %arg3: memref<8x512xf32, #tpu.memory_space<vmem>>) attributes {dimension_semantics = [#tpu.dimension_semantics<parallel>], iteration_bounds = array<i64: 4>, scalar_prefetch = 0 : i64, scratch_operands = 0 : i64, tpu.core_type = #tpu.core_type<tc>, window_params = [{transform_indices = @transform_0, window_bounds = array<i64: 2, 4096>}, {pipeline_mode = #tpu.pipeline_mode<synchronous>, transform_indices = @transform_1, window_bounds = array<i64: 96, 9>}, {transform_indices = @transform_2, window_bounds = array<i64: 8, 512>}]} {
    %c0 = arith.constant 0 : index
    %c0_0 = arith.constant 0 : index
    %0 = vector.load %arg2[%c0, %c0_0] : memref<96x9xf32, #tpu.memory_space<vmem>>, vector<8x1xf32>
    %c0_1 = arith.constant 0 : index
    %c1 = arith.constant 1 : index
    %1 = vector.load %arg2[%c0_1, %c1] : memref<96x9xf32, #tpu.memory_space<vmem>>, vector<8x1xf32>
    %c0_2 = arith.constant 0 : index
    %c2 = arith.constant 2 : index
    %2 = vector.load %arg2[%c0_2, %c2] : memref<96x9xf32, #tpu.memory_space<vmem>>, vector<8x1xf32>
    %c8 = arith.constant 8 : index
    %c0_3 = arith.constant 0 : index
    %3 = vector.load %arg2[%c8, %c0_3] : memref<96x9xf32, #tpu.memory_space<vmem>>, vector<8x8xf32>
    %c8_4 = arith.constant 8 : index
    %c8_5 = arith.constant 8 : index
    %4 = vector.load %arg2[%c8_4, %c8_5] : memref<96x9xf32, #tpu.memory_space<vmem>>, vector<8x1xf32>
    %c16 = arith.constant 16 : index
    %c0_6 = arith.constant 0 : index
    %5 = vector.load %arg2[%c16, %c0_6] : memref<96x9xf32, #tpu.memory_space<vmem>>, vector<8x8xf32>
    %c16_7 = arith.constant 16 : index
    %c8_8 = arith.constant 8 : index
    %6 = vector.load %arg2[%c16_7, %c8_8] : memref<96x9xf32, #tpu.memory_space<vmem>>, vector<8x1xf32>
    %c24 = arith.constant 24 : index
    %c0_9 = arith.constant 0 : index
    %7 = vector.load %arg2[%c24, %c0_9] : memref<96x9xf32, #tpu.memory_space<vmem>>, vector<8x8xf32>
    %c24_10 = arith.constant 24 : index
    %c8_11 = arith.constant 8 : index
    %8 = vector.load %arg2[%c24_10, %c8_11] : memref<96x9xf32, #tpu.memory_space<vmem>>, vector<8x1xf32>
    %c32 = arith.constant 32 : index
    %c0_12 = arith.constant 0 : index
    %9 = vector.load %arg2[%c32, %c0_12] : memref<96x9xf32, #tpu.memory_space<vmem>>, vector<32x8xf32>
    %c32_13 = arith.constant 32 : index
    %c8_14 = arith.constant 8 : index
    %10 = vector.load %arg2[%c32_13, %c8_14] : memref<96x9xf32, #tpu.memory_space<vmem>>, vector<32x1xf32>
    %c64 = arith.constant 64 : index
    %c0_15 = arith.constant 0 : index
    %11 = vector.load %arg2[%c64, %c0_15] : memref<96x9xf32, #tpu.memory_space<vmem>>, vector<32x1xf32>
    %c64_16 = arith.constant 64 : index
    %c1_17 = arith.constant 1 : index
    %12 = vector.load %arg2[%c64_16, %c1_17] : memref<96x9xf32, #tpu.memory_space<vmem>>, vector<1x1xf32>
    %c0_18 = arith.constant 0 : index
    %c0_19 = arith.constant 0 : index
    %13 = vector.load %arg1[%c0_18, %c0_19] : memref<2x4096xf32, #tpu.memory_space<vmem>>, vector<1x512xf32>
    %c1_20 = arith.constant 1 : index
    %c0_21 = arith.constant 0 : index
    %14 = vector.load %arg1[%c1_20, %c0_21] : memref<2x4096xf32, #tpu.memory_space<vmem>>, vector<1x512xf32>
    %15 = vector.broadcast %0 : vector<8x1xf32> to vector<8x512xf32>
    %16 = vector.broadcast %13 : vector<1x512xf32> to vector<8x512xf32>
    %17 = arith.mulf %15, %16 : vector<8x512xf32>
    %18 = vector.broadcast %1 : vector<8x1xf32> to vector<8x512xf32>
    %19 = vector.broadcast %14 : vector<1x512xf32> to vector<8x512xf32>
    %20 = arith.mulf %18, %19 : vector<8x512xf32>
    %21 = arith.addf %17, %20 : vector<8x512xf32>
    %22 = vector.broadcast %2 : vector<8x1xf32> to vector<8x512xf32>
    %23 = arith.addf %21, %22 : vector<8x512xf32>
    %cst = arith.constant dense<0.000000e+00> : vector<8x512xf32>
    %24 = tpu.matmul %3, %23, %cst {dimension_numbers = #tpu.dot_dimension_numbers<[1], [0], [0], [1], [0, 0, 1, 1], [], []>} : vector<8x8xf32>, vector<8x512xf32>, vector<8x512xf32> -> vector<8x512xf32>
    %25 = vector.broadcast %4 : vector<8x1xf32> to vector<8x512xf32>
    %26 = arith.addf %24, %25 : vector<8x512xf32>
    %27 = arith.mulf %26, %23 : vector<8x512xf32>
    %cst_22 = arith.constant 0.000000e+00 : f32
    %28 = vector.broadcast %cst_22 : f32 to vector<8x512xf32>
    %29 = arith.cmpf oge, %27, %28 : vector<8x512xf32>
    %cst_23 = arith.constant 0.00999999977 : f32
    %30 = vector.broadcast %cst_23 : f32 to vector<8x512xf32>
    %31 = arith.mulf %30, %27 : vector<8x512xf32>
    %32 = arith.select %29, %27, %31 : vector<8x512xi1>, vector<8x512xf32>
    %33 = arith.addf %32, %26 : vector<8x512xf32>
    %cst_24 = arith.constant dense<0.000000e+00> : vector<8x512xf32>
    %34 = tpu.matmul %5, %33, %cst_24 {dimension_numbers = #tpu.dot_dimension_numbers<[1], [0], [0], [1], [0, 0, 1, 1], [], []>} : vector<8x8xf32>, vector<8x512xf32>, vector<8x512xf32> -> vector<8x512xf32>
    %35 = vector.broadcast %6 : vector<8x1xf32> to vector<8x512xf32>
    %36 = arith.addf %34, %35 : vector<8x512xf32>
    %37 = arith.mulf %36, %23 : vector<8x512xf32>
    %cst_25 = arith.constant dense<0.000000e+00> : vector<8x512xf32>
    %38 = tpu.matmul %5, %37, %cst_25 {dimension_numbers = #tpu.dot_dimension_numbers<[1], [0], [0], [1], [0, 0, 1, 1], [], []>} : vector<8x8xf32>, vector<8x512xf32>, vector<8x512xf32> -> vector<8x512xf32>
    %39 = vector.broadcast %6 : vector<8x1xf32> to vector<8x512xf32>
    %40 = arith.addf %38, %39 : vector<8x512xf32>
    %41 = arith.mulf %40, %23 : vector<8x512xf32>
    %cst_26 = arith.constant 0.000000e+00 : f32
    %42 = vector.broadcast %cst_26 : f32 to vector<8x512xf32>
    %43 = arith.cmpf oge, %41, %42 : vector<8x512xf32>
    %cst_27 = arith.constant 0.00999999977 : f32
    %44 = vector.broadcast %cst_27 : f32 to vector<8x512xf32>
    %45 = arith.mulf %44, %41 : vector<8x512xf32>
    %46 = arith.select %43, %41, %45 : vector<8x512xi1>, vector<8x512xf32>
    %47 = arith.addf %46, %40 : vector<8x512xf32>
    %cst_28 = arith.constant dense<0.000000e+00> : vector<8x512xf32>
    %48 = tpu.matmul %7, %47, %cst_28 {dimension_numbers = #tpu.dot_dimension_numbers<[1], [0], [0], [1], [0, 0, 1, 1], [], []>} : vector<8x8xf32>, vector<8x512xf32>, vector<8x512xf32> -> vector<8x512xf32>
    %49 = vector.broadcast %8 : vector<8x1xf32> to vector<8x512xf32>
    %50 = arith.addf %48, %49 : vector<8x512xf32>
    %cst_29 = arith.constant dense<0.000000e+00> : vector<32x512xf32>
    %51 = tpu.matmul %9, %50, %cst_29 {dimension_numbers = #tpu.dot_dimension_numbers<[1], [0], [0], [1], [0, 0, 1, 1], [], []>} : vector<32x8xf32>, vector<8x512xf32>, vector<32x512xf32> -> vector<32x512xf32>
    %52 = vector.broadcast %10 : vector<32x1xf32> to vector<32x512xf32>
    %53 = arith.addf %51, %52 : vector<32x512xf32>
    %cst_30 = arith.constant 0.000000e+00 : f32
    %54 = vector.broadcast %cst_30 : f32 to vector<32x512xf32>
    %55 = arith.cmpf oge, %53, %54 : vector<32x512xf32>
    %cst_31 = arith.constant 0.00999999977 : f32
    %56 = vector.broadcast %cst_31 : f32 to vector<32x512xf32>
    %57 = arith.mulf %56, %53 : vector<32x512xf32>
    %58 = arith.select %55, %53, %57 : vector<32x512xi1>, vector<32x512xf32>
    %59 = vector.broadcast %11 : vector<32x1xf32> to vector<32x512xf32>
    %60 = arith.mulf %58, %59 : vector<32x512xf32>
    %cst_32 = arith.constant dense<0.000000e+00> : vector<512xf32>
    %61 = vector.multi_reduction <add>, %60, %cst_32 [0] : vector<32x512xf32> to vector<512xf32>
    %62 = vector.shape_cast %61 : vector<512xf32> to vector<1x512xf32>
    %63 = vector.broadcast %12 : vector<1x1xf32> to vector<1x512xf32>
    %64 = arith.addf %62, %63 : vector<1x512xf32>
    %c0_33 = arith.constant 0 : index
    %c0_34 = arith.constant 0 : index
    %65 = vector.load %arg3[%c0_33, %c0_34] : memref<8x512xf32, #tpu.memory_space<vmem>>, vector<1x512xf32>
    tpu.vector_store %arg3[%c0_33, %c0_34], %64 {strides = array<i32>} : memref<8x512xf32, #tpu.memory_space<vmem>>, vector<1x512xf32>,
    %c0_35 = arith.constant 0 : index
    %c512 = arith.constant 512 : index
    %66 = vector.load %arg1[%c0_35, %c512] : memref<2x4096xf32, #tpu.memory_space<vmem>>, vector<1x512xf32>
    %c1_36 = arith.constant 1 : index
    %c512_37 = arith.constant 512 : index
    %67 = vector.load %arg1[%c1_36, %c512_37] : memref<2x4096xf32, #tpu.memory_space<vmem>>, vector<1x512xf32>
    %68 = vector.broadcast %0 : vector<8x1xf32> to vector<8x512xf32>
    %69 = vector.broadcast %66 : vector<1x512xf32> to vector<8x512xf32>
    %70 = arith.mulf %68, %69 : vector<8x512xf32>
    %71 = vector.broadcast %1 : vector<8x1xf32> to vector<8x512xf32>
    %72 = vector.broadcast %67 : vector<1x512xf32> to vector<8x512xf32>
    %73 = arith.mulf %71, %72 : vector<8x512xf32>
    %74 = arith.addf %70, %73 : vector<8x512xf32>
    %75 = vector.broadcast %2 : vector<8x1xf32> to vector<8x512xf32>
    %76 = arith.addf %74, %75 : vector<8x512xf32>
    %cst_38 = arith.constant dense<0.000000e+00> : vector<8x512xf32>
    %77 = tpu.matmul %3, %76, %cst_38 {dimension_numbers = #tpu.dot_dimension_numbers<[1], [0], [0], [1], [0, 0, 1, 1], [], []>} : vector<8x8xf32>, vector<8x512xf32>, vector<8x512xf32> -> vector<8x512xf32>
    %78 = vector.broadcast %4 : vector<8x1xf32> to vector<8x512xf32>
    %79 = arith.addf %77, %78 : vector<8x512xf32>
    %80 = arith.mulf %79, %76 : vector<8x512xf32>
    %cst_39 = arith.constant 0.000000e+00 : f32
    %81 = vector.broadcast %cst_39 : f32 to vector<8x512xf32>
    %82 = arith.cmpf oge, %80, %81 : vector<8x512xf32>
    %cst_40 = arith.constant 0.00999999977 : f32
    %83 = vector.broadcast %cst_40 : f32 to vector<8x512xf32>
    %84 = arith.mulf %83, %80 : vector<8x512xf32>
    %85 = arith.select %82, %80, %84 : vector<8x512xi1>, vector<8x512xf32>
    %86 = arith.addf %85, %79 : vector<8x512xf32>
    %cst_41 = arith.constant dense<0.000000e+00> : vector<8x512xf32>
    %87 = tpu.matmul %5, %86, %cst_41 {dimension_numbers = #tpu.dot_dimension_numbers<[1], [0], [0], [1], [0, 0, 1, 1], [], []>} : vector<8x8xf32>, vector<8x512xf32>, vector<8x512xf32> -> vector<8x512xf32>
    %88 = vector.broadcast %6 : vector<8x1xf32> to vector<8x512xf32>
    %89 = arith.addf %87, %88 : vector<8x512xf32>
    %90 = arith.mulf %89, %76 : vector<8x512xf32>
    %cst_42 = arith.constant dense<0.000000e+00> : vector<8x512xf32>
    %91 = tpu.matmul %5, %90, %cst_42 {dimension_numbers = #tpu.dot_dimension_numbers<[1], [0], [0], [1], [0, 0, 1, 1], [], []>} : vector<8x8xf32>, vector<8x512xf32>, vector<8x512xf32> -> vector<8x512xf32>
    %92 = vector.broadcast %6 : vector<8x1xf32> to vector<8x512xf32>
    %93 = arith.addf %91, %92 : vector<8x512xf32>
    %94 = arith.mulf %93, %76 : vector<8x512xf32>
    %cst_43 = arith.constant 0.000000e+00 : f32
    %95 = vector.broadcast %cst_43 : f32 to vector<8x512xf32>
    %96 = arith.cmpf oge, %94, %95 : vector<8x512xf32>
    %cst_44 = arith.constant 0.00999999977 : f32
    %97 = vector.broadcast %cst_44 : f32 to vector<8x512xf32>
    %98 = arith.mulf %97, %94 : vector<8x512xf32>
    %99 = arith.select %96, %94, %98 : vector<8x512xi1>, vector<8x512xf32>
    %100 = arith.addf %99, %93 : vector<8x512xf32>
    %cst_45 = arith.constant dense<0.000000e+00> : vector<8x512xf32>
    %101 = tpu.matmul %7, %100, %cst_45 {dimension_numbers = #tpu.dot_dimension_numbers<[1], [0], [0], [1], [0, 0, 1, 1], [], []>} : vector<8x8xf32>, vector<8x512xf32>, vector<8x512xf32> -> vector<8x512xf32>
    %102 = vector.broadcast %8 : vector<8x1xf32> to vector<8x512xf32>
    %103 = arith.addf %101, %102 : vector<8x512xf32>
    %cst_46 = arith.constant dense<0.000000e+00> : vector<32x512xf32>
    %104 = tpu.matmul %9, %103, %cst_46 {dimension_numbers = #tpu.dot_dimension_numbers<[1], [0], [0], [1], [0, 0, 1, 1], [], []>} : vector<32x8xf32>, vector<8x512xf32>, vector<32x512xf32> -> vector<32x512xf32>
    %105 = vector.broadcast %10 : vector<32x1xf32> to vector<32x512xf32>
    %106 = arith.addf %104, %105 : vector<32x512xf32>
    %cst_47 = arith.constant 0.000000e+00 : f32
    %107 = vector.broadcast %cst_47 : f32 to vector<32x512xf32>
    %108 = arith.cmpf oge, %106, %107 : vector<32x512xf32>
    %cst_48 = arith.constant 0.00999999977 : f32
    %109 = vector.broadcast %cst_48 : f32 to vector<32x512xf32>
    %110 = arith.mulf %109, %106 : vector<32x512xf32>
    %111 = arith.select %108, %106, %110 : vector<32x512xi1>, vector<32x512xf32>
    %112 = vector.broadcast %11 : vector<32x1xf32> to vector<32x512xf32>
    %113 = arith.mulf %111, %112 : vector<32x512xf32>
    %cst_49 = arith.constant dense<0.000000e+00> : vector<512xf32>
    %114 = vector.multi_reduction <add>, %113, %cst_49 [0] : vector<32x512xf32> to vector<512xf32>
    %115 = vector.shape_cast %114 : vector<512xf32> to vector<1x512xf32>
    %116 = vector.broadcast %12 : vector<1x1xf32> to vector<1x512xf32>
    %117 = arith.addf %115, %116 : vector<1x512xf32>
    %c1_50 = arith.constant 1 : index
    %c0_51 = arith.constant 0 : index
    %118 = vector.load %arg3[%c1_50, %c0_51] : memref<8x512xf32, #tpu.memory_space<vmem>>, vector<1x512xf32>
    tpu.vector_store %arg3[%c1_50, %c0_51], %117 {strides = array<i32>} : memref<8x512xf32, #tpu.memory_space<vmem>>, vector<1x512xf32>,
    %c0_52 = arith.constant 0 : index
    %c1024 = arith.constant 1024 : index
    %119 = vector.load %arg1[%c0_52, %c1024] : memref<2x4096xf32, #tpu.memory_space<vmem>>, vector<1x512xf32>
    %c1_53 = arith.constant 1 : index
    %c1024_54 = arith.constant 1024 : index
    %120 = vector.load %arg1[%c1_53, %c1024_54] : memref<2x4096xf32, #tpu.memory_space<vmem>>, vector<1x512xf32>
    %121 = vector.broadcast %0 : vector<8x1xf32> to vector<8x512xf32>
    %122 = vector.broadcast %119 : vector<1x512xf32> to vector<8x512xf32>
    %123 = arith.mulf %121, %122 : vector<8x512xf32>
    %124 = vector.broadcast %1 : vector<8x1xf32> to vector<8x512xf32>
    %125 = vector.broadcast %120 : vector<1x512xf32> to vector<8x512xf32>
    %126 = arith.mulf %124, %125 : vector<8x512xf32>
    %127 = arith.addf %123, %126 : vector<8x512xf32>
    %128 = vector.broadcast %2 : vector<8x1xf32> to vector<8x512xf32>
    %129 = arith.addf %127, %128 : vector<8x512xf32>
    %cst_55 = arith.constant dense<0.000000e+00> : vector<8x512xf32>
    %130 = tpu.matmul %3, %129, %cst_55 {dimension_numbers = #tpu.dot_dimension_numbers<[1], [0], [0], [1], [0, 0, 1, 1], [], []>} : vector<8x8xf32>, vector<8x512xf32>, vector<8x512xf32> -> vector<8x512xf32>
    %131 = vector.broadcast %4 : vector<8x1xf32> to vector<8x512xf32>
    %132 = arith.addf %130, %131 : vector<8x512xf32>
    %133 = arith.mulf %132, %129 : vector<8x512xf32>
    %cst_56 = arith.constant 0.000000e+00 : f32
    %134 = vector.broadcast %cst_56 : f32 to vector<8x512xf32>
    %135 = arith.cmpf oge, %133, %134 : vector<8x512xf32>
    %cst_57 = arith.constant 0.00999999977 : f32
    %136 = vector.broadcast %cst_57 : f32 to vector<8x512xf32>
    %137 = arith.mulf %136, %133 : vector<8x512xf32>
    %138 = arith.select %135, %133, %137 : vector<8x512xi1>, vector<8x512xf32>
    %139 = arith.addf %138, %132 : vector<8x512xf32>
    %cst_58 = arith.constant dense<0.000000e+00> : vector<8x512xf32>
    %140 = tpu.matmul %5, %139, %cst_58 {dimension_numbers = #tpu.dot_dimension_numbers<[1], [0], [0], [1], [0, 0, 1, 1], [], []>} : vector<8x8xf32>, vector<8x512xf32>, vector<8x512xf32> -> vector<8x512xf32>
    %141 = vector.broadcast %6 : vector<8x1xf32> to vector<8x512xf32>
    %142 = arith.addf %140, %141 : vector<8x512xf32>
    %143 = arith.mulf %142, %129 : vector<8x512xf32>
    %cst_59 = arith.constant dense<0.000000e+00> : vector<8x512xf32>
    %144 = tpu.matmul %5, %143, %cst_59 {dimension_numbers = #tpu.dot_dimension_numbers<[1], [0], [0], [1], [0, 0, 1, 1], [], []>} : vector<8x8xf32>, vector<8x512xf32>, vector<8x512xf32> -> vector<8x512xf32>
    %145 = vector.broadcast %6 : vector<8x1xf32> to vector<8x512xf32>
    %146 = arith.addf %144, %145 : vector<8x512xf32>
    %147 = arith.mulf %146, %129 : vector<8x512xf32>
    %cst_60 = arith.constant 0.000000e+00 : f32
    %148 = vector.broadcast %cst_60 : f32 to vector<8x512xf32>
    %149 = arith.cmpf oge, %147, %148 : vector<8x512xf32>
    %cst_61 = arith.constant 0.00999999977 : f32
    %150 = vector.broadcast %cst_61 : f32 to vector<8x512xf32>
    %151 = arith.mulf %150, %147 : vector<8x512xf32>
    %152 = arith.select %149, %147, %151 : vector<8x512xi1>, vector<8x512xf32>
    %153 = arith.addf %152, %146 : vector<8x512xf32>
    %cst_62 = arith.constant dense<0.000000e+00> : vector<8x512xf32>
    %154 = tpu.matmul %7, %153, %cst_62 {dimension_numbers = #tpu.dot_dimension_numbers<[1], [0], [0], [1], [0, 0, 1, 1], [], []>} : vector<8x8xf32>, vector<8x512xf32>, vector<8x512xf32> -> vector<8x512xf32>
    %155 = vector.broadcast %8 : vector<8x1xf32> to vector<8x512xf32>
    %156 = arith.addf %154, %155 : vector<8x512xf32>
    %cst_63 = arith.constant dense<0.000000e+00> : vector<32x512xf32>
    %157 = tpu.matmul %9, %156, %cst_63 {dimension_numbers = #tpu.dot_dimension_numbers<[1], [0], [0], [1], [0, 0, 1, 1], [], []>} : vector<32x8xf32>, vector<8x512xf32>, vector<32x512xf32> -> vector<32x512xf32>
    %158 = vector.broadcast %10 : vector<32x1xf32> to vector<32x512xf32>
    %159 = arith.addf %157, %158 : vector<32x512xf32>
    %cst_64 = arith.constant 0.000000e+00 : f32
    %160 = vector.broadcast %cst_64 : f32 to vector<32x512xf32>
    %161 = arith.cmpf oge, %159, %160 : vector<32x512xf32>
    %cst_65 = arith.constant 0.00999999977 : f32
    %162 = vector.broadcast %cst_65 : f32 to vector<32x512xf32>
    %163 = arith.mulf %162, %159 : vector<32x512xf32>
    %164 = arith.select %161, %159, %163 : vector<32x512xi1>, vector<32x512xf32>
    %165 = vector.broadcast %11 : vector<32x1xf32> to vector<32x512xf32>
    %166 = arith.mulf %164, %165 : vector<32x512xf32>
    %cst_66 = arith.constant dense<0.000000e+00> : vector<512xf32>
    %167 = vector.multi_reduction <add>, %166, %cst_66 [0] : vector<32x512xf32> to vector<512xf32>
    %168 = vector.shape_cast %167 : vector<512xf32> to vector<1x512xf32>
    %169 = vector.broadcast %12 : vector<1x1xf32> to vector<1x512xf32>
    %170 = arith.addf %168, %169 : vector<1x512xf32>
    %c2_67 = arith.constant 2 : index
    %c0_68 = arith.constant 0 : index
    %171 = vector.load %arg3[%c2_67, %c0_68] : memref<8x512xf32, #tpu.memory_space<vmem>>, vector<1x512xf32>
    tpu.vector_store %arg3[%c2_67, %c0_68], %170 {strides = array<i32>} : memref<8x512xf32, #tpu.memory_space<vmem>>, vector<1x512xf32>,
    %c0_69 = arith.constant 0 : index
    %c1536 = arith.constant 1536 : index
    %172 = vector.load %arg1[%c0_69, %c1536] : memref<2x4096xf32, #tpu.memory_space<vmem>>, vector<1x512xf32>
    %c1_70 = arith.constant 1 : index
    %c1536_71 = arith.constant 1536 : index
    %173 = vector.load %arg1[%c1_70, %c1536_71] : memref<2x4096xf32, #tpu.memory_space<vmem>>, vector<1x512xf32>
    %174 = vector.broadcast %0 : vector<8x1xf32> to vector<8x512xf32>
    %175 = vector.broadcast %172 : vector<1x512xf32> to vector<8x512xf32>
    %176 = arith.mulf %174, %175 : vector<8x512xf32>
    %177 = vector.broadcast %1 : vector<8x1xf32> to vector<8x512xf32>
    %178 = vector.broadcast %173 : vector<1x512xf32> to vector<8x512xf32>
    %179 = arith.mulf %177, %178 : vector<8x512xf32>
    %180 = arith.addf %176, %179 : vector<8x512xf32>
    %181 = vector.broadcast %2 : vector<8x1xf32> to vector<8x512xf32>
    %182 = arith.addf %180, %181 : vector<8x512xf32>
    %cst_72 = arith.constant dense<0.000000e+00> : vector<8x512xf32>
    %183 = tpu.matmul %3, %182, %cst_72 {dimension_numbers = #tpu.dot_dimension_numbers<[1], [0], [0], [1], [0, 0, 1, 1], [], []>} : vector<8x8xf32>, vector<8x512xf32>, vector<8x512xf32> -> vector<8x512xf32>
    %184 = vector.broadcast %4 : vector<8x1xf32> to vector<8x512xf32>
    %185 = arith.addf %183, %184 : vector<8x512xf32>
    %186 = arith.mulf %185, %182 : vector<8x512xf32>
    %cst_73 = arith.constant 0.000000e+00 : f32
    %187 = vector.broadcast %cst_73 : f32 to vector<8x512xf32>
    %188 = arith.cmpf oge, %186, %187 : vector<8x512xf32>
    %cst_74 = arith.constant 0.00999999977 : f32
    %189 = vector.broadcast %cst_74 : f32 to vector<8x512xf32>
    %190 = arith.mulf %189, %186 : vector<8x512xf32>
    %191 = arith.select %188, %186, %190 : vector<8x512xi1>, vector<8x512xf32>
    %192 = arith.addf %191, %185 : vector<8x512xf32>
    %cst_75 = arith.constant dense<0.000000e+00> : vector<8x512xf32>
    %193 = tpu.matmul %5, %192, %cst_75 {dimension_numbers = #tpu.dot_dimension_numbers<[1], [0], [0], [1], [0, 0, 1, 1], [], []>} : vector<8x8xf32>, vector<8x512xf32>, vector<8x512xf32> -> vector<8x512xf32>
    %194 = vector.broadcast %6 : vector<8x1xf32> to vector<8x512xf32>
    %195 = arith.addf %193, %194 : vector<8x512xf32>
    %196 = arith.mulf %195, %182 : vector<8x512xf32>
    %cst_76 = arith.constant dense<0.000000e+00> : vector<8x512xf32>
    %197 = tpu.matmul %5, %196, %cst_76 {dimension_numbers = #tpu.dot_dimension_numbers<[1], [0], [0], [1], [0, 0, 1, 1], [], []>} : vector<8x8xf32>, vector<8x512xf32>, vector<8x512xf32> -> vector<8x512xf32>
    %198 = vector.broadcast %6 : vector<8x1xf32> to vector<8x512xf32>
    %199 = arith.addf %197, %198 : vector<8x512xf32>
    %200 = arith.mulf %199, %182 : vector<8x512xf32>
    %cst_77 = arith.constant 0.000000e+00 : f32
    %201 = vector.broadcast %cst_77 : f32 to vector<8x512xf32>
    %202 = arith.cmpf oge, %200, %201 : vector<8x512xf32>
    %cst_78 = arith.constant 0.00999999977 : f32
    %203 = vector.broadcast %cst_78 : f32 to vector<8x512xf32>
    %204 = arith.mulf %203, %200 : vector<8x512xf32>
    %205 = arith.select %202, %200, %204 : vector<8x512xi1>, vector<8x512xf32>
    %206 = arith.addf %205, %199 : vector<8x512xf32>
    %cst_79 = arith.constant dense<0.000000e+00> : vector<8x512xf32>
    %207 = tpu.matmul %7, %206, %cst_79 {dimension_numbers = #tpu.dot_dimension_numbers<[1], [0], [0], [1], [0, 0, 1, 1], [], []>} : vector<8x8xf32>, vector<8x512xf32>, vector<8x512xf32> -> vector<8x512xf32>
    %208 = vector.broadcast %8 : vector<8x1xf32> to vector<8x512xf32>
    %209 = arith.addf %207, %208 : vector<8x512xf32>
    %cst_80 = arith.constant dense<0.000000e+00> : vector<32x512xf32>
    %210 = tpu.matmul %9, %209, %cst_80 {dimension_numbers = #tpu.dot_dimension_numbers<[1], [0], [0], [1], [0, 0, 1, 1], [], []>} : vector<32x8xf32>, vector<8x512xf32>, vector<32x512xf32> -> vector<32x512xf32>
    %211 = vector.broadcast %10 : vector<32x1xf32> to vector<32x512xf32>
    %212 = arith.addf %210, %211 : vector<32x512xf32>
    %cst_81 = arith.constant 0.000000e+00 : f32
    %213 = vector.broadcast %cst_81 : f32 to vector<32x512xf32>
    %214 = arith.cmpf oge, %212, %213 : vector<32x512xf32>
    %cst_82 = arith.constant 0.00999999977 : f32
    %215 = vector.broadcast %cst_82 : f32 to vector<32x512xf32>
    %216 = arith.mulf %215, %212 : vector<32x512xf32>
    %217 = arith.select %214, %212, %216 : vector<32x512xi1>, vector<32x512xf32>
    %218 = vector.broadcast %11 : vector<32x1xf32> to vector<32x512xf32>
    %219 = arith.mulf %217, %218 : vector<32x512xf32>
    %cst_83 = arith.constant dense<0.000000e+00> : vector<512xf32>
    %220 = vector.multi_reduction <add>, %219, %cst_83 [0] : vector<32x512xf32> to vector<512xf32>
    %221 = vector.shape_cast %220 : vector<512xf32> to vector<1x512xf32>
    %222 = vector.broadcast %12 : vector<1x1xf32> to vector<1x512xf32>
    %223 = arith.addf %221, %222 : vector<1x512xf32>
    %c3 = arith.constant 3 : index
    %c0_84 = arith.constant 0 : index
    %224 = vector.load %arg3[%c3, %c0_84] : memref<8x512xf32, #tpu.memory_space<vmem>>, vector<1x512xf32>
    tpu.vector_store %arg3[%c3, %c0_84], %223 {strides = array<i32>} : memref<8x512xf32, #tpu.memory_space<vmem>>, vector<1x512xf32>,
    %c0_85 = arith.constant 0 : index
    %c2048 = arith.constant 2048 : index
    %225 = vector.load %arg1[%c0_85, %c2048] : memref<2x4096xf32, #tpu.memory_space<vmem>>, vector<1x512xf32>
    %c1_86 = arith.constant 1 : index
    %c2048_87 = arith.constant 2048 : index
    %226 = vector.load %arg1[%c1_86, %c2048_87] : memref<2x4096xf32, #tpu.memory_space<vmem>>, vector<1x512xf32>
    %227 = vector.broadcast %0 : vector<8x1xf32> to vector<8x512xf32>
    %228 = vector.broadcast %225 : vector<1x512xf32> to vector<8x512xf32>
    %229 = arith.mulf %227, %228 : vector<8x512xf32>
    %230 = vector.broadcast %1 : vector<8x1xf32> to vector<8x512xf32>
    %231 = vector.broadcast %226 : vector<1x512xf32> to vector<8x512xf32>
    %232 = arith.mulf %230, %231 : vector<8x512xf32>
    %233 = arith.addf %229, %232 : vector<8x512xf32>
    %234 = vector.broadcast %2 : vector<8x1xf32> to vector<8x512xf32>
    %235 = arith.addf %233, %234 : vector<8x512xf32>
    %cst_88 = arith.constant dense<0.000000e+00> : vector<8x512xf32>
    %236 = tpu.matmul %3, %235, %cst_88 {dimension_numbers = #tpu.dot_dimension_numbers<[1], [0], [0], [1], [0, 0, 1, 1], [], []>} : vector<8x8xf32>, vector<8x512xf32>, vector<8x512xf32> -> vector<8x512xf32>
    %237 = vector.broadcast %4 : vector<8x1xf32> to vector<8x512xf32>
    %238 = arith.addf %236, %237 : vector<8x512xf32>
    %239 = arith.mulf %238, %235 : vector<8x512xf32>
    %cst_89 = arith.constant 0.000000e+00 : f32
    %240 = vector.broadcast %cst_89 : f32 to vector<8x512xf32>
    %241 = arith.cmpf oge, %239, %240 : vector<8x512xf32>
    %cst_90 = arith.constant 0.00999999977 : f32
    %242 = vector.broadcast %cst_90 : f32 to vector<8x512xf32>
    %243 = arith.mulf %242, %239 : vector<8x512xf32>
    %244 = arith.select %241, %239, %243 : vector<8x512xi1>, vector<8x512xf32>
    %245 = arith.addf %244, %238 : vector<8x512xf32>
    %cst_91 = arith.constant dense<0.000000e+00> : vector<8x512xf32>
    %246 = tpu.matmul %5, %245, %cst_91 {dimension_numbers = #tpu.dot_dimension_numbers<[1], [0], [0], [1], [0, 0, 1, 1], [], []>} : vector<8x8xf32>, vector<8x512xf32>, vector<8x512xf32> -> vector<8x512xf32>
    %247 = vector.broadcast %6 : vector<8x1xf32> to vector<8x512xf32>
    %248 = arith.addf %246, %247 : vector<8x512xf32>
    %249 = arith.mulf %248, %235 : vector<8x512xf32>
    %cst_92 = arith.constant dense<0.000000e+00> : vector<8x512xf32>
    %250 = tpu.matmul %5, %249, %cst_92 {dimension_numbers = #tpu.dot_dimension_numbers<[1], [0], [0], [1], [0, 0, 1, 1], [], []>} : vector<8x8xf32>, vector<8x512xf32>, vector<8x512xf32> -> vector<8x512xf32>
    %251 = vector.broadcast %6 : vector<8x1xf32> to vector<8x512xf32>
    %252 = arith.addf %250, %251 : vector<8x512xf32>
    %253 = arith.mulf %252, %235 : vector<8x512xf32>
    %cst_93 = arith.constant 0.000000e+00 : f32
    %254 = vector.broadcast %cst_93 : f32 to vector<8x512xf32>
    %255 = arith.cmpf oge, %253, %254 : vector<8x512xf32>
    %cst_94 = arith.constant 0.00999999977 : f32
    %256 = vector.broadcast %cst_94 : f32 to vector<8x512xf32>
    %257 = arith.mulf %256, %253 : vector<8x512xf32>
    %258 = arith.select %255, %253, %257 : vector<8x512xi1>, vector<8x512xf32>
    %259 = arith.addf %258, %252 : vector<8x512xf32>
    %cst_95 = arith.constant dense<0.000000e+00> : vector<8x512xf32>
    %260 = tpu.matmul %7, %259, %cst_95 {dimension_numbers = #tpu.dot_dimension_numbers<[1], [0], [0], [1], [0, 0, 1, 1], [], []>} : vector<8x8xf32>, vector<8x512xf32>, vector<8x512xf32> -> vector<8x512xf32>
    %261 = vector.broadcast %8 : vector<8x1xf32> to vector<8x512xf32>
    %262 = arith.addf %260, %261 : vector<8x512xf32>
    %cst_96 = arith.constant dense<0.000000e+00> : vector<32x512xf32>
    %263 = tpu.matmul %9, %262, %cst_96 {dimension_numbers = #tpu.dot_dimension_numbers<[1], [0], [0], [1], [0, 0, 1, 1], [], []>} : vector<32x8xf32>, vector<8x512xf32>, vector<32x512xf32> -> vector<32x512xf32>
    %264 = vector.broadcast %10 : vector<32x1xf32> to vector<32x512xf32>
    %265 = arith.addf %263, %264 : vector<32x512xf32>
    %cst_97 = arith.constant 0.000000e+00 : f32
    %266 = vector.broadcast %cst_97 : f32 to vector<32x512xf32>
    %267 = arith.cmpf oge, %265, %266 : vector<32x512xf32>
    %cst_98 = arith.constant 0.00999999977 : f32
    %268 = vector.broadcast %cst_98 : f32 to vector<32x512xf32>
    %269 = arith.mulf %268, %265 : vector<32x512xf32>
    %270 = arith.select %267, %265, %269 : vector<32x512xi1>, vector<32x512xf32>
    %271 = vector.broadcast %11 : vector<32x1xf32> to vector<32x512xf32>
    %272 = arith.mulf %270, %271 : vector<32x512xf32>
    %cst_99 = arith.constant dense<0.000000e+00> : vector<512xf32>
    %273 = vector.multi_reduction <add>, %272, %cst_99 [0] : vector<32x512xf32> to vector<512xf32>
    %274 = vector.shape_cast %273 : vector<512xf32> to vector<1x512xf32>
    %275 = vector.broadcast %12 : vector<1x1xf32> to vector<1x512xf32>
    %276 = arith.addf %274, %275 : vector<1x512xf32>
    %c4 = arith.constant 4 : index
    %c0_100 = arith.constant 0 : index
    %277 = vector.load %arg3[%c4, %c0_100] : memref<8x512xf32, #tpu.memory_space<vmem>>, vector<1x512xf32>
    tpu.vector_store %arg3[%c4, %c0_100], %276 {strides = array<i32>} : memref<8x512xf32, #tpu.memory_space<vmem>>, vector<1x512xf32>,
    %c0_101 = arith.constant 0 : index
    %c2560 = arith.constant 2560 : index
    %278 = vector.load %arg1[%c0_101, %c2560] : memref<2x4096xf32, #tpu.memory_space<vmem>>, vector<1x512xf32>
    %c1_102 = arith.constant 1 : index
    %c2560_103 = arith.constant 2560 : index
    %279 = vector.load %arg1[%c1_102, %c2560_103] : memref<2x4096xf32, #tpu.memory_space<vmem>>, vector<1x512xf32>
    %280 = vector.broadcast %0 : vector<8x1xf32> to vector<8x512xf32>
    %281 = vector.broadcast %278 : vector<1x512xf32> to vector<8x512xf32>
    %282 = arith.mulf %280, %281 : vector<8x512xf32>
    %283 = vector.broadcast %1 : vector<8x1xf32> to vector<8x512xf32>
    %284 = vector.broadcast %279 : vector<1x512xf32> to vector<8x512xf32>
    %285 = arith.mulf %283, %284 : vector<8x512xf32>
    %286 = arith.addf %282, %285 : vector<8x512xf32>
    %287 = vector.broadcast %2 : vector<8x1xf32> to vector<8x512xf32>
    %288 = arith.addf %286, %287 : vector<8x512xf32>
    %cst_104 = arith.constant dense<0.000000e+00> : vector<8x512xf32>
    %289 = tpu.matmul %3, %288, %cst_104 {dimension_numbers = #tpu.dot_dimension_numbers<[1], [0], [0], [1], [0, 0, 1, 1], [], []>} : vector<8x8xf32>, vector<8x512xf32>, vector<8x512xf32> -> vector<8x512xf32>
    %290 = vector.broadcast %4 : vector<8x1xf32> to vector<8x512xf32>
    %291 = arith.addf %289, %290 : vector<8x512xf32>
    %292 = arith.mulf %291, %288 : vector<8x512xf32>
    %cst_105 = arith.constant 0.000000e+00 : f32
    %293 = vector.broadcast %cst_105 : f32 to vector<8x512xf32>
    %294 = arith.cmpf oge, %292, %293 : vector<8x512xf32>
    %cst_106 = arith.constant 0.00999999977 : f32
    %295 = vector.broadcast %cst_106 : f32 to vector<8x512xf32>
    %296 = arith.mulf %295, %292 : vector<8x512xf32>
    %297 = arith.select %294, %292, %296 : vector<8x512xi1>, vector<8x512xf32>
    %298 = arith.addf %297, %291 : vector<8x512xf32>
    %cst_107 = arith.constant dense<0.000000e+00> : vector<8x512xf32>
    %299 = tpu.matmul %5, %298, %cst_107 {dimension_numbers = #tpu.dot_dimension_numbers<[1], [0], [0], [1], [0, 0, 1, 1], [], []>} : vector<8x8xf32>, vector<8x512xf32>, vector<8x512xf32> -> vector<8x512xf32>
    %300 = vector.broadcast %6 : vector<8x1xf32> to vector<8x512xf32>
    %301 = arith.addf %299, %300 : vector<8x512xf32>
    %302 = arith.mulf %301, %288 : vector<8x512xf32>
    %cst_108 = arith.constant dense<0.000000e+00> : vector<8x512xf32>
    %303 = tpu.matmul %5, %302, %cst_108 {dimension_numbers = #tpu.dot_dimension_numbers<[1], [0], [0], [1], [0, 0, 1, 1], [], []>} : vector<8x8xf32>, vector<8x512xf32>, vector<8x512xf32> -> vector<8x512xf32>
    %304 = vector.broadcast %6 : vector<8x1xf32> to vector<8x512xf32>
    %305 = arith.addf %303, %304 : vector<8x512xf32>
    %306 = arith.mulf %305, %288 : vector<8x512xf32>
    %cst_109 = arith.constant 0.000000e+00 : f32
    %307 = vector.broadcast %cst_109 : f32 to vector<8x512xf32>
    %308 = arith.cmpf oge, %306, %307 : vector<8x512xf32>
    %cst_110 = arith.constant 0.00999999977 : f32
    %309 = vector.broadcast %cst_110 : f32 to vector<8x512xf32>
    %310 = arith.mulf %309, %306 : vector<8x512xf32>
    %311 = arith.select %308, %306, %310 : vector<8x512xi1>, vector<8x512xf32>
    %312 = arith.addf %311, %305 : vector<8x512xf32>
    %cst_111 = arith.constant dense<0.000000e+00> : vector<8x512xf32>
    %313 = tpu.matmul %7, %312, %cst_111 {dimension_numbers = #tpu.dot_dimension_numbers<[1], [0], [0], [1], [0, 0, 1, 1], [], []>} : vector<8x8xf32>, vector<8x512xf32>, vector<8x512xf32> -> vector<8x512xf32>
    %314 = vector.broadcast %8 : vector<8x1xf32> to vector<8x512xf32>
    %315 = arith.addf %313, %314 : vector<8x512xf32>
    %cst_112 = arith.constant dense<0.000000e+00> : vector<32x512xf32>
    %316 = tpu.matmul %9, %315, %cst_112 {dimension_numbers = #tpu.dot_dimension_numbers<[1], [0], [0], [1], [0, 0, 1, 1], [], []>} : vector<32x8xf32>, vector<8x512xf32>, vector<32x512xf32> -> vector<32x512xf32>
    %317 = vector.broadcast %10 : vector<32x1xf32> to vector<32x512xf32>
    %318 = arith.addf %316, %317 : vector<32x512xf32>
    %cst_113 = arith.constant 0.000000e+00 : f32
    %319 = vector.broadcast %cst_113 : f32 to vector<32x512xf32>
    %320 = arith.cmpf oge, %318, %319 : vector<32x512xf32>
    %cst_114 = arith.constant 0.00999999977 : f32
    %321 = vector.broadcast %cst_114 : f32 to vector<32x512xf32>
    %322 = arith.mulf %321, %318 : vector<32x512xf32>
    %323 = arith.select %320, %318, %322 : vector<32x512xi1>, vector<32x512xf32>
    %324 = vector.broadcast %11 : vector<32x1xf32> to vector<32x512xf32>
    %325 = arith.mulf %323, %324 : vector<32x512xf32>
    %cst_115 = arith.constant dense<0.000000e+00> : vector<512xf32>
    %326 = vector.multi_reduction <add>, %325, %cst_115 [0] : vector<32x512xf32> to vector<512xf32>
    %327 = vector.shape_cast %326 : vector<512xf32> to vector<1x512xf32>
    %328 = vector.broadcast %12 : vector<1x1xf32> to vector<1x512xf32>
    %329 = arith.addf %327, %328 : vector<1x512xf32>
    %c5 = arith.constant 5 : index
    %c0_116 = arith.constant 0 : index
    %330 = vector.load %arg3[%c5, %c0_116] : memref<8x512xf32, #tpu.memory_space<vmem>>, vector<1x512xf32>
    tpu.vector_store %arg3[%c5, %c0_116], %329 {strides = array<i32>} : memref<8x512xf32, #tpu.memory_space<vmem>>, vector<1x512xf32>,
    %c0_117 = arith.constant 0 : index
    %c3072 = arith.constant 3072 : index
    %331 = vector.load %arg1[%c0_117, %c3072] : memref<2x4096xf32, #tpu.memory_space<vmem>>, vector<1x512xf32>
    %c1_118 = arith.constant 1 : index
    %c3072_119 = arith.constant 3072 : index
    %332 = vector.load %arg1[%c1_118, %c3072_119] : memref<2x4096xf32, #tpu.memory_space<vmem>>, vector<1x512xf32>
    %333 = vector.broadcast %0 : vector<8x1xf32> to vector<8x512xf32>
    %334 = vector.broadcast %331 : vector<1x512xf32> to vector<8x512xf32>
    %335 = arith.mulf %333, %334 : vector<8x512xf32>
    %336 = vector.broadcast %1 : vector<8x1xf32> to vector<8x512xf32>
    %337 = vector.broadcast %332 : vector<1x512xf32> to vector<8x512xf32>
    %338 = arith.mulf %336, %337 : vector<8x512xf32>
    %339 = arith.addf %335, %338 : vector<8x512xf32>
    %340 = vector.broadcast %2 : vector<8x1xf32> to vector<8x512xf32>
    %341 = arith.addf %339, %340 : vector<8x512xf32>
    %cst_120 = arith.constant dense<0.000000e+00> : vector<8x512xf32>
    %342 = tpu.matmul %3, %341, %cst_120 {dimension_numbers = #tpu.dot_dimension_numbers<[1], [0], [0], [1], [0, 0, 1, 1], [], []>} : vector<8x8xf32>, vector<8x512xf32>, vector<8x512xf32> -> vector<8x512xf32>
    %343 = vector.broadcast %4 : vector<8x1xf32> to vector<8x512xf32>
    %344 = arith.addf %342, %343 : vector<8x512xf32>
    %345 = arith.mulf %344, %341 : vector<8x512xf32>
    %cst_121 = arith.constant 0.000000e+00 : f32
    %346 = vector.broadcast %cst_121 : f32 to vector<8x512xf32>
    %347 = arith.cmpf oge, %345, %346 : vector<8x512xf32>
    %cst_122 = arith.constant 0.00999999977 : f32
    %348 = vector.broadcast %cst_122 : f32 to vector<8x512xf32>
    %349 = arith.mulf %348, %345 : vector<8x512xf32>
    %350 = arith.select %347, %345, %349 : vector<8x512xi1>, vector<8x512xf32>
    %351 = arith.addf %350, %344 : vector<8x512xf32>
    %cst_123 = arith.constant dense<0.000000e+00> : vector<8x512xf32>
    %352 = tpu.matmul %5, %351, %cst_123 {dimension_numbers = #tpu.dot_dimension_numbers<[1], [0], [0], [1], [0, 0, 1, 1], [], []>} : vector<8x8xf32>, vector<8x512xf32>, vector<8x512xf32> -> vector<8x512xf32>
    %353 = vector.broadcast %6 : vector<8x1xf32> to vector<8x512xf32>
    %354 = arith.addf %352, %353 : vector<8x512xf32>
    %355 = arith.mulf %354, %341 : vector<8x512xf32>
    %cst_124 = arith.constant dense<0.000000e+00> : vector<8x512xf32>
    %356 = tpu.matmul %5, %355, %cst_124 {dimension_numbers = #tpu.dot_dimension_numbers<[1], [0], [0], [1], [0, 0, 1, 1], [], []>} : vector<8x8xf32>, vector<8x512xf32>, vector<8x512xf32> -> vector<8x512xf32>
    %357 = vector.broadcast %6 : vector<8x1xf32> to vector<8x512xf32>
    %358 = arith.addf %356, %357 : vector<8x512xf32>
    %359 = arith.mulf %358, %341 : vector<8x512xf32>
    %cst_125 = arith.constant 0.000000e+00 : f32
    %360 = vector.broadcast %cst_125 : f32 to vector<8x512xf32>
    %361 = arith.cmpf oge, %359, %360 : vector<8x512xf32>
    %cst_126 = arith.constant 0.00999999977 : f32
    %362 = vector.broadcast %cst_126 : f32 to vector<8x512xf32>
    %363 = arith.mulf %362, %359 : vector<8x512xf32>
    %364 = arith.select %361, %359, %363 : vector<8x512xi1>, vector<8x512xf32>
    %365 = arith.addf %364, %358 : vector<8x512xf32>
    %cst_127 = arith.constant dense<0.000000e+00> : vector<8x512xf32>
    %366 = tpu.matmul %7, %365, %cst_127 {dimension_numbers = #tpu.dot_dimension_numbers<[1], [0], [0], [1], [0, 0, 1, 1], [], []>} : vector<8x8xf32>, vector<8x512xf32>, vector<8x512xf32> -> vector<8x512xf32>
    %367 = vector.broadcast %8 : vector<8x1xf32> to vector<8x512xf32>
    %368 = arith.addf %366, %367 : vector<8x512xf32>
    %cst_128 = arith.constant dense<0.000000e+00> : vector<32x512xf32>
    %369 = tpu.matmul %9, %368, %cst_128 {dimension_numbers = #tpu.dot_dimension_numbers<[1], [0], [0], [1], [0, 0, 1, 1], [], []>} : vector<32x8xf32>, vector<8x512xf32>, vector<32x512xf32> -> vector<32x512xf32>
    %370 = vector.broadcast %10 : vector<32x1xf32> to vector<32x512xf32>
    %371 = arith.addf %369, %370 : vector<32x512xf32>
    %cst_129 = arith.constant 0.000000e+00 : f32
    %372 = vector.broadcast %cst_129 : f32 to vector<32x512xf32>
    %373 = arith.cmpf oge, %371, %372 : vector<32x512xf32>
    %cst_130 = arith.constant 0.00999999977 : f32
    %374 = vector.broadcast %cst_130 : f32 to vector<32x512xf32>
    %375 = arith.mulf %374, %371 : vector<32x512xf32>
    %376 = arith.select %373, %371, %375 : vector<32x512xi1>, vector<32x512xf32>
    %377 = vector.broadcast %11 : vector<32x1xf32> to vector<32x512xf32>
    %378 = arith.mulf %376, %377 : vector<32x512xf32>
    %cst_131 = arith.constant dense<0.000000e+00> : vector<512xf32>
    %379 = vector.multi_reduction <add>, %378, %cst_131 [0] : vector<32x512xf32> to vector<512xf32>
    %380 = vector.shape_cast %379 : vector<512xf32> to vector<1x512xf32>
    %381 = vector.broadcast %12 : vector<1x1xf32> to vector<1x512xf32>
    %382 = arith.addf %380, %381 : vector<1x512xf32>
    %c6 = arith.constant 6 : index
    %c0_132 = arith.constant 0 : index
    %383 = vector.load %arg3[%c6, %c0_132] : memref<8x512xf32, #tpu.memory_space<vmem>>, vector<1x512xf32>
    tpu.vector_store %arg3[%c6, %c0_132], %382 {strides = array<i32>} : memref<8x512xf32, #tpu.memory_space<vmem>>, vector<1x512xf32>,
    %c0_133 = arith.constant 0 : index
    %c3584 = arith.constant 3584 : index
    %384 = vector.load %arg1[%c0_133, %c3584] : memref<2x4096xf32, #tpu.memory_space<vmem>>, vector<1x512xf32>
    %c1_134 = arith.constant 1 : index
    %c3584_135 = arith.constant 3584 : index
    %385 = vector.load %arg1[%c1_134, %c3584_135] : memref<2x4096xf32, #tpu.memory_space<vmem>>, vector<1x512xf32>
    %386 = vector.broadcast %0 : vector<8x1xf32> to vector<8x512xf32>
    %387 = vector.broadcast %384 : vector<1x512xf32> to vector<8x512xf32>
    %388 = arith.mulf %386, %387 : vector<8x512xf32>
    %389 = vector.broadcast %1 : vector<8x1xf32> to vector<8x512xf32>
    %390 = vector.broadcast %385 : vector<1x512xf32> to vector<8x512xf32>
    %391 = arith.mulf %389, %390 : vector<8x512xf32>
    %392 = arith.addf %388, %391 : vector<8x512xf32>
    %393 = vector.broadcast %2 : vector<8x1xf32> to vector<8x512xf32>
    %394 = arith.addf %392, %393 : vector<8x512xf32>
    %cst_136 = arith.constant dense<0.000000e+00> : vector<8x512xf32>
    %395 = tpu.matmul %3, %394, %cst_136 {dimension_numbers = #tpu.dot_dimension_numbers<[1], [0], [0], [1], [0, 0, 1, 1], [], []>} : vector<8x8xf32>, vector<8x512xf32>, vector<8x512xf32> -> vector<8x512xf32>
    %396 = vector.broadcast %4 : vector<8x1xf32> to vector<8x512xf32>
    %397 = arith.addf %395, %396 : vector<8x512xf32>
    %398 = arith.mulf %397, %394 : vector<8x512xf32>
    %cst_137 = arith.constant 0.000000e+00 : f32
    %399 = vector.broadcast %cst_137 : f32 to vector<8x512xf32>
    %400 = arith.cmpf oge, %398, %399 : vector<8x512xf32>
    %cst_138 = arith.constant 0.00999999977 : f32
    %401 = vector.broadcast %cst_138 : f32 to vector<8x512xf32>
    %402 = arith.mulf %401, %398 : vector<8x512xf32>
    %403 = arith.select %400, %398, %402 : vector<8x512xi1>, vector<8x512xf32>
    %404 = arith.addf %403, %397 : vector<8x512xf32>
    %cst_139 = arith.constant dense<0.000000e+00> : vector<8x512xf32>
    %405 = tpu.matmul %5, %404, %cst_139 {dimension_numbers = #tpu.dot_dimension_numbers<[1], [0], [0], [1], [0, 0, 1, 1], [], []>} : vector<8x8xf32>, vector<8x512xf32>, vector<8x512xf32> -> vector<8x512xf32>
    %406 = vector.broadcast %6 : vector<8x1xf32> to vector<8x512xf32>
    %407 = arith.addf %405, %406 : vector<8x512xf32>
    %408 = arith.mulf %407, %394 : vector<8x512xf32>
    %cst_140 = arith.constant dense<0.000000e+00> : vector<8x512xf32>
    %409 = tpu.matmul %5, %408, %cst_140 {dimension_numbers = #tpu.dot_dimension_numbers<[1], [0], [0], [1], [0, 0, 1, 1], [], []>} : vector<8x8xf32>, vector<8x512xf32>, vector<8x512xf32> -> vector<8x512xf32>
    %410 = vector.broadcast %6 : vector<8x1xf32> to vector<8x512xf32>
    %411 = arith.addf %409, %410 : vector<8x512xf32>
    %412 = arith.mulf %411, %394 : vector<8x512xf32>
    %cst_141 = arith.constant 0.000000e+00 : f32
    %413 = vector.broadcast %cst_141 : f32 to vector<8x512xf32>
    %414 = arith.cmpf oge, %412, %413 : vector<8x512xf32>
    %cst_142 = arith.constant 0.00999999977 : f32
    %415 = vector.broadcast %cst_142 : f32 to vector<8x512xf32>
    %416 = arith.mulf %415, %412 : vector<8x512xf32>
    %417 = arith.select %414, %412, %416 : vector<8x512xi1>, vector<8x512xf32>
    %418 = arith.addf %417, %411 : vector<8x512xf32>
    %cst_143 = arith.constant dense<0.000000e+00> : vector<8x512xf32>
    %419 = tpu.matmul %7, %418, %cst_143 {dimension_numbers = #tpu.dot_dimension_numbers<[1], [0], [0], [1], [0, 0, 1, 1], [], []>} : vector<8x8xf32>, vector<8x512xf32>, vector<8x512xf32> -> vector<8x512xf32>
    %420 = vector.broadcast %8 : vector<8x1xf32> to vector<8x512xf32>
    %421 = arith.addf %419, %420 : vector<8x512xf32>
    %cst_144 = arith.constant dense<0.000000e+00> : vector<32x512xf32>
    %422 = tpu.matmul %9, %421, %cst_144 {dimension_numbers = #tpu.dot_dimension_numbers<[1], [0], [0], [1], [0, 0, 1, 1], [], []>} : vector<32x8xf32>, vector<8x512xf32>, vector<32x512xf32> -> vector<32x512xf32>
    %423 = vector.broadcast %10 : vector<32x1xf32> to vector<32x512xf32>
    %424 = arith.addf %422, %423 : vector<32x512xf32>
    %cst_145 = arith.constant 0.000000e+00 : f32
    %425 = vector.broadcast %cst_145 : f32 to vector<32x512xf32>
    %426 = arith.cmpf oge, %424, %425 : vector<32x512xf32>
    %cst_146 = arith.constant 0.00999999977 : f32
    %427 = vector.broadcast %cst_146 : f32 to vector<32x512xf32>
    %428 = arith.mulf %427, %424 : vector<32x512xf32>
    %429 = arith.select %426, %424, %428 : vector<32x512xi1>, vector<32x512xf32>
    %430 = vector.broadcast %11 : vector<32x1xf32> to vector<32x512xf32>
    %431 = arith.mulf %429, %430 : vector<32x512xf32>
    %cst_147 = arith.constant dense<0.000000e+00> : vector<512xf32>
    %432 = vector.multi_reduction <add>, %431, %cst_147 [0] : vector<32x512xf32> to vector<512xf32>
    %433 = vector.shape_cast %432 : vector<512xf32> to vector<1x512xf32>
    %434 = vector.broadcast %12 : vector<1x1xf32> to vector<1x512xf32>
    %435 = arith.addf %433, %434 : vector<1x512xf32>
    %c7 = arith.constant 7 : index
    %c0_148 = arith.constant 0 : index
    %436 = vector.load %arg3[%c7, %c0_148] : memref<8x512xf32, #tpu.memory_space<vmem>>, vector<1x512xf32>
    tpu.vector_store %arg3[%c7, %c0_148], %435 {strides = array<i32>} : memref<8x512xf32, #tpu.memory_space<vmem>>, vector<1x512xf32>,
    return
  }
  func.func @transform_0(%arg0: i32) -> (i32, i32) {
    %c0_i32 = arith.constant 0 : i32
    %c0_i32_0 = arith.constant 0 : i32
    return %c0_i32, %arg0 : i32, i32
  }
  func.func @transform_1(%arg0: i32) -> (i32, i32) {
    %c0_i32 = arith.constant 0 : i32
    %c0_i32_0 = arith.constant 0 : i32
    %c0_i32_1 = arith.constant 0 : i32
    return %c0_i32, %c0_i32_0 : i32, i32
  }
  func.func @transform_2(%arg0: i32) -> (i32, i32) {
    %c0_i32 = arith.constant 0 : i32
    %c0_i32_0 = arith.constant 0 : i32
    return %arg0, %c0_i32 : i32, i32
  }
}

</mosaic_0001>

<bundles_post_ra>
// kernel: tpu_custom_call.1
= control target key start
LH: loop header
LB: loop body
LE: loop exit
PB: predicated region body
PF: predicated region fallthrough
CT: control target
= control target key end

     0   :  { %7 = vsyncpa [#allocation3], 0  ;;  %s10524_s0 = inlined_call_operand.hbm [shape: f32[2,16384], index: 0, kind: input, shape index: {}]   ;;  %s10525_s1 = inlined_call_operand.vmem [shape: f32[96,9], index: 1, kind: input, shape index: {}]   ;;  %s10526_s2 = inlined_call_operand.hbm [shape: f32[32,512], index: 2, kind: output, shape index: {}]  }
   0x1   :  { %9 = vsyncpa [#allocation3 + $0x1], 0 }
   0x2   :  { %10 = vsyncpa [#allocation4], 0 }
   0x3   :  { %12 = vsyncpa [#allocation4 + $0x1], 0  ;;  %s8622_s9 = smov 0   ;;  %s8624_s10 = smov 0  }
   0x4   :  { %s8626_s11 = smov 0   ;;  %s8628_s12 = smov 0  }
   0x5 LB: > { %s8643_s13 = sadd.s32 4294967295, %s8597_s12   ;;  %s8253_s14 = sadd.s32 4294967294, %s8597_s12   ;;  %s8597_s12 = sphi %s8628_s12, %s10634_s12   ;;  %s8593_s11 = sphi %s8626_s11, %s10633_s11   ;;  %s8589_s10 = sphi %s8624_s10, %s10632_s10   ;;  %s8585_s9 = sphi %s8622_s9, %s10631_s9  }
   0x6   : > { %s8647_s15 = sadd.s32 1, %s8597_s12   ;;  %s25_s16 = sadd.s32 1, %s8593_s11 }
   0x7   : > { %s22_s17 = ssub.s32 %s8597_s12, %s8647_s15  ;;  %p32_p0 = scmp.ne.s32.totalorder %s8593_s11, %s8589_s10 }
   0x8   : > { %p23_p1 = scmp.eq.s32.totalorder %s22_s17, 0  ;;  %p33_p2 = scmp.eq.s32.totalorder %s8597_s12, 0 }
   0x9   : > { %p38_p3 = scmp.ne.s32.totalorder %s8589_s10, %s8585_s9  ;;  %p39_p4 = scmp.eq.s32.totalorder %s8643_s13, 0 }
   0xa   : > { %s8659_s18 = scalar_select %p23_p1, %s8593_s11, %s25_s16  }
   0xb   : > { %p8661_p5 = por %p33_p2, %p32_p0  ;;  %p8665_p6 = por %p39_p4, %p38_p3 }
   0xc   : > { %p83_p7 = scmp.eq.s32.totalorder %s8643_s13, 3  ;;  %p89_p8 = scmp.eq.s32.totalorder %s8253_s14, 3 }
   0xd   : > { %s10551_s20 = scalar_select %p8665_p6, 1, 0 }
   0xe   : > { %p8431_p9 = scmp.lt.s32.totalorder %s8597_s12, 4  ;;  %p8671_p10 = por %p83_p7, %p32_p0 }
   0xf   : > { %p8675_p11 = por %p89_p8, %p38_p3  ;;  %s112_s23 = sand.u32 1, %s8593_s11  }
  0x10   : > { %s10552_s21 = scalar_select %p8671_p10, 1, 0 }
  0x11   : > { %s10553_s22 = scalar_select %p8675_p11, 1, 0 }
  0x12   : > { %s8417_s24 = sshll.u32 %s8597_s12, 10  ;;  %s8256_s25 = sshll.u32 %s112_s23, 6 }
  0x13   : > { %s8684_s28 = scalar_lea.hbm %s10524_s0, %s8417_s24  ;;  %s116_s29 = scalar_lea.vmem [#allocation2], %s8256_s25 }
  0x14   : > { %s124_s30 = sshll.u32 %s116_s29, 4  ;;  %p8688_p12 = pnand %p8431_p9, %p8661_p5  ;;  %s8692_s30 = int_to_ptr.vmem [resolvable:$true] %s124_s30 }
  0x15   : > { %s113_s4 = scalar_lea.sflag [#allocation3], %s112_s23  ;;  %s8505_s5 = scalar_lea.hbm %s8684_s28, 1024 }
  0x16   : > { %p8506_p1 = scmp.ne.s32.totalorder %s8684_s28, %s8505_s5  ;;  %p8507_p2 = pneg %p8688_p12 }
  0x17   : > { %s8510_s8 = scalar_lea.hbm %s10524_s0, 4096  ;;  %p8511_p5 = scmp.lt.s32.totalorder %s8684_s28, %s10524_s0 }
  0x18   : > { %p8508_p3 = pnand %p8507_p2, %p8506_p1  ;;  %p8512_p7 = scmp.lt.s32.totalorder %s8510_s8, %s8505_s5 }
  0x1a   : > { %p8509_p4 = pneg %p8508_p3  ;;  %p8513_p8 = por %p8512_p7, %p8511_p5 }
  0x1c   : > { %p8514_p9 = pnand %p8513_p8, %p8509_p4 }
  0x1e   : > { %8517 = shalt.err (!%p8514_p9)
}
  0x1f   : > { %s8518_s17 = scalar_lea.vmem %s8692_s30, 1024  ;;  %s8599_s19 = smov [#allocation2]  }
  0x20   : > { %p8519_p13 = scmp.ne.s32.totalorder %s8692_s30, %s8518_s17  ;;  %s8523_s23 = sshll.u32 %s8599_s19, 4  ;;  %s8524_s23 = int_to_ptr.vmem [resolvable:$false] %s8523_s23 }
  0x21   : > { %s8525_s24 = scalar_lea.vmem %s8524_s23, 2048  ;;  %p8526_p3 = scmp.lt.s32.totalorder %s8692_s30, %s8524_s23 }
  0x22   : > { %p8521_p0 = pnand %p8519_p13, %p8507_p2  ;;  %p8527_p11 = scmp.lt.s32.totalorder %s8525_s24, %s8518_s17 }
  0x24   : > { %p8522_p1 = pneg %p8521_p0  ;;  %p8528_p10 = por %p8527_p11, %p8526_p3 }
  0x26   : > { %p8529_p6 = pnand %p8528_p10, %p8522_p1 }
  0x28   : > { %8532 = shalt.err (!%p8529_p6)
}
  0x29   : > { %8426 = dma.hbm_to_vmem [thread:$0]  (!%p8688_p12), %s8684_s28, 1024, %s8692_s30, %s113_s4  }
  0x2a   : > { %p10555_p4 = scmp.lt.s32.totalorder %s8597_s12, 5  ;;  %p10556_p5 = scmp.ge.s32.totalorder %s8597_s12, 1 }
  0x2c   : > { %p130_p13 = pnand %p10556_p5, %p10555_p4 }
  0x2e   : > { %133 = sbr.rel (%p130_p13) target bundleno = 7110 (0x1bc6), region = 28 }
  0x33   : > { %s8719_s25 = sand.u32 1, %s8589_s10   ;;  %p10557_p6 = scmp.ne.s32.totalorder %s10551_s20, 0 }
  0x34   : > { %s8260_s26 = sshll.u32 %s8719_s25, 6  ;;  %s136_s27 = scalar_lea.sflag [#allocation3], %s8719_s25 }
  0x35   : > { %s8723_s29 = scalar_lea.vmem [#allocation2], %s8260_s26 }
  0x36   : > { %8576 = dma.done.wait (%p10557_p6), %s136_s27, 1024  }
  0x37   : > { %8578 = vsyncadd (%p10557_p6), %s136_s27, 4294966272  ;;  %v10532_v0 = vmov 0   ;;  %v8601_v1 = vmov 2   ;;  %v161_v2 = vld [vmem:[%s10525_s1] sm:$0xff]  ;;  %v10530_v3 = vmov 1   ;;  %v10533_v4 = vmov 0.0  }
  0x38   : > { %8471 = vset.pattern.permute.xlu0 %v10532_v0  ;;  %8473 = vset.pattern.permute.xlu1 %v8601_v1  ;;  %v8739_v5 = vld [vmem:[%s10525_s1 + $0x8] sm:$0xff]  ;;  %v8604_v6 = vmov 8   ;;  %v8745_v7 = vld [vmem:[%s10525_s1 + $0x10] sm:$0xff]  ;;  %v8751_v8 = vld [vmem:[%s10525_s1 + $0x20] sm:$0xff]  ;;  %v10529_v11 = vlaneseq  ;;  %vm253_vm0 = vcmask 64512   ;;  %s8261_s16 = sshll.u32 %s8719_s25, 5 }
  0x39   : > { %179 = vperm.xlu0 %8471, %v161_v2   ;;  %241 = vperm.xlu1 %8473, %v161_v2   ;;  %v8757_v9 = vld [vmem:[%s10525_s1 + $0x28] sm:$0xff]  ;;  %v8763_v10 = vld [vmem:[%s10525_s1 + $0x38] sm:$0xff]  ;;  %v8783_v17 = vld [vmem:[%s8723_s29] ss:$2 sm:$0xf]  ;;  %s9547_s17 = scalar_lea.vmem [#allocation5], %s8261_s16 }
  0x3a   : > { %320 = vmatprep.mubr.f32.mxu0 %v10533_v4  ;;  %391 = vmatprep.mubr.f32.mxu1 %v10533_v4  ;;  %v8768_v12 = vshrl.u32 %v10529_v11, 7  ;;  %v8786_v18 = vld [vmem:[%s8723_s29 + $0x1] ss:$2 sm:$0xf]  ;;  %s8418_s8 = sshll.u32 %s8643_s13, 9  ;;  %s8183_s14 = sshll.u32 %s9547_s17, 4  ;;  %s8184_s14 = int_to_ptr.vmem [resolvable:$true] %s8183_s14 }
  0x3b   : > { %v8789_v19 = vld [vmem:[%s8723_s29 + $0x8] ss:$2 sm:$0xf]  ;;  %v8792_v20 = vld [vmem:[%s8723_s29 + $0x9] ss:$2 sm:$0xf]  ;;  %s8181_s23 = scalar_lea.hbm %s10526_s2, %s8418_s8 }
  0x3c   : > { %v8771_v13 = vsub.s32 1, %v8768_v12  ;;  %v8774_v14 = vsub.s32 3, %v8768_v12  ;;  %v8777_v15 = vsub.s32 0, %v8768_v12  ;;  %v8780_v16 = vsub.s32 2, %v8768_v12  ;;  %s8169_s24 = scalar_lea.sflag [#allocation4], %s8719_s25  ;;  %s8533_s26 = scalar_lea.vmem %s8184_s14, 512 }
  0x3d   : > { %8472 = vset.pattern.permute.xlu0 %v10530_v3  ;;  %8474 = vset.pattern.permute.xlu1 %v8604_v6  ;;  %v8811_v29 = vld [vmem:[%s8723_s29 + $0x10] ss:$2 sm:$0xf]  ;;  %v8814_v30 = vld [vmem:[%s8723_s29 + $0x11] ss:$2 sm:$0xf]  ;;  %p8534_p10 = scmp.ne.s32.totalorder %s8184_s14, %s8533_s26 }
  0x3e   : > { %208 = vperm.xlu0 %8472, %v161_v2   ;;  %250 = vperm.xlu1 %8474, %v8739_v5   ;;  %v190_v21 = vrot.slane %v8783_v17, %v8771_v13  ;;  %v219_v22 = vrot.slane %v8786_v18, %v8771_v13  ;;  %v198_v23 = vrot.slane %v8783_v17, %v8774_v14  ;;  %v8833_v39 = vld [vmem:[%s8723_s29 + $0x18] ss:$2 sm:$0xf]  ;;  %v8844_v44 = vld [vmem:[%s8723_s29 + $0x19] ss:$2 sm:$0xf] }
  0x3f   : > { %v186_v24 = vrot.slane %v8783_v17, %v8777_v15  ;;  %v227_v25 = vrot.slane %v8786_v18, %v8774_v14  ;;  %v215_v26 = vrot.slane %v8786_v18, %v8777_v15  ;;  %v194_v27 = vrot.slane %v8783_v17, %v8780_v16  ;;  %v8855_v49 = vld [vmem:[%s8723_s29 + $0x20] ss:$2 sm:$0xf]  ;;  %v8866_v54 = vld [vmem:[%s8723_s29 + $0x21] ss:$2 sm:$0xf] }
  0x40   : > { %v223_v28 = vrot.slane %v8786_v18, %v8780_v16  ;;  %v1264_v31 = vrot.slane %v8789_v19, %v8771_v13  ;;  %v1289_v32 = vrot.slane %v8792_v20, %v8771_v13  ;;  %v1272_v33 = vrot.slane %v8789_v19, %v8774_v14  ;;  %v8877_v59 = vld [vmem:[%s8723_s29 + $0x28] ss:$2 sm:$0xf]  ;;  %v8888_v1 = vld [vmem:[%s8723_s29 + $0x29] ss:$2 sm:$0xf] }
  0x41   : > { %v1297_v34 = vrot.slane %v8792_v20, %v8774_v14  ;;  %v1260_v35 = vrot.slane %v8789_v19, %v8777_v15  ;;  %v1285_v36 = vrot.slane %v8792_v20, %v8777_v15  ;;  %v1268_v37 = vrot.slane %v8789_v19, %v8780_v16  ;;  %v8899_v3 = vld [vmem:[%s8723_s29 + $0x30] ss:$2 sm:$0xf]  ;;  %v8910_v58 = vld [vmem:[%s8723_s29 + $0x31] ss:$2 sm:$0xf] }
  0x42   : > { %8475 = vset.pattern.permute.xlu0 %v8604_v6  ;;  %420 = vperm.xlu1 %8474, %v8745_v7   ;;  %v1293_v38 = vrot.slane %v8792_v20, %v8780_v16  ;;  %v2252_v40 = vrot.slane %v8811_v29, %v8771_v13  ;;  %v2277_v41 = vrot.slane %v8814_v30, %v8771_v13  ;;  %v8921_v57 = vld [vmem:[%s8723_s29 + $0x38] ss:$2 sm:$0xf]  ;;  %v8932_v4 = vld [vmem:[%s8723_s29 + $0x39] ss:$2 sm:$0xf] }
  0x43   : > { %v2260_v42 = vrot.slane %v8811_v29, %v8774_v14  ;;  %v2248_v45 = vrot.slane %v8811_v29, %v8777_v15  ;;  %v2256_v47 = vrot.slane %v8811_v29, %v8780_v16  ;;  %v3240_v50 = vrot.slane %v8833_v39, %v8771_v13  ;;  %p10629_p11 = scmp.ne.s32.totalorder %s10552_s21, 0  ;;  %s8606_s27 = smov [#allocation5]  }
  0x44   : > { %v3248_v51 = vrot.slane %v8833_v39, %v8774_v14  ;;  %v3236_v52 = vrot.slane %v8833_v39, %v8777_v15  ;;  %v3244_v53 = vrot.slane %v8833_v39, %v8780_v16  ;;  %v4228_v60 = vrot.slane %v8855_v49, %v8771_v13  ;;  %s8537_s13 = sshll.u32 %s8606_s27, 4  ;;  %s8538_s13 = int_to_ptr.vmem [resolvable:$false] %s8537_s13 }
  0x45   : > { %v4236_v61 = vrot.slane %v8855_v49, %v8774_v14  ;;  %v4224_v62 = vrot.slane %v8855_v49, %v8777_v15  ;;  %v4232_v63 = vrot.slane %v8855_v49, %v8780_v16  ;;  %p8535_p12 = pnand %p8534_p10, %p10629_p11  ;;  %s8539_s29 = scalar_lea.vmem %s8538_s13, 1024 }
  0x46   : > { %884 = vperm.xlu1 %8474, %v8751_v8   ;;  %p8540_p2 = scmp.lt.s32.totalorder %s8184_s14, %s8538_s13  ;;  %p8541_p7 = scmp.lt.s32.totalorder %s8539_s29, %s8533_s26 }
  0x47   : > { %p8536_p0 = pneg %p8535_p12 }
  0x48   : > { %p8542_p8 = por %p8541_p7, %p8540_p2 }
  0x4a   : > { %889 = vperm.xlu1 %8474, %v8757_v9   ;;  %p8543_p9 = pnand %p8542_p8, %p8536_p0 }
  0x4e   : > { %899 = vperm.xlu1 %8474, %v8763_v10  }
  0x52   : > { %8477 = vset.pattern.permute.xlu1 %v10532_v0 }
  0xb4   : > { %v8950_v55 = vpop.permute.xlu0 %179 }
  0xb5   : > { %v204_v56 = vmul.f32 %v190_v21, %v8950_v55  ;;  %v206_v49 = vmul.f32 %v198_v23, %v8950_v55  ;;  %v203_v6 = vmul.f32 %v186_v24, %v8950_v55  ;;  %v205_v39 = vmul.f32 %v194_v27, %v8950_v55 }
  0xb6   : > { %v1278_v21 = vmul.f32 %v1264_v31, %v8950_v55  ;;  %v1280_v23 = vmul.f32 %v1272_v33, %v8950_v55  ;;  %v1277_v24 = vmul.f32 %v1260_v35, %v8950_v55  ;;  %v1279_v17 = vmul.f32 %v1268_v37, %v8950_v55 }
  0xb7   : > { %v2266_v27 = vmul.f32 %v2252_v40, %v8950_v55  ;;  %v2268_v31 = vmul.f32 %v2260_v42, %v8950_v55  ;;  %v2265_v33 = vmul.f32 %v2248_v45, %v8950_v55  ;;  %v2267_v19 = vmul.f32 %v2256_v47, %v8950_v55 }
  0xb8   : > { %v3254_v35 = vmul.f32 %v3240_v50, %v8950_v55  ;;  %v3256_v37 = vmul.f32 %v3248_v51, %v8950_v55  ;;  %v3253_v40 = vmul.f32 %v3236_v52, %v8950_v55  ;;  %v9012_v11 = vmul.f32 %v3244_v53, %v8950_v55 }
  0xb9   : > { %v9014_v42 = vpop.permute.xlu0 %208  ;;  %v9017_v2 = vmul.f32 %v4228_v60, %v8950_v55  ;;  %v9020_v45 = vmul.f32 %v4236_v61, %v8950_v55  ;;  %v9023_v29 = vmul.f32 %v4224_v62, %v8950_v55  ;;  %v9026_v47 = vmul.f32 %v4232_v63, %v8950_v55  ;;  %v9044_v60 = vpop.permute.xlu1 %241 }
  0xba   : > { %v233_v50 = vmul.f32 %v219_v22, %v9014_v42  ;;  %v235_v51 = vmul.f32 %v227_v25, %v9014_v42  ;;  %v232_v52 = vmul.f32 %v215_v26, %v9014_v42  ;;  %v234_v53 = vmul.f32 %v223_v28, %v9014_v42 }
  0xbb   : > { %v1303_v22 = vmul.f32 %v1289_v32, %v9014_v42  ;;  %v1305_v25 = vmul.f32 %v1297_v34, %v9014_v42  ;;  %v1302_v26 = vmul.f32 %v1285_v36, %v9014_v42  ;;  %v1304_v18 = vmul.f32 %v1293_v38, %v9014_v42 }
  0xbc   : > { %v237_v28 = vadd.f32 %v233_v50, %v204_v56  ;;  %v239_v61 = vadd.f32 %v235_v51, %v206_v49  ;;  %v236_v62 = vadd.f32 %v232_v52, %v203_v6  ;;  %v238_v63 = vadd.f32 %v234_v53, %v205_v39 }
  0xbd   : > { %v1307_v32 = vadd.f32 %v1303_v22, %v1278_v21  ;;  %v1309_v0 = vadd.f32 %v1305_v25, %v1280_v23  ;;  %v1306_v48 = vadd.f32 %v1302_v26, %v1277_v24  ;;  %v1308_v46 = vadd.f32 %v1304_v18, %v1279_v17 }
  0xbe   : > { %v9063_v34 = vadd.f32 %v9044_v60, %v237_v28  ;;  %v9066_v43 = vadd.f32 %v9044_v60, %v239_v61  ;;  %v9069_v36 = vadd.f32 %v9044_v60, %v236_v62  ;;  %v9072_v20 = vadd.f32 %v9044_v60, %v238_v63 }
  0xbf   : > { %v9075_v38 = vadd.f32 %v1307_v32, %v9044_v60  ;;  %v9078_v56 = vadd.f32 %v1309_v0, %v9044_v60  ;;  %v9081_v6 = vadd.f32 %v1306_v48, %v9044_v60  ;;  %v9084_v39 = vadd.f32 %v1308_v46, %v9044_v60 }
  0xc0   : > { %286 = vmatprep.subr.mxu0 %v9063_v34  ;;  %357 = vmatprep.subr.mxu1 %v9066_v43  ;;  %v2291_v49 = vmul.f32 %v2277_v41, %v9014_v42  ;;  %v10558_v0 = vrot.slane %v8814_v30, %v8774_v14  ;;  %v10559_v48 = vrot.slane %v8814_v30, %v8777_v15  ;;  %v10563_v22 = vmov 0.0  }
  0xc1   : > { %287 = vmatpush1.msra.mxu0 %v9069_v36  ;;  %358 = vmatpush1.msra.mxu1 %v9072_v20  ;;  %v10560_v23 = vrot.slane %v8814_v30, %v8780_v16  ;;  %v10561_v41 = vrot.slane %v8844_v44, %v8771_v13  ;;  %v10562_v50 = vrot.slane %v8844_v44, %v8774_v14 }
  0xc2   : > { %v2293_v21 = vmul.f32 %v10558_v0, %v9014_v42  ;;  %v2290_v46 = vmul.f32 %v10559_v48, %v9014_v42  ;;  %8263 = vmatmul.mubr.msk.f32.vlgmr.msra.gmra.mxu0 %vm253_vm0, %v8739_v5  ;;  %8264 = vmatmul.mubr.msk.f32.vlgmr.msra.gmra.mxu1 %vm253_vm0, %v8739_v5  ;;  %v2295_v52 = vadd.f32 %v2291_v49, %v2266_v27 }
  0xc3   : > { %v2292_v24 = vmul.f32 %v10560_v23, %v9014_v42  ;;  %v3279_v17 = vmul.f32 %v10561_v41, %v9014_v42  ;;  %v3281_v51 = vmul.f32 %v10562_v50, %v9014_v42  ;;  %489 = vmatprep.mubr.f32.mxu0 %v10563_v22  ;;  %560 = vmatprep.mubr.f32.mxu1 %v10563_v22 }
  0xc4   : > { %v2297_v53 = vadd.f32 %v2293_v21, %v2268_v31  ;;  %v2294_v30 = vadd.f32 %v2290_v46, %v2265_v33  ;;  %v9121_v28 = vadd.f32 %v2295_v52, %v9044_v60  ;;  %v10564_v27 = vrot.slane %v8844_v44, %v8777_v15 }
  0xc5   : > { %v2296_v25 = vadd.f32 %v2292_v24, %v2267_v19  ;;  %v3283_v26 = vadd.f32 %v3279_v17, %v3254_v35  ;;  %v3285_v18 = vadd.f32 %v3281_v51, %v3256_v37  ;;  %v10565_v37 = vrot.slane %v8844_v44, %v8780_v16 }
  0xc6   : > { %v9124_v61 = vadd.f32 %v2297_v53, %v9044_v60  ;;  %v9127_v62 = vadd.f32 %v2294_v30, %v9044_v60  ;;  %v3278_v31 = vmul.f32 %v10564_v27, %v9014_v42  ;;  %v10566_v49 = vrot.slane %v8866_v54, %v8771_v13 }
  0xc7   : > { %v9134_v33 = vadd.f32 %v2296_v25, %v9044_v60  ;;  %v9137_v19 = vadd.f32 %v3283_v26, %v9044_v60  ;;  %v9140_v35 = vadd.f32 %v3285_v18, %v9044_v60  ;;  %v3280_v63 = vmul.f32 %v10565_v37, %v9014_v42 }
  0xc8   : > { %v3282_v32 = vadd.f32 %v3278_v31, %v3253_v40  ;;  %v4267_v0 = vmul.f32 %v10566_v49, %v9014_v42  ;;  %v10567_v21 = vrot.slane %v8866_v54, %v8774_v14  ;;  %v10568_v46 = vrot.slane %v8866_v54, %v8777_v15 }
  0xc9   : > { %v3284_v24 = vadd.f32 %v3280_v63, %v9012_v11  ;;  %v10569_v44 = vrot.slane %v8866_v54, %v8780_v16  ;;  %v10570_v41 = vrot.slane %v8877_v59, %v8771_v13  ;;  %v10571_v50 = vrot.slane %v8888_v1, %v8771_v13 }
  0xca   : > { %v4269_v48 = vmul.f32 %v10567_v21, %v9014_v42  ;;  %v4266_v23 = vmul.f32 %v10568_v46, %v9014_v42  ;;  %v9172_v52 = vadd.f32 %v3282_v32, %v9044_v60  ;;  %v4271_v11 = vadd.f32 %v4267_v0, %v9017_v2 }
  0xcb   : > { %v4268_v40 = vmul.f32 %v10569_v44, %v9014_v42  ;;  %v5230_v17 = vmul.f32 %v10570_v41, %v8950_v55  ;;  %v5255_v51 = vmul.f32 %v10571_v50, %v9014_v42  ;;  %v9178_v30 = vadd.f32 %v3284_v24, %v9044_v60 }
  0xcc   : > { %v4273_v53 = vadd.f32 %v4269_v48, %v9020_v45  ;;  %v4270_v54 = vadd.f32 %v4266_v23, %v9023_v29  ;;  %v10572_v18 = vrot.slane %v8877_v59, %v8774_v14  ;;  %v9186_v31 = vadd.f32 %v4271_v11, %v9044_v60 }
  0xcd   : > { %v4272_v25 = vadd.f32 %v4268_v40, %v9026_v47  ;;  %v5259_v26 = vadd.f32 %v5255_v51, %v5230_v17  ;;  %v10575_v29 = vrot.slane %v8888_v1, %v8774_v14  ;;  %v10578_v32 = vrot.slane %v8877_v59, %v8777_v15 }
  0xce   : > { %v5232_v27 = vmul.f32 %v10572_v18, %v8950_v55  ;;  %v9189_v2 = vadd.f32 %v4273_v53, %v9044_v60  ;;  %v9192_v45 = vadd.f32 %v4270_v54, %v9044_v60  ;;  %v10579_v0 = vrot.slane %v8888_v1, %v8777_v15 }
  0xcf   : > { %v5257_v47 = vmul.f32 %v10575_v29, %v9014_v42  ;;  %v9199_v37 = vadd.f32 %v4272_v25, %v9044_v60  ;;  %v9202_v63 = vadd.f32 %v5259_v26, %v9044_v60  ;;  %v5229_v49 = vmul.f32 %v10578_v32, %v8950_v55 }
  0xd0   : > { %10573 = vst [vmem:[#allocation8_spill] sm:$0xff] %v9189_v2  ;;  %10574 = vst [vmem:[#allocation9_spill] sm:$0xff] %v9192_v45  ;;  %v5254_v21 = vmul.f32 %v10579_v0, %v9014_v42  ;;  %v10580_v46 = vrot.slane %v8877_v59, %v8780_v16  ;;  %v10581_v24 = vrot.slane %v8888_v1, %v8780_v16 }
  0xd1   : > { %10576 = vst [vmem:[#allocation10_spill] sm:$0xff] %v9199_v37  ;;  %10577 = vst [vmem:[#allocation11_spill] sm:$0xff] %v9202_v63  ;;  %v5261_v48 = vadd.f32 %v5257_v47, %v5232_v27  ;;  %v10582_v40 = vrot.slane %v8899_v3, %v8771_v13  ;;  %v10583_v50 = vrot.slane %v8910_v58, %v8771_v13 }
  0xd2   : > { %v5231_v23 = vmul.f32 %v10580_v46, %v8950_v55  ;;  %v5256_v44 = vmul.f32 %v10581_v24, %v9014_v42  ;;  %v5258_v17 = vadd.f32 %v5254_v21, %v5229_v49  ;;  %v10584_v59 = vrot.slane %v8899_v3, %v8774_v14 }
  0xd3   : > { %v6218_v41 = vmul.f32 %v10582_v40, %v8950_v55  ;;  %v6243_v51 = vmul.f32 %v10583_v50, %v9014_v42  ;;  %v10585_v1 = vrot.slane %v8910_v58, %v8774_v14  ;;  %v9237_v54 = vadd.f32 %v5261_v48, %v9044_v60 }
  0xd4   : > { %v6220_v11 = vmul.f32 %v10584_v59, %v8950_v55  ;;  %v5260_v25 = vadd.f32 %v5256_v44, %v5231_v23  ;;  %v10587_v26 = vrot.slane %v8899_v3, %v8777_v15  ;;  %v10588_v27 = vrot.slane %v8910_v58, %v8777_v15 }
  0xd5   : > { %v6245_v53 = vmul.f32 %v10585_v1, %v9014_v42  ;;  %10586 = vst [vmem:[#allocation12_spill] sm:$0xff] %v9237_v54  ;;  %v9248_v47 = vadd.f32 %v5258_v17, %v9044_v60  ;;  %v6247_v32 = vadd.f32 %v6243_v51, %v6218_v41  ;;  %v10590_v0 = vrot.slane %v8899_v3, %v8780_v16 }
  0xd6   : > { %v6217_v18 = vmul.f32 %v10587_v26, %v8950_v55  ;;  %v6242_v29 = vmul.f32 %v10588_v27, %v9014_v42  ;;  %v9255_v48 = vadd.f32 %v5260_v25, %v9044_v60  ;;  %v10592_v23 = vrot.slane %v8910_v58, %v8780_v16 }
  0xd7   : > { %10589 = vst [vmem:[#allocation13_spill] sm:$0xff] %v9248_v47  ;;  %v6249_v49 = vadd.f32 %v6245_v53, %v6220_v11  ;;  %v6219_v21 = vmul.f32 %v10590_v0, %v8950_v55  ;;  %v10593_v44 = vrot.slane %v8921_v57, %v8771_v13  ;;  %v9266_v41 = vadd.f32 %v6247_v32, %v9044_v60 }
  0xd8   : > { %10591 = vst [vmem:[#allocation14_spill] sm:$0xff] %v9255_v48  ;;  %v6246_v46 = vadd.f32 %v6242_v29, %v6217_v18  ;;  %v6244_v24 = vmul.f32 %v10592_v23, %v9014_v42  ;;  %v10596_v17 = vrot.slane %v8932_v4, %v8771_v13  ;;  %v10597_v58 = vrot.slane %v8921_v57, %v8774_v14 }
  0xd9   : > { %v7206_v40 = vmul.f32 %v10593_v44, %v8950_v55  ;;  %10594 = vst [vmem:[#allocation15_spill] sm:$0xff] %v9266_v41  ;;  %v9269_v3 = vadd.f32 %v6249_v49, %v9044_v60  ;;  %v10599_v1 = vrot.slane %v8932_v4, %v8774_v14  ;;  %v10600_v25 = vrot.slane %v8921_v57, %v8777_v15 }
  0xda   : > { %v7231_v50 = vmul.f32 %v10596_v17, %v9014_v42  ;;  %v7208_v51 = vmul.f32 %v10597_v58, %v8950_v55  ;;  %v9280_v59 = vadd.f32 %v6246_v46, %v9044_v60  ;;  %v6248_v11 = vadd.f32 %v6244_v24, %v6219_v21 }
  0xdb   : > { %10595 = vst [vmem:[#allocation16_spill] sm:$0xff] %v9269_v3  ;;  %v7233_v53 = vmul.f32 %v10599_v1, %v9014_v42  ;;  %v7205_v13 = vmul.f32 %v10600_v25, %v8950_v55  ;;  %v10601_v18 = vrot.slane %v8932_v4, %v8777_v15  ;;  %v10602_v29 = vrot.slane %v8921_v57, %v8780_v16 }
  0xdc   : > { %10598 = vst [vmem:[#allocation17_spill] sm:$0xff] %v9280_v59  ;;  %v7235_v26 = vadd.f32 %v7231_v50, %v7206_v40  ;;  %v10603_v14 = vrot.slane %v8932_v4, %v8780_v16  ;;  %v9303_v0 = vadd.f32 %v6248_v11, %v9044_v60  ;;  %v9317_v4 = vpop.permute.xlu1 %250 }
  0xdd   : > { %v7230_v27 = vmul.f32 %v10601_v18, %v9014_v42  ;;  %v7207_v32 = vmul.f32 %v10602_v29, %v8950_v55  ;;  %v7237_v21 = vadd.f32 %v7233_v53, %v7208_v51 }
  0xde   : > { %v7232_v49 = vmul.f32 %v10603_v14, %v9014_v42  ;;  %10604 = vst [vmem:[#allocation18_spill] sm:$0xff] %v9303_v0  ;;  %v9306_v46 = vadd.f32 %v7235_v26, %v9044_v60 }
  0xdf   : > { %v7234_v23 = vadd.f32 %v7230_v27, %v7205_v13  ;;  %v9309_v24 = vadd.f32 %v7237_v21, %v9044_v60 }
  0xe0   : > { %10605 = vst [vmem:[#allocation19_spill] sm:$0xff] %v9306_v46  ;;  %v7236_v15 = vadd.f32 %v7232_v49, %v7207_v32 }
  0xe1   : > { %10606 = vst [vmem:[#allocation20_spill] sm:$0xff] %v9309_v24  ;;  %v9312_v57 = vadd.f32 %v7234_v23, %v9044_v60 }
  0xe2   : > { %v9315_v55 = vadd.f32 %v7236_v15, %v9044_v60 }
  0xe3   : > { %10607 = vst [vmem:[#allocation21_spill] sm:$0xff] %v9312_v57 }
  0xe4   : > { %10608 = vst [vmem:[#allocation22_spill] sm:$0xff] %v9315_v55 }
 0x182   : > { %v322_v16 = vpop.f32.mrf.mxu0  ;;  %v393_v42 = vpop.f32.mrf.mxu1 }
 0x183   : > { %v323_v44 = vadd.f32 %v322_v16, %v9317_v4  ;;  %v394_v40 = vadd.f32 %v393_v42, %v9317_v4  ;;  %v9333_v42 = vpop.permute.xlu1 %420 }
 0x184   : > { %v324_v17 = vpop.f32.mrf.mxu0  ;;  %v395_v50 = vpop.f32.mrf.mxu1 }
 0x185   : > { %v398_v58 = vmul.f32 %v323_v44, %v9069_v36  ;;  %v400_v51 = vmul.f32 %v394_v40, %v9072_v20  ;;  %v325_v11 = vadd.f32 %v324_v17, %v9317_v4  ;;  %v396_v1 = vadd.f32 %v395_v50, %v9317_v4 }
 0x187   : > { %v406_v60 = vmul.f32 0.01, %v398_v58  ;;  %vm402_vm1 = vcmp.ge.f32.partialorder %v398_v58, 0.0  ;;  %v408_v53 = vmul.f32 0.01, %v400_v51  ;;  %v399_v25 = vmul.f32 %v325_v11, %v9063_v34 }
 0x188   : > { %v401_v13 = vmul.f32 %v396_v1, %v9066_v43  ;;  %vm404_vm2 = vcmp.ge.f32.partialorder %v400_v51, 0.0 }
 0x189   : > { %vm403_vm3 = vcmp.ge.f32.partialorder %v399_v25, 0.0  ;;  %v407_v26 = vmul.f32 0.01, %v399_v25  ;;  %v410_v18 = vsel %vm402_vm1, %v398_v58, %v406_v60  ;;  %v412_v29 = vsel %vm404_vm2, %v400_v51, %v408_v53 }
 0x18a   : > { %vm405_vm4 = vcmp.ge.f32.partialorder %v401_v13, 0.0  ;;  %v409_v27 = vmul.f32 0.01, %v401_v13  ;;  %v414_v21 = vadd.f32 %v410_v18, %v323_v44  ;;  %v416_v15 = vadd.f32 %v412_v29, %v394_v40 }
 0x18b   : > { %v411_v32 = vsel %vm403_vm3, %v399_v25, %v407_v26  ;;  %v9358_v26 = vld [vmem:[%s10525_s1 + $0x30] sm:$0xff]  ;;  %v10609_v18 = vmov 0  }
 0x18c   : > { %v415_v14 = vadd.f32 %v411_v32, %v325_v11  ;;  %v413_v49 = vsel %vm405_vm4, %v401_v13, %v409_v27  ;;  %v9352_v13 = vld [vmem:[%s10525_s1 + $0x18] sm:$0xff] }
 0x18d   : > { %v417_v23 = vadd.f32 %v413_v49, %v396_v1  ;;  %735 = vperm.xlu0 %8475, %v9352_v13  }
 0x18e   : > { %455 = vmatprep.subr.mxu0 %v415_v14 }
 0x18f   : > { %526 = vmatprep.subr.mxu1 %v417_v23  ;;  %456 = vmatpush1.msra.mxu0 %v414_v21 }
 0x190   : > { %527 = vmatpush1.msra.mxu1 %v416_v15  ;;  %8265 = vmatmul.mubr.msk.f32.vlgmr.msra.gmra.mxu0 %vm253_vm0, %v8745_v7 }
 0x191   : > { %8266 = vmatmul.mubr.msk.f32.vlgmr.msra.gmra.mxu1 %vm253_vm0, %v8745_v7  ;;  %635 = vmatprep.mubr.f32.mxu0 %v10563_v22 }
 0x192   : > { %706 = vmatprep.mubr.f32.mxu1 %v10563_v22  ;;  %894 = vperm.xlu0 %8475, %v9358_v26  }
 0x196   : > { %8476 = vset.pattern.permute.xlu0 %v10609_v18 }
 0x250   : > { %v491_v16 = vpop.f32.mrf.mxu0 }
 0x251   : > { %v562_v44 = vpop.f32.mrf.mxu1  ;;  %v492_v40 = vadd.f32 %v491_v16, %v9333_v42 }
 0x252   : > { %v493_v17 = vpop.f32.mrf.mxu0  ;;  %v563_v50 = vadd.f32 %v562_v44, %v9333_v42 }
 0x253   : > { %v494_v58 = vadd.f32 %v493_v17, %v9333_v42  ;;  %v564_v51 = vpop.f32.mrf.mxu1  ;;  %v567_v60 = vmul.f32 %v492_v40, %v9069_v36 }
 0x254   : > { %v565_v11 = vadd.f32 %v564_v51, %v9333_v42  ;;  %v569_v25 = vmul.f32 %v563_v50, %v9072_v20 }
 0x255   : > { %v568_v1 = vmul.f32 %v494_v58, %v9063_v34 }
 0x256   : > { %v570_v53 = vmul.f32 %v565_v11, %v9066_v43 }
 0x257   : > { %601 = vmatprep.subr.mxu0 %v568_v1 }
 0x258   : > { %672 = vmatprep.subr.mxu1 %v570_v53  ;;  %602 = vmatpush1.msra.mxu0 %v567_v60 }
 0x259   : > { %673 = vmatpush1.msra.mxu1 %v569_v25  ;;  %8267 = vmatmul.mubr.msk.f32.vlgmr.msra.gmra.mxu0 %vm253_vm0, %v8745_v7 }
 0x25a   : > { %8268 = vmatmul.mubr.msk.f32.vlgmr.msra.gmra.mxu1 %vm253_vm0, %v8745_v7  ;;  %804 = vmatprep.mubr.f32.mxu0 %v10563_v22 }
 0x25b   : > { %875 = vmatprep.mubr.f32.mxu1 %v10563_v22 }
 0x319   : > { %v637_v7 = vpop.f32.mrf.mxu0 }
 0x31a   : > { %v638_v27 = vadd.f32 %v637_v7, %v9333_v42  ;;  %v708_v29 = vpop.f32.mrf.mxu1  ;;  %v171_v7 = vld [vmem:[%s10525_s1 + $0x50] sm:$0xff] }
 0x31b   : > { %v709_v32 = vadd.f32 %v708_v29, %v9333_v42  ;;  %v639_v14 = vpop.f32.mrf.mxu0  ;;  %v173_v29 = vld [vmem:[%s10525_s1 + $0x40] sm:$0x1] }
 0x31c   : > { %v713_v49 = vmul.f32 %v638_v27, %v9069_v36  ;;  %v640_v21 = vadd.f32 %v639_v14, %v9333_v42  ;;  %v710_v23 = vpop.f32.mrf.mxu1 }
 0x31d   : > { %v715_v15 = vmul.f32 %v709_v32, %v9072_v20  ;;  %v711_v16 = vadd.f32 %v710_v23, %v9333_v42 }
 0x31e   : > { %vm717_vm5 = vcmp.ge.f32.partialorder %v713_v49, 0.0  ;;  %v721_v44 = vmul.f32 0.01, %v713_v49  ;;  %v714_v40 = vmul.f32 %v640_v21, %v9063_v34  ;;  %v170_v34 = vld [vmem:[%s10525_s1 + $0x48] sm:$0xff] }
 0x31f   : > { %vm719_vm6 = vcmp.ge.f32.partialorder %v715_v15, 0.0  ;;  %v723_v17 = vmul.f32 0.01, %v715_v15  ;;  %v716_v50 = vmul.f32 %v711_v16, %v9066_v43  ;;  %v169_v43 = vld [vmem:[%s10525_s1 + $0x40] sm:$0xff]  ;;  %1143 = vperm.xlu1 %8477, %v170_v34  }
 0x320   : > { %vm718_vm7 = vcmp.ge.f32.partialorder %v714_v40, 0.0  ;;  %v722_v58 = vmul.f32 0.01, %v714_v40  ;;  %v725_v51 = vsel %vm717_vm5, %v713_v49, %v721_v44  ;;  %1138 = vperm.xlu0 %8476, %v169_v43  }
 0x321   : > { %vm720_vm8 = vcmp.ge.f32.partialorder %v716_v50, 0.0  ;;  %v724_v36 = vmul.f32 0.01, %v716_v50  ;;  %v727_v11 = vsel %vm719_vm6, %v715_v15, %v723_v17  ;;  %v729_v20 = vadd.f32 %v725_v51, %v638_v27  ;;  %v172_v27 = vld [vmem:[%s10525_s1 + $0x58] sm:$0xff] }
 0x322   : > { %v726_v1 = vsel %vm718_vm7, %v714_v40, %v722_v58  ;;  %v731_v18 = vadd.f32 %v727_v11, %v709_v32  ;;  %v10610_v32 = vmov 1  }
 0x323   : > { %v730_v60 = vadd.f32 %v726_v1, %v640_v21  ;;  %v728_v53 = vsel %vm720_vm8, %v716_v50, %v724_v36  ;;  %1148 = vperm.xlu1 %8477, %v171_v7   ;;  %v9393_v21 = vpop.permute.xlu0 %735 }
 0x324   : > { %v732_v25 = vadd.f32 %v728_v53, %v711_v16  ;;  %1153 = vperm.xlu0 %8476, %v172_v27  }
 0x325   : > { %770 = vmatprep.subr.mxu0 %v730_v60 }
 0x326   : > { %841 = vmatprep.subr.mxu1 %v732_v25  ;;  %771 = vmatpush1.msra.mxu0 %v729_v20 }
 0x327   : > { %842 = vmatpush1.msra.mxu1 %v731_v18  ;;  %8269 = vmatmul.mubr.msk.f32.vlgmr.msra.gmra.mxu0 %vm253_vm0, %v9352_v13 }
 0x328   : > { %8270 = vmatmul.mubr.msk.f32.vlgmr.msra.gmra.mxu1 %vm253_vm0, %v9352_v13  ;;  %974 = vmatprep.mubr.f32.mxu0 %v10563_v22 }
 0x329   : > { %1063 = vmatprep.mubr.f32.mxu1 %v10563_v22  ;;  %8478 = vset.pattern.permute.xlu1 %v10610_v32 }
 0x32a   : > { %8479 = vset.pattern.permute.xlu0 %v10610_v32  ;;  %1210 = vperm.xlu1 %8478, %v173_v29  }
 0x3e7   : > { %v806_v14 = vpop.f32.mrf.mxu0 }
 0x3e8   : > { %v877_v49 = vpop.f32.mrf.mxu1  ;;  %v807_v44 = vadd.f32 %v806_v14, %v9393_v21 }
 0x3e9   : > { %v808_v23 = vpop.f32.mrf.mxu0  ;;  %v878_v17 = vadd.f32 %v877_v49, %v9393_v21 }
 0x3ea   : > { %v809_v15 = vadd.f32 %v808_v23, %v9393_v21  ;;  %v879_v16 = vpop.f32.mrf.mxu1 }
 0x3eb   : > { %v880_v40 = vadd.f32 %v879_v16, %v9393_v21 }
 0x3ec   : > { %940 = vmatprep.subr.mxu0 %v809_v15  ;;  %v9448_v15 = vpop.permute.xlu0 %894 }
 0x3ed   : > { %1029 = vmatprep.subr.mxu1 %v880_v40  ;;  %941 = vmatpush1.msra.mxu0 %v807_v44 }
 0x3ee   : > { %1030 = vmatpush1.msra.mxu1 %v878_v17  ;;  %8271 = vmatmul.mubr.msk.f32.vlgmr.msra.gmra.mxu0 %vm253_vm0, %v8751_v8 }
 0x3ef   : > { %8275 = vmatmul.mubr.msk.f32.vlgmr.msra.gmra.mxu1 %vm253_vm0, %v8751_v8  ;;  %1344 = vmatprep.subr.mxu0 %v9075_v38  ;;  %v9433_v8 = vpop.permute.xlu1 %884 }
 0x3f0   : > { %1415 = vmatprep.subr.mxu1 %v9078_v56  ;;  %1345 = vmatpush1.msra.mxu0 %v9081_v6  ;;  %v9475_v0 = vpop.permute.xlu0 %1138 }
 0x3f1   : > { %1416 = vmatpush1.msra.mxu1 %v9084_v39  ;;  %980 = vmatprep.mubr.f32.mxu0 %v10563_v22 }
 0x3f2   : > { %1069 = vmatprep.mubr.f32.mxu1 %v10563_v22  ;;  %8272 = vmatmul.mubr.msk.f32.gmra.mxu0 %vm253_vm0, %v8757_v9 }
 0x3f3   : > { %8276 = vmatmul.mubr.msk.f32.gmra.mxu1 %vm253_vm0, %v8757_v9  ;;  %986 = vmatprep.mubr.f32.mxu0 %v10563_v22  ;;  %v9438_v60 = vpop.permute.xlu1 %889 }
 0x3f4   : > { %1075 = vmatprep.mubr.f32.mxu1 %v10563_v22  ;;  %v9501_v37 = vpop.permute.xlu0 %1153 }
 0x3f6   : > { %8273 = vmatmul.mubr.msk.f32.gmra.mxu0 %vm253_vm0, %v9358_v26 }
 0x3f7   : > { %8277 = vmatmul.mubr.msk.f32.gmra.mxu1 %vm253_vm0, %v9358_v26  ;;  %992 = vmatprep.mubr.f32.mxu0 %v10563_v22 }
 0x3f8   : > { %1081 = vmatprep.mubr.f32.mxu1 %v10563_v22 }
 0x3fa   : > { %8274 = vmatmul.mubr.msk.f32.gmra.mxu0 %vm253_vm0, %v8763_v10 }
 0x3fb   : > { %8278 = vmatmul.mubr.msk.f32.gmra.mxu1 %vm253_vm0, %v8763_v10  ;;  %1378 = vmatprep.mubr.f32.mxu0 %v10563_v22 }
 0x3fc   : > { %1449 = vmatprep.mubr.f32.mxu1 %v10563_v22 }
 0x3fe   : > { %8281 = vmatmul.mubr.msk.f32.vlgmr.msra.gmra.mxu0 %vm253_vm0, %v8739_v5 }
 0x3ff   : > { %8282 = vmatmul.mubr.msk.f32.vlgmr.msra.gmra.mxu1 %vm253_vm0, %v8739_v5  ;;  %1540 = vmatprep.mubr.f32.mxu0 %v10563_v22 }
 0x400   : > { %1611 = vmatprep.mubr.f32.mxu1 %v10563_v22 }
 0x4ae   : > { %v976_v9 = vpop.f32.mrf.mxu0 }
 0x4af   : > { %v977_v50 = vadd.f32 %v976_v9, %v9433_v8  ;;  %v1065_v10 = vpop.f32.mrf.mxu1 }
 0x4b0   : > { %v1066_v58 = vadd.f32 %v1065_v10, %v9433_v8  ;;  %v978_v51 = vpop.f32.mrf.mxu0 }
 0x4b1   : > { %vm1088_vm9 = vcmp.ge.f32.partialorder %v977_v50, 0.0  ;;  %v1104_v36 = vmul.f32 0.01, %v977_v50  ;;  %v979_v11 = vadd.f32 %v978_v51, %v9433_v8  ;;  %v1067_v1 = vpop.f32.mrf.mxu1 }
 0x4b2   : > { %vm1090_vm10 = vcmp.ge.f32.partialorder %v1066_v58, 0.0  ;;  %v1106_v5 = vmul.f32 0.01, %v1066_v58  ;;  %v1068_v53 = vadd.f32 %v1067_v1, %v9433_v8  ;;  %v982_v20 = vpop.f32.mrf.mxu0 }
 0x4b3   : > { %vm1089_vm11 = vcmp.ge.f32.partialorder %v979_v11, 0.0  ;;  %v1105_v25 = vmul.f32 0.01, %v979_v11  ;;  %v983_v18 = vadd.f32 %v982_v20, %v9438_v60  ;;  %v1071_v43 = vpop.f32.mrf.mxu1  ;;  %v9442_v34 = vsel %vm1088_vm9, %v977_v50, %v1104_v36 }
 0x4b4   : > { %vm1091_vm12 = vcmp.ge.f32.partialorder %v1068_v53, 0.0  ;;  %v1107_v7 = vmul.f32 0.01, %v1068_v53  ;;  %v1072_v27 = vadd.f32 %v1071_v43, %v9438_v60  ;;  %v984_v29 = vpop.f32.mrf.mxu0  ;;  %v9445_v32 = vsel %vm1090_vm10, %v1066_v58, %v1106_v5  ;;  %v9462_v43 = vpop.permute.xlu1 %899 }
 0x4b5   : > { %vm1092_vm13 = vcmp.ge.f32.partialorder %v983_v18, 0.0  ;;  %v1108_v14 = vmul.f32 0.01, %v983_v18  ;;  %v985_v49 = vadd.f32 %v984_v29, %v9438_v60  ;;  %v1073_v23 = vpop.f32.mrf.mxu1  ;;  %v9450_v16 = vsel %vm1089_vm11, %v979_v11, %v1105_v25 }
 0x4b6   : > { %vm1094_vm14 = vcmp.ge.f32.partialorder %v1072_v27, 0.0  ;;  %v1110_v44 = vmul.f32 0.01, %v1072_v27  ;;  %v1074_v40 = vadd.f32 %v1073_v23, %v9438_v60  ;;  %v988_v17 = vpop.f32.mrf.mxu0  ;;  %v9453_v9 = vsel %vm1091_vm12, %v1068_v53, %v1107_v7 }
 0x4b7   : > { %vm1093_vm15 = vcmp.ge.f32.partialorder %v985_v49, 0.0  ;;  %v1109_v50 = vmul.f32 0.01, %v985_v49  ;;  %v989_v10 = vadd.f32 %v988_v17, %v9448_v15  ;;  %v1077_v58 = vpop.f32.mrf.mxu1  ;;  %v9456_v51 = vsel %vm1092_vm13, %v983_v18, %v1108_v14 }
 0x4b8   : > { %vm1095_vm1 = vcmp.ge.f32.partialorder %v1074_v40, 0.0  ;;  %v1111_v36 = vmul.f32 0.01, %v1074_v40  ;;  %v1078_v1 = vadd.f32 %v1077_v58, %v9448_v15  ;;  %v990_v11 = vpop.f32.mrf.mxu0  ;;  %v9459_v5 = vsel %vm1094_vm14, %v1072_v27, %v1110_v44 }
 0x4b9   : > { %vm1096_vm2 = vcmp.ge.f32.partialorder %v989_v10, 0.0  ;;  %v1112_v20 = vmul.f32 0.01, %v989_v10  ;;  %v991_v25 = vadd.f32 %v990_v11, %v9448_v15  ;;  %v1079_v53 = vpop.f32.mrf.mxu1  ;;  %v9464_v7 = vsel %vm1093_vm15, %v985_v49, %v1109_v50 }
 0x4ba   : > { %vm1098_vm3 = vcmp.ge.f32.partialorder %v1078_v1, 0.0  ;;  %v1114_v29 = vmul.f32 0.01, %v1078_v1  ;;  %v1080_v18 = vadd.f32 %v1079_v53, %v9448_v15  ;;  %v994_v14 = vpop.f32.mrf.mxu0  ;;  %v9467_v23 = vsel %vm1095_vm1, %v1074_v40, %v1111_v36 }
 0x4bb   : > { %vm1097_vm4 = vcmp.ge.f32.partialorder %v991_v25, 0.0  ;;  %v1113_v17 = vmul.f32 0.01, %v991_v25  ;;  %v995_v27 = vadd.f32 %v994_v14, %v9462_v43  ;;  %v1083_v44 = vpop.f32.mrf.mxu1  ;;  %v9470_v58 = vsel %vm1096_vm2, %v989_v10, %v1112_v20 }
 0x4bc   : > { %vm1099_vm5 = vcmp.ge.f32.partialorder %v1080_v18, 0.0  ;;  %v1115_v11 = vmul.f32 0.01, %v1080_v18  ;;  %v1084_v55 = vadd.f32 %v1083_v44, %v9462_v43  ;;  %v996_v49 = vpop.f32.mrf.mxu0  ;;  %v1130_v50 = vsel %vm1098_vm3, %v1078_v1, %v1114_v29  ;;  %v9478_v1 = vpop.permute.xlu1 %1143 }
 0x4bd   : > { %vm1100_vm6 = vcmp.ge.f32.partialorder %v995_v27, 0.0  ;;  %v1116_v24 = vmul.f32 0.01, %v995_v27  ;;  %v997_v53 = vadd.f32 %v996_v49, %v9462_v43  ;;  %v1085_v57 = vpop.f32.mrf.mxu1  ;;  %v1129_v40 = vsel %vm1097_vm4, %v991_v25, %v1113_v17 }
 0x4be   : > { %vm1102_vm7 = vcmp.ge.f32.partialorder %v1084_v55, 0.0  ;;  %v1118_v36 = vmul.f32 0.01, %v1084_v55  ;;  %v1086_v46 = vadd.f32 %v1085_v57, %v9462_v43  ;;  %v1380_v14 = vpop.f32.mrf.mxu0  ;;  %v1131_v10 = vsel %vm1099_vm5, %v1080_v18, %v1115_v11 }
 0x4bf   : > { %vm1101_vm8 = vcmp.ge.f32.partialorder %v997_v53, 0.0  ;;  %v1117_v20 = vmul.f32 0.01, %v997_v53  ;;  %v1381_v44 = vadd.f32 %v1380_v14, %v9317_v4  ;;  %v1451_v3 = vpop.f32.mrf.mxu1  ;;  %v1132_v29 = vsel %vm1100_vm6, %v995_v27, %v1116_v24 }
 0x4c0   : > { %vm1103_vm9 = vcmp.ge.f32.partialorder %v1086_v46, 0.0  ;;  %v1119_v49 = vmul.f32 0.01, %v1086_v46  ;;  %v1452_v25 = vadd.f32 %v1451_v3, %v9317_v4  ;;  %v1382_v17 = vpop.f32.mrf.mxu0  ;;  %v1134_v57 = vsel %vm1102_vm7, %v1084_v55, %v1118_v36 }
 0x4c1   : > { %v1133_v59 = vsel %vm1101_vm8, %v997_v53, %v1117_v20  ;;  %v1456_v41 = vmul.f32 %v1381_v44, %v9081_v6  ;;  %v1383_v18 = vadd.f32 %v1382_v17, %v9317_v4  ;;  %v1453_v11 = vpop.f32.mrf.mxu1  ;;  %v1156_v24 = vmul.f32 %v9475_v0, %v9442_v34  ;;  %v9497_v17 = vpop.permute.xlu1 %1148 }
 0x4c2   : > { %v1135_v48 = vsel %vm1103_vm9, %v1086_v46, %v1119_v49  ;;  %v1458_v14 = vmul.f32 %v1452_v25, %v9084_v39  ;;  %v1454_v54 = vadd.f32 %v1453_v11, %v9317_v4  ;;  %v1157_v55 = vmul.f32 %v9475_v0, %v9450_v16 }
 0x4c3   : > { %vm1460_vm10 = vcmp.ge.f32.partialorder %v1456_v41, 0.0  ;;  %v1464_v27 = vmul.f32 0.01, %v1456_v41  ;;  %v1457_v3 = vmul.f32 %v1383_v18, %v9075_v38  ;;  %v1158_v46 = vmul.f32 %v9475_v0, %v9445_v32 }
 0x4c4   : > { %vm1462_vm11 = vcmp.ge.f32.partialorder %v1458_v14, 0.0  ;;  %v1466_v53 = vmul.f32 0.01, %v1458_v14  ;;  %v1459_v36 = vmul.f32 %v1454_v54, %v9078_v56  ;;  %v1159_v34 = vmul.f32 %v9475_v0, %v9453_v9 }
 0x4c5   : > { %v1468_v20 = vsel %vm1460_vm10, %v1456_v41, %v1464_v27  ;;  %vm1461_vm12 = vcmp.ge.f32.partialorder %v1457_v3, 0.0  ;;  %v1465_v49 = vmul.f32 0.01, %v1457_v3  ;;  %v1160_v16 = vmul.f32 %v9478_v1, %v9456_v51 }
 0x4c6   : > { %v1470_v11 = vsel %vm1462_vm11, %v1458_v14, %v1466_v53  ;;  %vm1463_vm13 = vcmp.ge.f32.partialorder %v1459_v36, 0.0  ;;  %v1467_v47 = vmul.f32 0.01, %v1459_v36  ;;  %v1472_v63 = vadd.f32 %v1468_v20, %v1381_v44 }
 0x4c7   : > { %v1469_v2 = vsel %vm1461_vm12, %v1457_v3, %v1465_v49  ;;  %v1161_v41 = vmul.f32 %v9478_v1, %v9464_v7  ;;  %v1162_v32 = vmul.f32 %v9478_v1, %v9459_v5  ;;  %v1474_v27 = vadd.f32 %v1470_v11, %v1452_v25 }
 0x4c8   : > { %v1473_v9 = vadd.f32 %v1469_v2, %v1383_v18  ;;  %v1471_v45 = vsel %vm1463_vm13, %v1459_v36, %v1467_v47  ;;  %v1163_v14 = vmul.f32 %v9478_v1, %v9467_v23  ;;  %v1164_v51 = vmul.f32 %v9497_v17, %v9470_v58  ;;  %v9520_v23 = vld [vmem:[%s10525_s1 + $0x10] sm:$0xff] }
 0x4c9   : > { %v1475_v53 = vadd.f32 %v1471_v45, %v1454_v54  ;;  %v1165_v44 = vmul.f32 %v9497_v17, %v1129_v40  ;;  %v1166_v3 = vmul.f32 %v9497_v17, %v1130_v50  ;;  %v1167_v7 = vmul.f32 %v9497_v17, %v1131_v10 }
 0x4ca   : > { %1506 = vmatprep.subr.mxu0 %v1473_v9  ;;  %v1168_v20 = vmul.f32 %v9501_v37, %v1132_v29  ;;  %v1169_v5 = vmul.f32 %v9501_v37, %v1133_v59  ;;  %v1170_v2 = vmul.f32 %v9501_v37, %v1134_v57  ;;  %v1172_v47 = vadd.f32 %v1160_v16, %v1156_v24 }
 0x4cb   : > { %1577 = vmatprep.subr.mxu1 %v1475_v53  ;;  %1507 = vmatpush1.msra.mxu0 %v1472_v63  ;;  %v1181_v45 = vadd.f32 %v1161_v41, %v1157_v55  ;;  %v1190_v54 = vadd.f32 %v1162_v32, %v1158_v46  ;;  %v1171_v58 = vmul.f32 %v9501_v37, %v1135_v48  ;;  %v8605_v16 = vmov 1966171168  }
 0x4cc   : > { %1578 = vmatpush1.msra.mxu1 %v1474_v27  ;;  %8283 = vmatmul.mubr.msk.f32.vlgmr.msra.gmra.mxu0 %vm253_vm0, %v9520_v23  ;;  %v1199_v50 = vadd.f32 %v1163_v14, %v1159_v34  ;;  %v1173_v63 = vadd.f32 %v1172_v47, %v1164_v51  ;;  %v1224_v41 = vunpack.c.l.s4 %v8605_v16  ;;  %v9529_v47 = vpop.permute.xlu1 %1210 }
 0x4cd   : > { %8284 = vmatmul.mubr.msk.f32.vlgmr.msra.gmra.mxu1 %vm253_vm0, %v9520_v23  ;;  %1686 = vmatprep.mubr.f32.mxu0 %v10563_v22  ;;  %v1182_v59 = vadd.f32 %v1181_v45, %v1165_v44  ;;  %v1191_v40 = vadd.f32 %v1190_v54, %v1166_v3 }
 0x4ce   : > { %1757 = vmatprep.mubr.f32.mxu1 %v10563_v22  ;;  %v1200_v10 = vadd.f32 %v1199_v50, %v1167_v7  ;;  %v1174_v29 = vadd.f32 %v1173_v63, %v1168_v20  ;;  %v1225_v7 = vunpack.c.0.s8 %v1224_v41 }
 0x4cf   : > { %v1183_v25 = vadd.f32 %v1182_v59, %v1169_v5  ;;  %v1192_v57 = vadd.f32 %v1191_v40, %v1170_v2 }
 0x4d0   : > { %v1201_v18 = vadd.f32 %v1200_v10, %v1171_v58  ;;  %v1175_v24 = vrot.slane %v1174_v29, 4  ;;  %v9532_v59 = vsub.s32 %v1225_v7, %v8768_v12 }
 0x4d1   : > { %v1184_v55 = vrot.slane %v1183_v25, 4  ;;  %v1193_v36 = vrot.slane %v1192_v57, 4 }
 0x4d2   : > { %v1202_v48 = vrot.slane %v1201_v18, 4  ;;  %v1176_v46 = vadd.f32 %v1175_v24, %v1174_v29 }
 0x4d3   : > { %v1185_v49 = vadd.f32 %v1184_v55, %v1183_v25  ;;  %v1194_v34 = vadd.f32 %v1193_v36, %v1192_v57 }
 0x4d4   : > { %v1203_v11 = vadd.f32 %v1202_v48, %v1201_v18  ;;  %v1177_v32 = vrot.slane %v1176_v46, 2  ;;  %v10611_v48 = vlaneseq }
 0x4d5   : > { %v1186_v27 = vrot.slane %v1185_v49, 2  ;;  %v1195_v9 = vrot.slane %v1194_v34, 2 }
 0x4d6   : > { %v1204_v14 = vrot.slane %v1203_v11, 2  ;;  %v1178_v53 = vadd.f32 %v1177_v32, %v1176_v46  ;;  %vm9542_vm14 = vcmp.lt.s32.totalorder %v10611_v48, 512 }
 0x4d7   : > { %v1187_v51 = vadd.f32 %v1186_v27, %v1185_v49  ;;  %v1196_v44 = vadd.f32 %v1195_v9, %v1194_v34 }
 0x4d8   : > { %v1205_v3 = vadd.f32 %v1204_v14, %v1203_v11  ;;  %v1179_v20 = vrot.slane %v1178_v53, 1 }
 0x4d9   : > { %v1188_v5 = vrot.slane %v1187_v51, 1  ;;  %v1197_v2 = vrot.slane %v1196_v44, 1 }
 0x4da   : > { %v1206_v45 = vrot.slane %v1205_v3, 1  ;;  %v1180_v54 = vadd.f32 %v1179_v20, %v1178_v53 }
 0x4db   : > { %v1189_v58 = vadd.f32 %v1188_v5, %v1187_v51  ;;  %v1198_v50 = vadd.f32 %v1197_v2, %v1196_v44 }
 0x4dc   : > { %v1207_v63 = vadd.f32 %v1206_v45, %v1205_v3  ;;  %v1213_v40 = vadd.f32 %v9529_v47, %v1180_v54 }
 0x4dd   : > { %v1214_v10 = vadd.f32 %v9529_v47, %v1189_v58  ;;  %v1215_v29 = vadd.f32 %v9529_v47, %v1198_v50 }
 0x4de   : > { %v1216_v25 = vadd.f32 %v9529_v47, %v1207_v63 }
 0x4df   : > { %v1221_v57 = vcombine.low %v1213_v40, %v1214_v10 }
 0x4e0   : > { %v1222_v18 = vcombine.low %v1215_v29, %v1216_v25 }
 0x4e1   : > { %v1229_v24 = vrot.slane %v1221_v57, %v9532_v59 }
 0x4e2   : > { %v1236_v55 = vrot.slane %v1222_v18, %v9532_v59 }
 0x4e4   : > { %v1237_v36 = vcombine.low %v1229_v24, %v1236_v55 }
 0x4e6   : > { %v1244_v46 = vrot.slane %v1237_v36, %v9532_v59 }
 0x4e8   : > { %1250 = vst.msk [vmem:[%s9547_s17] ss:$8 sm:$0xf] %vm9542_vm14, %v1244_v46 }
 0x58c   : > { %v1542_v49 = vpop.f32.mrf.mxu0 }
 0x58d   : > { %v1613_v34 = vpop.f32.mrf.mxu1  ;;  %v1543_v11 = vadd.f32 %v1542_v49, %v9333_v42 }
 0x58e   : > { %v1544_v16 = vpop.f32.mrf.mxu0  ;;  %v1614_v41 = vadd.f32 %v1613_v34, %v9333_v42 }
 0x58f   : > { %v1545_v32 = vadd.f32 %v1544_v16, %v9333_v42  ;;  %v1615_v27 = vpop.f32.mrf.mxu1  ;;  %v1618_v53 = vmul.f32 %v1543_v11, %v9081_v6 }
 0x590   : > { %v1616_v9 = vadd.f32 %v1615_v27, %v9333_v42  ;;  %v1620_v44 = vmul.f32 %v1614_v41, %v9084_v39 }
 0x591   : > { %v1619_v14 = vmul.f32 %v1545_v32, %v9075_v38 }
 0x592   : > { %v1621_v51 = vmul.f32 %v1616_v9, %v9078_v56  ;;  %v9602_v9 = vld [vmem:[%s10525_s1 + $0x28] sm:$0xff] }
 0x593   : > { %1652 = vmatprep.subr.mxu0 %v1619_v14  ;;  %v9619_v14 = vld [vmem:[%s10525_s1 + $0x38] sm:$0xff] }
 0x594   : > { %1723 = vmatprep.subr.mxu1 %v1621_v51  ;;  %1653 = vmatpush1.msra.mxu0 %v1618_v53 }
 0x595   : > { %1724 = vmatpush1.msra.mxu1 %v1620_v44  ;;  %8285 = vmatmul.mubr.msk.f32.vlgmr.msra.gmra.mxu0 %vm253_vm0, %v9520_v23 }
 0x596   : > { %8286 = vmatmul.mubr.msk.f32.vlgmr.msra.gmra.mxu1 %vm253_vm0, %v9520_v23  ;;  %1848 = vmatprep.mubr.f32.mxu0 %v10563_v22 }
 0x597   : > { %1919 = vmatprep.mubr.f32.mxu1 %v10563_v22 }
 0x655   : > { %v1688_v3 = vpop.f32.mrf.mxu0 }
 0x656   : > { %v1689_v7 = vadd.f32 %v1688_v3, %v9333_v42  ;;  %v1759_v20 = vpop.f32.mrf.mxu1 }
 0x657   : > { %v1760_v5 = vadd.f32 %v1759_v20, %v9333_v42  ;;  %v1690_v2 = vpop.f32.mrf.mxu0 }
 0x658   : > { %v1764_v45 = vmul.f32 %v1689_v7, %v9081_v6  ;;  %v1691_v54 = vadd.f32 %v1690_v2, %v9333_v42  ;;  %v1761_v58 = vpop.f32.mrf.mxu1 }
 0x659   : > { %v1766_v50 = vmul.f32 %v1760_v5, %v9084_v39  ;;  %v1762_v63 = vadd.f32 %v1761_v58, %v9333_v42 }
 0x65a   : > { %vm1768_vm15 = vcmp.ge.f32.partialorder %v1764_v45, 0.0  ;;  %v1772_v40 = vmul.f32 0.01, %v1764_v45  ;;  %v1765_v10 = vmul.f32 %v1691_v54, %v9075_v38 }
 0x65b   : > { %vm1770_vm1 = vcmp.ge.f32.partialorder %v1766_v50, 0.0  ;;  %v1774_v29 = vmul.f32 0.01, %v1766_v50  ;;  %v1767_v25 = vmul.f32 %v1762_v63, %v9078_v56 }
 0x65c   : > { %vm1769_vm2 = vcmp.ge.f32.partialorder %v1765_v10, 0.0  ;;  %v1773_v57 = vmul.f32 0.01, %v1765_v10  ;;  %v1776_v18 = vsel %vm1768_vm15, %v1764_v45, %v1772_v40 }
 0x65d   : > { %vm1771_vm3 = vcmp.ge.f32.partialorder %v1767_v25, 0.0  ;;  %v1775_v6 = vmul.f32 0.01, %v1767_v25  ;;  %v1778_v24 = vsel %vm1770_vm1, %v1766_v50, %v1774_v29  ;;  %v1780_v39 = vadd.f32 %v1776_v18, %v1689_v7 }
 0x65e   : > { %v1777_v55 = vsel %vm1769_vm2, %v1765_v10, %v1773_v57  ;;  %v1782_v49 = vadd.f32 %v1778_v24, %v1760_v5 }
 0x65f   : > { %v1781_v36 = vadd.f32 %v1777_v55, %v1691_v54  ;;  %v1779_v48 = vsel %vm1771_vm3, %v1767_v25, %v1775_v6 }
 0x660   : > { %v1783_v46 = vadd.f32 %v1779_v48, %v1762_v63 }
 0x661   : > { %1814 = vmatprep.subr.mxu0 %v1781_v36 }
 0x662   : > { %1885 = vmatprep.subr.mxu1 %v1783_v46  ;;  %1815 = vmatpush1.msra.mxu0 %v1780_v39 }
 0x663   : > { %1886 = vmatpush1.msra.mxu1 %v1782_v49  ;;  %8287 = vmatmul.mubr.msk.f32.vlgmr.msra.gmra.mxu0 %vm253_vm0, %v9352_v13 }
 0x664   : > { %8288 = vmatmul.mubr.msk.f32.vlgmr.msra.gmra.mxu1 %vm253_vm0, %v9352_v13  ;;  %1990 = vmatprep.mubr.f32.mxu0 %v10563_v22  ;;  %v9587_v13 = vld [vmem:[%s10525_s1 + $0x20] sm:$0xff] }
 0x665   : > { %2079 = vmatprep.mubr.f32.mxu1 %v10563_v22 }
 0x723   : > { %v1850_v38 = vpop.f32.mrf.mxu0 }
 0x724   : > { %v1921_v56 = vpop.f32.mrf.mxu1  ;;  %v1851_v41 = vadd.f32 %v1850_v38, %v9393_v21 }
 0x725   : > { %v1852_v34 = vpop.f32.mrf.mxu0  ;;  %v1922_v27 = vadd.f32 %v1921_v56, %v9393_v21 }
 0x726   : > { %v1853_v11 = vadd.f32 %v1852_v34, %v9393_v21  ;;  %v1923_v16 = vpop.f32.mrf.mxu1 }
 0x727   : > { %v1924_v32 = vadd.f32 %v1923_v16, %v9393_v21 }
 0x728   : > { %1956 = vmatprep.subr.mxu0 %v1853_v11 }
 0x729   : > { %2045 = vmatprep.subr.mxu1 %v1924_v32  ;;  %1957 = vmatpush1.msra.mxu0 %v1851_v41 }
 0x72a   : > { %2046 = vmatpush1.msra.mxu1 %v1922_v27  ;;  %8289 = vmatmul.mubr.msk.f32.vlgmr.msra.gmra.mxu0 %vm253_vm0, %v9587_v13 }
 0x72b   : > { %8293 = vmatmul.mubr.msk.f32.vlgmr.msra.gmra.mxu1 %vm253_vm0, %v9587_v13  ;;  %2332 = vmatprep.subr.mxu0 %v9121_v28 }
 0x72c   : > { %2403 = vmatprep.subr.mxu1 %v9124_v61  ;;  %2333 = vmatpush1.msra.mxu0 %v9127_v62 }
 0x72d   : > { %2404 = vmatpush1.msra.mxu1 %v9134_v33  ;;  %1996 = vmatprep.mubr.f32.mxu0 %v10563_v22 }
 0x72e   : > { %2085 = vmatprep.mubr.f32.mxu1 %v10563_v22  ;;  %8290 = vmatmul.mubr.msk.f32.gmra.mxu0 %vm253_vm0, %v9602_v9 }
 0x72f   : > { %8294 = vmatmul.mubr.msk.f32.gmra.mxu1 %vm253_vm0, %v9602_v9  ;;  %2002 = vmatprep.mubr.f32.mxu0 %v10563_v22 }
 0x730   : > { %2091 = vmatprep.mubr.f32.mxu1 %v10563_v22 }
 0x732   : > { %8291 = vmatmul.mubr.msk.f32.gmra.mxu0 %vm253_vm0, %v9358_v26 }
 0x733   : > { %8295 = vmatmul.mubr.msk.f32.gmra.mxu1 %vm253_vm0, %v9358_v26  ;;  %2008 = vmatprep.mubr.f32.mxu0 %v10563_v22  ;;  %v9630_v26 = vld [vmem:[%s10525_s1 + $0x8] sm:$0xff] }
 0x734   : > { %2097 = vmatprep.mubr.f32.mxu1 %v10563_v22 }
 0x736   : > { %8292 = vmatmul.mubr.msk.f32.gmra.mxu0 %vm253_vm0, %v9619_v14 }
 0x737   : > { %8296 = vmatmul.mubr.msk.f32.gmra.mxu1 %vm253_vm0, %v9619_v14  ;;  %2366 = vmatprep.mubr.f32.mxu0 %v10563_v22 }
 0x738   : > { %2437 = vmatprep.mubr.f32.mxu1 %v10563_v22 }
 0x73a   : > { %8300 = vmatmul.mubr.msk.f32.vlgmr.msra.gmra.mxu0 %vm253_vm0, %v9630_v26 }
 0x73b   : > { %8301 = vmatmul.mubr.msk.f32.vlgmr.msra.gmra.mxu1 %vm253_vm0, %v9630_v26  ;;  %2528 = vmatprep.mubr.f32.mxu0 %v10563_v22 }
 0x73c   : > { %2599 = vmatprep.mubr.f32.mxu1 %v10563_v22 }
 0x7ea   : > { %v1992_v53 = vpop.f32.mrf.mxu0 }
 0x7eb   : > { %v1993_v51 = vadd.f32 %v1992_v53, %v9433_v8  ;;  %v2081_v44 = vpop.f32.mrf.mxu1 }
 0x7ec   : > { %v2082_v3 = vadd.f32 %v2081_v44, %v9433_v8  ;;  %v1994_v7 = vpop.f32.mrf.mxu0 }
 0x7ed   : > { %vm2104_vm4 = vcmp.ge.f32.partialorder %v1993_v51, 0.0  ;;  %v2120_v20 = vmul.f32 0.01, %v1993_v51  ;;  %v1995_v5 = vadd.f32 %v1994_v7, %v9433_v8  ;;  %v2083_v2 = vpop.f32.mrf.mxu1 }
 0x7ee   : > { %vm2106_vm5 = vcmp.ge.f32.partialorder %v2082_v3, 0.0  ;;  %v2122_v45 = vmul.f32 0.01, %v2082_v3  ;;  %v2084_v54 = vadd.f32 %v2083_v2, %v9433_v8  ;;  %v1998_v58 = vpop.f32.mrf.mxu0 }
 0x7ef   : > { %v2136_v50 = vsel %vm2104_vm4, %v1993_v51, %v2120_v20  ;;  %vm2105_vm6 = vcmp.ge.f32.partialorder %v1995_v5, 0.0  ;;  %v2121_v63 = vmul.f32 0.01, %v1995_v5  ;;  %v1999_v40 = vadd.f32 %v1998_v58, %v9438_v60  ;;  %v2087_v10 = vpop.f32.mrf.mxu1 }
 0x7f0   : > { %v2138_v29 = vsel %vm2106_vm5, %v2082_v3, %v2122_v45  ;;  %vm2107_vm7 = vcmp.ge.f32.partialorder %v2084_v54, 0.0  ;;  %v2123_v25 = vmul.f32 0.01, %v2084_v54  ;;  %v2000_v57 = vpop.f32.mrf.mxu0  ;;  %v2152_v18 = vmul.f32 %v2136_v50, %v9475_v0 }
 0x7f1   : > { %v2137_v6 = vsel %vm2105_vm6, %v1995_v5, %v2121_v63  ;;  %vm2108_vm8 = vcmp.ge.f32.partialorder %v1999_v40, 0.0  ;;  %v2124_v24 = vmul.f32 0.01, %v1999_v40  ;;  %v2089_v55 = vpop.f32.mrf.mxu1  ;;  %v2154_v36 = vmul.f32 %v2138_v29, %v9475_v0 }
 0x7f2   : > { %v2153_v48 = vmul.f32 %v2137_v6, %v9475_v0  ;;  %v2088_v39 = vadd.f32 %v2087_v10, %v9438_v60  ;;  %v2001_v46 = vadd.f32 %v2000_v57, %v9438_v60  ;;  %v2004_v49 = vpop.f32.mrf.mxu0  ;;  %v2139_v38 = vsel %vm2107_vm7, %v2084_v54, %v2123_v25 }
 0x7f3   : > { %v2140_v56 = vsel %vm2108_vm8, %v1999_v40, %v2124_v24  ;;  %v2090_v34 = vadd.f32 %v2089_v55, %v9438_v60  ;;  %v2005_v11 = vadd.f32 %v2004_v49, %v9448_v15  ;;  %v2093_v16 = vpop.f32.mrf.mxu1  ;;  %v2155_v3 = vmul.f32 %v2139_v38, %v9475_v0 }
 0x7f4   : > { %v2156_v41 = vmul.f32 %v2140_v56, %v9478_v1  ;;  %vm2110_vm9 = vcmp.ge.f32.partialorder %v2088_v39, 0.0  ;;  %v2126_v32 = vmul.f32 0.01, %v2088_v39  ;;  %vm2109_vm10 = vcmp.ge.f32.partialorder %v2001_v46, 0.0  ;;  %v2006_v27 = vpop.f32.mrf.mxu0 }
 0x7f5   : > { %v2125_v53 = vmul.f32 0.01, %v2001_v46  ;;  %vm2111_vm11 = vcmp.ge.f32.partialorder %v2090_v34, 0.0  ;;  %v2127_v51 = vmul.f32 0.01, %v2090_v34  ;;  %vm2112_vm12 = vcmp.ge.f32.partialorder %v2005_v11, 0.0  ;;  %v2095_v44 = vpop.f32.mrf.mxu1 }
 0x7f6   : > { %v2142_v7 = vsel %vm2110_vm9, %v2088_v39, %v2126_v32  ;;  %v2128_v20 = vmul.f32 0.01, %v2005_v11  ;;  %v2094_v5 = vadd.f32 %v2093_v16, %v9448_v15  ;;  %v2010_v2 = vpop.f32.mrf.mxu0  ;;  %v2007_v50 = vadd.f32 %v2006_v27, %v9448_v15 }
 0x7f7   : > { %v2158_v45 = vmul.f32 %v2142_v7, %v9478_v1  ;;  %v2141_v54 = vsel %vm2109_vm10, %v2001_v46, %v2125_v53  ;;  %v2143_v58 = vsel %vm2111_vm11, %v2090_v34, %v2127_v51  ;;  %v2099_v63 = vpop.f32.mrf.mxu1  ;;  %v2168_v57 = vadd.f32 %v2156_v41, %v2152_v18 }
 0x7f8   : > { %v2157_v40 = vmul.f32 %v2141_v54, %v9478_v1  ;;  %v2159_v10 = vmul.f32 %v2143_v58, %v9478_v1  ;;  %v2144_v29 = vsel %vm2112_vm12, %v2005_v11, %v2128_v20  ;;  %vm2114_vm13 = vcmp.ge.f32.partialorder %v2094_v5, 0.0  ;;  %v2012_v25 = vpop.f32.mrf.mxu0 }
 0x7f9   : > { %v2186_v6 = vadd.f32 %v2158_v45, %v2154_v36  ;;  %v2130_v24 = vmul.f32 0.01, %v2094_v5  ;;  %vm2113_vm15 = vcmp.ge.f32.partialorder %v2007_v50, 0.0  ;;  %v2160_v39 = vmul.f32 %v2144_v29, %v9497_v17  ;;  %v2101_v32 = vpop.f32.mrf.mxu1 }
 0x7fa   : > { %v2177_v55 = vadd.f32 %v2157_v40, %v2153_v48  ;;  %v2129_v49 = vmul.f32 0.01, %v2007_v50  ;;  %v2096_v46 = vadd.f32 %v2095_v44, %v9448_v15  ;;  %v2195_v38 = vadd.f32 %v2159_v10, %v2155_v3  ;;  %v2368_v36 = vpop.f32.mrf.mxu0 }
 0x7fb   : > { %v2146_v56 = vsel %vm2114_vm13, %v2094_v5, %v2130_v24  ;;  %v2011_v34 = vadd.f32 %v2010_v2, %v9462_v43  ;;  %v2100_v16 = vadd.f32 %v2099_v63, %v9462_v43  ;;  %v2169_v53 = vadd.f32 %v2168_v57, %v2160_v39  ;;  %v2439_v45 = vpop.f32.mrf.mxu1 }
 0x7fc   : > { %v2162_v11 = vmul.f32 %v2146_v56, %v9497_v17  ;;  %v2145_v27 = vsel %vm2113_vm15, %v2007_v50, %v2129_v49  ;;  %vm2115_vm1 = vcmp.ge.f32.partialorder %v2096_v46, 0.0  ;;  %v2131_v18 = vmul.f32 0.01, %v2096_v46  ;;  %v2370_v63 = vpop.f32.mrf.mxu0 }
 0x7fd   : > { %v2161_v48 = vmul.f32 %v2145_v27, %v9497_v17  ;;  %vm2116_vm2 = vcmp.ge.f32.partialorder %v2011_v34, 0.0  ;;  %v2132_v41 = vmul.f32 0.01, %v2011_v34  ;;  %vm2118_vm3 = vcmp.ge.f32.partialorder %v2100_v16, 0.0 }
 0x7fe   : > { %v2147_v51 = vsel %vm2115_vm1, %v2096_v46, %v2131_v18  ;;  %v2134_v44 = vmul.f32 0.01, %v2100_v16  ;;  %v2013_v3 = vadd.f32 %v2012_v25, %v9462_v43  ;;  %v2187_v7 = vadd.f32 %v2186_v6, %v2162_v11  ;;  %v2441_v11 = vpop.f32.mrf.mxu1 }
 0x7ff   : > { %v2163_v20 = vmul.f32 %v2147_v51, %v9497_v17  ;;  %v2148_v5 = vsel %vm2116_vm2, %v2011_v34, %v2132_v41  ;;  %v2102_v2 = vadd.f32 %v2101_v32, %v9462_v43  ;;  %v2178_v40 = vadd.f32 %v2177_v55, %v2161_v48 }
 0x800   : > { %v2164_v54 = vmul.f32 %v2148_v5, %v9501_v37  ;;  %v2150_v58 = vsel %vm2118_vm3, %v2100_v16, %v2134_v44  ;;  %vm2117_vm4 = vcmp.ge.f32.partialorder %v2013_v3, 0.0  ;;  %v2133_v50 = vmul.f32 0.01, %v2013_v3 }
 0x801   : > { %v2166_v10 = vmul.f32 %v2150_v58, %v9501_v37  ;;  %vm2119_vm5 = vcmp.ge.f32.partialorder %v2102_v2, 0.0  ;;  %v2135_v29 = vmul.f32 0.01, %v2102_v2  ;;  %v2369_v6 = vadd.f32 %v2368_v36, %v9317_v4 }
 0x802   : > { %v2170_v57 = vadd.f32 %v2169_v53, %v2164_v54  ;;  %v2149_v25 = vsel %vm2117_vm4, %v2013_v3, %v2133_v50  ;;  %v2440_v24 = vadd.f32 %v2439_v45, %v9317_v4  ;;  %v2371_v56 = vadd.f32 %v2370_v63, %v9317_v4 }
 0x803   : > { %v2188_v39 = vadd.f32 %v2187_v7, %v2166_v10  ;;  %v2165_v49 = vmul.f32 %v2149_v25, %v9501_v37  ;;  %v2151_v46 = vsel %vm2119_vm5, %v2102_v2, %v2135_v29  ;;  %v2196_v34 = vadd.f32 %v2195_v38, %v2163_v20 }
 0x804   : > { %v2171_v16 = vrot.slane %v2170_v57, 4  ;;  %v2167_v55 = vmul.f32 %v2151_v46, %v9501_v37  ;;  %v2444_v32 = vmul.f32 %v2369_v6, %v9127_v62  ;;  %v2445_v48 = vmul.f32 %v2371_v56, %v9121_v28 }
 0x805   : > { %v2189_v27 = vrot.slane %v2188_v39, 4  ;;  %v2179_v18 = vadd.f32 %v2178_v40, %v2165_v49  ;;  %v2446_v53 = vmul.f32 %v2440_v24, %v9134_v33  ;;  %v2442_v7 = vadd.f32 %v2441_v11, %v9317_v4 }
 0x806   : > { %v2172_v36 = vadd.f32 %v2171_v16, %v2170_v57  ;;  %v2197_v41 = vadd.f32 %v2196_v34, %v2167_v55  ;;  %v2452_v3 = vmul.f32 0.01, %v2444_v32  ;;  %vm2448_vm6 = vcmp.ge.f32.partialorder %v2444_v32, 0.0 }
 0x807   : > { %v2190_v51 = vadd.f32 %v2189_v27, %v2188_v39  ;;  %v2180_v44 = vrot.slane %v2179_v18, 4  ;;  %vm2449_vm7 = vcmp.ge.f32.partialorder %v2445_v48, 0.0  ;;  %v2454_v58 = vmul.f32 0.01, %v2446_v53 }
 0x808   : > { %v2173_v38 = vrot.slane %v2172_v36, 2  ;;  %v2198_v20 = vrot.slane %v2197_v41, 4  ;;  %v2453_v50 = vmul.f32 0.01, %v2445_v48  ;;  %v2456_v10 = vsel %vm2448_vm6, %v2444_v32, %v2452_v3 }
 0x809   : > { %v2191_v5 = vrot.slane %v2190_v51, 2  ;;  %v2181_v2 = vadd.f32 %v2180_v44, %v2179_v18  ;;  %v2447_v29 = vmul.f32 %v2442_v7, %v9124_v61  ;;  %vm2450_vm8 = vcmp.ge.f32.partialorder %v2446_v53, 0.0 }
 0x80a   : > { %v2174_v45 = vadd.f32 %v2173_v38, %v2172_v36  ;;  %v2199_v54 = vadd.f32 %v2198_v20, %v2197_v41  ;;  %v2457_v39 = vsel %vm2449_vm7, %v2445_v48, %v2453_v50  ;;  %v2460_v55 = vadd.f32 %v2456_v10, %v2369_v6 }
 0x80b   : > { %v2192_v63 = vadd.f32 %v2191_v5, %v2190_v51  ;;  %v2182_v40 = vrot.slane %v2181_v2, 2  ;;  %v2461_v34 = vadd.f32 %v2457_v39, %v2371_v56  ;;  %vm2451_vm9 = vcmp.ge.f32.partialorder %v2447_v29, 0.0 }
 0x80c   : > { %v2175_v57 = vrot.slane %v2174_v45, 1  ;;  %v2200_v25 = vrot.slane %v2199_v54, 2  ;;  %v2455_v11 = vmul.f32 0.01, %v2447_v29  ;;  %v2458_v36 = vsel %vm2450_vm8, %v2446_v53, %v2454_v58 }
 0x80d   : > { %v2193_v49 = vrot.slane %v2192_v63, 1  ;;  %v2183_v46 = vadd.f32 %v2182_v40, %v2181_v2  ;;  %2494 = vmatprep.subr.mxu0 %v2461_v34  ;;  %v2462_v38 = vadd.f32 %v2458_v36, %v2440_v24 }
 0x80e   : > { %v2201_v16 = vadd.f32 %v2200_v25, %v2199_v54  ;;  %v2176_v27 = vadd.f32 %v2175_v57, %v2174_v45  ;;  %v2459_v32 = vsel %vm2451_vm9, %v2447_v29, %v2455_v11  ;;  %2495 = vmatpush1.msra.mxu0 %v2460_v55 }
 0x80f   : > { %v2184_v18 = vrot.slane %v2183_v46, 1  ;;  %v2194_v41 = vadd.f32 %v2193_v49, %v2192_v63  ;;  %v2463_v3 = vadd.f32 %v2459_v32, %v2442_v7  ;;  %8302 = vmatmul.mubr.msk.f32.vlgmr.msra.gmra.mxu0 %vm253_vm0, %v9520_v23 }
 0x810   : > { %v2202_v51 = vrot.slane %v2201_v16, 1  ;;  %2674 = vmatprep.mubr.f32.mxu0 %v10563_v22  ;;  %v2204_v6 = vadd.f32 %v2176_v27, %v9529_v47 }
 0x811   : > { %v2185_v44 = vadd.f32 %v2184_v18, %v2183_v46  ;;  %2565 = vmatprep.subr.mxu1 %v2463_v3  ;;  %v2206_v53 = vadd.f32 %v2194_v41, %v9529_v47 }
 0x812   : > { %v2203_v48 = vadd.f32 %v2202_v51, %v2201_v16  ;;  %2566 = vmatpush1.msra.mxu1 %v2462_v38 }
 0x813   : > { %v2205_v56 = vadd.f32 %v2185_v44, %v9529_v47  ;;  %8303 = vmatmul.mubr.msk.f32.vlgmr.msra.gmra.mxu1 %vm253_vm0, %v9520_v23 }
 0x814   : > { %v2207_v20 = vadd.f32 %v2203_v48, %v9529_v47  ;;  %2745 = vmatprep.mubr.f32.mxu1 %v10563_v22 }
 0x815   : > { %v2212_v5 = vcombine.low %v2204_v6, %v2205_v56 }
 0x816   : > { %v2213_v7 = vcombine.low %v2206_v53, %v2207_v20 }
 0x817   : > { %v2220_v24 = vrot.slane %v2212_v5, %v9532_v59 }
 0x818   : > { %v2227_v2 = vrot.slane %v2213_v7, %v9532_v59 }
 0x81a   : > { %v2228_v45 = vcombine.low %v2220_v24, %v2227_v2 }
 0x81c   : > { %v2235_v54 = vrot.slane %v2228_v45, %v9532_v59 }
 0x81e   : > { %8297 = vst.msk [vmem:[%s9547_s17 + $0x1] ss:$8 sm:$0xf] %vm9542_vm14, %v2235_v54 }
 0x8cf   : > { %v2530_v58 = vpop.f32.mrf.mxu0 }
 0x8d0   : > { %v2531_v50 = vadd.f32 %v2530_v58, %v9333_v42 }
 0x8d1   : > { %v2532_v63 = vpop.f32.mrf.mxu0 }
 0x8d2   : > { %v2533_v40 = vadd.f32 %v2532_v63, %v9333_v42  ;;  %v2606_v57 = vmul.f32 %v2531_v50, %v9127_v62 }
 0x8d3   : > { %v2601_v10 = vpop.f32.mrf.mxu1 }
 0x8d4   : > { %v2607_v29 = vmul.f32 %v2533_v40, %v9121_v28  ;;  %v2602_v25 = vadd.f32 %v2601_v10, %v9333_v42 }
 0x8d5   : > { %v2603_v39 = vpop.f32.mrf.mxu1 }
 0x8d6   : > { %v2604_v49 = vadd.f32 %v2603_v39, %v9333_v42  ;;  %2640 = vmatprep.subr.mxu0 %v2607_v29  ;;  %v2608_v34 = vmul.f32 %v2602_v25, %v9134_v33  ;;  %v9747_v29 = vld [vmem:[%s10525_s1 + $0x30] sm:$0xff] }
 0x8d7   : > { %2641 = vmatpush1.msra.mxu0 %v2606_v57 }
 0x8d8   : > { %v2609_v46 = vmul.f32 %v2604_v49, %v9124_v61  ;;  %8304 = vmatmul.mubr.msk.f32.vlgmr.msra.gmra.mxu0 %vm253_vm0, %v9520_v23 }
 0x8d9   : > { %2836 = vmatprep.mubr.f32.mxu0 %v10563_v22 }
 0x8da   : > { %2711 = vmatprep.subr.mxu1 %v2609_v46 }
 0x8db   : > { %2712 = vmatpush1.msra.mxu1 %v2608_v34 }
 0x8dc   : > { %8305 = vmatmul.mubr.msk.f32.vlgmr.msra.gmra.mxu1 %vm253_vm0, %v9520_v23 }
 0x8dd   : > { %2907 = vmatprep.mubr.f32.mxu1 %v10563_v22 }
 0x998   : > { %v2676_v16 = vpop.f32.mrf.mxu0 }
 0x999   : > { %v2677_v55 = vadd.f32 %v2676_v16, %v9333_v42 }
 0x99a   : > { %v2678_v11 = vpop.f32.mrf.mxu0 }
 0x99b   : > { %v2752_v27 = vmul.f32 %v2677_v55, %v9127_v62  ;;  %v2679_v18 = vadd.f32 %v2678_v11, %v9333_v42 }
 0x99c   : > { %v2747_v36 = vpop.f32.mrf.mxu1 }
 0x99d   : > { %vm2756_vm10 = vcmp.ge.f32.partialorder %v2752_v27, 0.0  ;;  %v2760_v41 = vmul.f32 0.01, %v2752_v27  ;;  %v2748_v51 = vadd.f32 %v2747_v36, %v9333_v42  ;;  %v2753_v32 = vmul.f32 %v2679_v18, %v9121_v28 }
 0x99e   : > { %v2749_v44 = vpop.f32.mrf.mxu1 }
 0x99f   : > { %v2754_v23 = vmul.f32 %v2748_v51, %v9134_v33  ;;  %vm2757_vm11 = vcmp.ge.f32.partialorder %v2753_v32, 0.0  ;;  %v2761_v3 = vmul.f32 0.01, %v2753_v32  ;;  %v2764_v48 = vsel %vm2756_vm10, %v2752_v27, %v2760_v41  ;;  %v9719_v33 = vld [vmem:[%s10525_s1 + $0x18] sm:$0xff] }
 0x9a0   : > { %v2750_v38 = vadd.f32 %v2749_v44, %v9333_v42  ;;  %v2768_v20 = vadd.f32 %v2764_v48, %v2677_v55 }
 0x9a1   : > { %v2762_v6 = vmul.f32 0.01, %v2754_v23  ;;  %v2765_v56 = vsel %vm2757_vm11, %v2753_v32, %v2761_v3  ;;  %vm2758_vm12 = vcmp.ge.f32.partialorder %v2754_v23, 0.0 }
 0x9a2   : > { %v2769_v62 = vadd.f32 %v2765_v56, %v2679_v18  ;;  %v2755_v53 = vmul.f32 %v2750_v38, %v9124_v61 }
 0x9a3   : > { %v2766_v7 = vsel %vm2758_vm12, %v2754_v23, %v2762_v6 }
 0x9a4   : > { %vm2759_vm13 = vcmp.ge.f32.partialorder %v2755_v53, 0.0  ;;  %v2763_v5 = vmul.f32 0.01, %v2755_v53  ;;  %2802 = vmatprep.subr.mxu0 %v2769_v62  ;;  %v2770_v2 = vadd.f32 %v2766_v7, %v2748_v51 }
 0x9a5   : > { %2803 = vmatpush1.msra.mxu0 %v2768_v20 }
 0x9a6   : > { %v2767_v28 = vsel %vm2759_vm13, %v2755_v53, %v2763_v5  ;;  %8306 = vmatmul.mubr.msk.f32.vlgmr.msra.gmra.mxu0 %vm253_vm0, %v9719_v33 }
 0x9a7   : > { %v2771_v24 = vadd.f32 %v2767_v28, %v2750_v38  ;;  %2978 = vmatprep.mubr.f32.mxu0 %v10563_v22 }
 0x9a9   : > { %2873 = vmatprep.subr.mxu1 %v2771_v24 }
 0x9aa   : > { %2874 = vmatpush1.msra.mxu1 %v2770_v2 }
 0x9ab   : > { %8307 = vmatmul.mubr.msk.f32.vlgmr.msra.gmra.mxu1 %vm253_vm0, %v9719_v33 }
 0x9ac   : > { %3067 = vmatprep.mubr.f32.mxu1 %v10563_v22 }
 0xa66   : > { %v2838_v61 = vpop.f32.mrf.mxu0 }
 0xa67   : > { %v2839_v58 = vadd.f32 %v2838_v61, %v9393_v21 }
 0xa68   : > { %v2840_v45 = vpop.f32.mrf.mxu0 }
 0xa69   : > { %v2841_v54 = vadd.f32 %v2840_v45, %v9393_v21 }
 0xa6b   : > { %v2909_v50 = vpop.f32.mrf.mxu1  ;;  %2944 = vmatprep.subr.mxu0 %v2841_v54 }
 0xa6c   : > { %2945 = vmatpush1.msra.mxu0 %v2839_v58  ;;  %v2910_v10 = vadd.f32 %v2909_v50, %v9393_v21 }
 0xa6d   : > { %v2911_v63 = vpop.f32.mrf.mxu1  ;;  %8308 = vmatmul.mubr.msk.f32.vlgmr.msra.gmra.mxu0 %vm253_vm0, %v9587_v13  ;;  %3320 = vmatprep.subr.mxu0 %v9137_v19 }
 0xa6e   : > { %v2912_v40 = vadd.f32 %v2911_v63, %v9393_v21  ;;  %3321 = vmatpush1.msra.mxu0 %v9172_v52  ;;  %2984 = vmatprep.mubr.f32.mxu0 %v10563_v22 }
 0xa70   : > { %3033 = vmatprep.subr.mxu1 %v2912_v40 }
 0xa71   : > { %3034 = vmatpush1.msra.mxu1 %v2910_v10  ;;  %8309 = vmatmul.mubr.msk.f32.gmra.mxu0 %vm253_vm0, %v9602_v9 }
 0xa72   : > { %8312 = vmatmul.mubr.msk.f32.vlgmr.msra.gmra.mxu1 %vm253_vm0, %v9587_v13  ;;  %3391 = vmatprep.subr.mxu1 %v9140_v35 }
 0xa73   : > { %3392 = vmatpush1.msra.mxu1 %v9178_v30  ;;  %3073 = vmatprep.mubr.f32.mxu1 %v10563_v22 }
 0xa74   : > { %2990 = vmatprep.mubr.f32.mxu0 %v10563_v22 }
 0xa75   : > { %8310 = vmatmul.mubr.msk.f32.gmra.mxu0 %vm253_vm0, %v9747_v29 }
 0xa76   : > { %8313 = vmatmul.mubr.msk.f32.gmra.mxu1 %vm253_vm0, %v9602_v9  ;;  %2996 = vmatprep.mubr.f32.mxu0 %v10563_v22 }
 0xa77   : > { %3079 = vmatprep.mubr.f32.mxu1 %v10563_v22 }
 0xa79   : > { %8311 = vmatmul.mubr.msk.f32.gmra.mxu0 %vm253_vm0, %v9619_v14 }
 0xa7a   : > { %8314 = vmatmul.mubr.msk.f32.gmra.mxu1 %vm253_vm0, %v9747_v29  ;;  %3354 = vmatprep.mubr.f32.mxu0 %v10563_v22 }
 0xa7b   : > { %3085 = vmatprep.mubr.f32.mxu1 %v10563_v22 }
 0xa7d   : > { %8319 = vmatmul.mubr.msk.f32.vlgmr.msra.gmra.mxu0 %vm253_vm0, %v9630_v26 }
 0xa7e   : > { %8315 = vmatmul.mubr.msk.f32.gmra.mxu1 %vm253_vm0, %v9619_v14  ;;  %3516 = vmatprep.mubr.f32.mxu0 %v10563_v22 }
 0xa7f   : > { %3425 = vmatprep.mubr.f32.mxu1 %v10563_v22 }
 0xa82   : > { %8320 = vmatmul.mubr.msk.f32.vlgmr.msra.gmra.mxu1 %vm253_vm0, %v9630_v26 }
 0xa83   : > { %3587 = vmatprep.mubr.f32.mxu1 %v10563_v22 }
 0xb2d   : > { %v2980_v13 = vpop.f32.mrf.mxu0 }
 0xb2e   : > { %v2981_v9 = vadd.f32 %v2980_v13, %v9433_v8 }
 0xb2f   : > { %v2982_v57 = vpop.f32.mrf.mxu0 }
 0xb30   : > { %vm3092_vm15 = vcmp.ge.f32.partialorder %v2981_v9, 0.0  ;;  %v3108_v25 = vmul.f32 0.01, %v2981_v9  ;;  %v2983_v39 = vadd.f32 %v2982_v57, %v9433_v8 }
 0xb31   : > { %v2986_v49 = vpop.f32.mrf.mxu0 }
 0xb32   : > { %v3124_v46 = vsel %vm3092_vm15, %v2981_v9, %v3108_v25  ;;  %v3069_v14 = vpop.f32.mrf.mxu1  ;;  %vm3093_vm1 = vcmp.ge.f32.partialorder %v2983_v39, 0.0  ;;  %v3109_v34 = vmul.f32 0.01, %v2983_v39  ;;  %v2987_v16 = vadd.f32 %v2986_v49, %v9438_v60 }
 0xb33   : > { %v3070_v55 = vadd.f32 %v3069_v14, %v9433_v8  ;;  %v2988_v26 = vpop.f32.mrf.mxu0  ;;  %v3140_v11 = vmul.f32 %v3124_v46, %v9475_v0 }
 0xb34   : > { %v3071_v27 = vpop.f32.mrf.mxu1  ;;  %vm3096_vm2 = vcmp.ge.f32.partialorder %v2987_v16, 0.0  ;;  %v3112_v18 = vmul.f32 0.01, %v2987_v16  ;;  %v2989_v36 = vadd.f32 %v2988_v26, %v9438_v60  ;;  %v3125_v51 = vsel %vm3093_vm1, %v2983_v39, %v3109_v34 }
 0xb35   : > { %vm3094_vm3 = vcmp.ge.f32.partialorder %v3070_v55, 0.0  ;;  %v3110_v41 = vmul.f32 0.01, %v3070_v55  ;;  %v3072_v32 = vadd.f32 %v3071_v27, %v9433_v8  ;;  %v2992_v44 = vpop.f32.mrf.mxu0  ;;  %v3141_v5 = vmul.f32 %v3125_v51, %v9475_v0 }
 0xb36   : > { %v3128_v23 = vsel %vm3096_vm2, %v2987_v16, %v3112_v18  ;;  %v3075_v3 = vpop.f32.mrf.mxu1  ;;  %vm3097_vm4 = vcmp.ge.f32.partialorder %v2989_v36, 0.0  ;;  %v3113_v48 = vmul.f32 0.01, %v2989_v36  ;;  %v2993_v38 = vadd.f32 %v2992_v44, %v9448_v15 }
 0xb37   : > { %v3126_v6 = vsel %vm3094_vm3, %v3070_v55, %v3110_v41  ;;  %vm3095_vm5 = vcmp.ge.f32.partialorder %v3072_v32, 0.0  ;;  %v3111_v56 = vmul.f32 0.01, %v3072_v32  ;;  %v3144_v62 = vmul.f32 %v3128_v23, %v9478_v1  ;;  %v2994_v53 = vpop.f32.mrf.mxu0 }
 0xb38   : > { %v3142_v20 = vmul.f32 %v3126_v6, %v9475_v0  ;;  %v3076_v7 = vadd.f32 %v3075_v3, %v9438_v60  ;;  %v3129_v28 = vsel %vm3097_vm4, %v2989_v36, %v3113_v48  ;;  %v3077_v24 = vpop.f32.mrf.mxu1  ;;  %vm3100_vm6 = vcmp.ge.f32.partialorder %v2993_v38, 0.0 }
 0xb39   : > { %v3127_v2 = vsel %vm3095_vm5, %v3072_v32, %v3111_v56  ;;  %v3156_v61 = vadd.f32 %v3144_v62, %v3140_v11  ;;  %v3078_v45 = vadd.f32 %v3077_v24, %v9438_v60  ;;  %v2998_v54 = vpop.f32.mrf.mxu0  ;;  %v3145_v50 = vmul.f32 %v3129_v28, %v9478_v1 }
 0xb3a   : > { %vm3098_vm7 = vcmp.ge.f32.partialorder %v3076_v7, 0.0  ;;  %v3114_v58 = vmul.f32 0.01, %v3076_v7  ;;  %v3116_v63 = vmul.f32 0.01, %v2993_v38  ;;  %v3081_v40 = vpop.f32.mrf.mxu1  ;;  %v3143_v10 = vmul.f32 %v3127_v2, %v9475_v0 }
 0xb3b   : > { %vm3099_vm8 = vcmp.ge.f32.partialorder %v3078_v45, 0.0  ;;  %v3115_v13 = vmul.f32 0.01, %v3078_v45  ;;  %v3082_v9 = vadd.f32 %v3081_v40, %v9448_v15  ;;  %v2995_v39 = vadd.f32 %v2994_v53, %v9448_v15  ;;  %v3000_v18 = vpop.f32.mrf.mxu0 }
 0xb3c   : > { %v3130_v57 = vsel %vm3098_vm7, %v3076_v7, %v3114_v58  ;;  %v3132_v25 = vsel %vm3100_vm6, %v2993_v38, %v3116_v63  ;;  %v3083_v49 = vpop.f32.mrf.mxu1  ;;  %v2999_v46 = vadd.f32 %v2998_v54, %v9462_v43  ;;  %v3165_v55 = vadd.f32 %v3145_v50, %v3141_v5 }
 0xb3d   : > { %v3146_v14 = vmul.f32 %v3130_v57, %v9478_v1  ;;  %v3131_v34 = vsel %vm3099_vm8, %v3078_v45, %v3115_v13  ;;  %v3148_v16 = vmul.f32 %v3132_v25, %v9497_v17  ;;  %vm3102_vm9 = vcmp.ge.f32.partialorder %v3082_v9, 0.0  ;;  %v3356_v7 = vpop.f32.mrf.mxu0 }
 0xb3e   : > { %v3118_v26 = vmul.f32 0.01, %v3082_v9  ;;  %vm3101_vm10 = vcmp.ge.f32.partialorder %v2995_v39, 0.0  ;;  %v3117_v11 = vmul.f32 0.01, %v2995_v39  ;;  %v3087_v27 = vpop.f32.mrf.mxu1  ;;  %v3147_v41 = vmul.f32 %v3131_v34, %v9478_v1 }
 0xb3f   : > { %v3174_v36 = vadd.f32 %v3146_v14, %v3142_v20  ;;  %v3084_v51 = vadd.f32 %v3083_v49, %v9448_v15  ;;  %vm3104_vm11 = vcmp.ge.f32.partialorder %v2999_v46, 0.0  ;;  %v3157_v32 = vadd.f32 %v3156_v61, %v3148_v16  ;;  %v3358_v25 = vpop.f32.mrf.mxu0 }
 0xb40   : > { %v3134_v44 = vsel %vm3102_vm9, %v3082_v9, %v3118_v26  ;;  %v3133_v23 = vsel %vm3101_vm10, %v2995_v39, %v3117_v11  ;;  %v3120_v3 = vmul.f32 0.01, %v2999_v46  ;;  %v3089_v48 = vpop.f32.mrf.mxu1  ;;  %v3088_v53 = vadd.f32 %v3087_v27, %v9462_v43 }
 0xb41   : > { %v3150_v38 = vmul.f32 %v3134_v44, %v9497_v17  ;;  %v3149_v6 = vmul.f32 %v3133_v23, %v9497_v17  ;;  %vm3103_vm12 = vcmp.ge.f32.partialorder %v3084_v51, 0.0  ;;  %v3119_v56 = vmul.f32 0.01, %v3084_v51 }
 0xb42   : > { %v3136_v62 = vsel %vm3104_vm11, %v2999_v46, %v3120_v3  ;;  %v3001_v20 = vadd.f32 %v3000_v18, %v9462_v43  ;;  %v3090_v5 = vadd.f32 %v3089_v48, %v9462_v43  ;;  %v3183_v28 = vadd.f32 %v3147_v41, %v3143_v10  ;;  %v3427_v45 = vpop.f32.mrf.mxu1 }
 0xb43   : > { %v3175_v24 = vadd.f32 %v3174_v36, %v3150_v38  ;;  %v3135_v2 = vsel %vm3103_vm12, %v3084_v51, %v3119_v56  ;;  %v3152_v61 = vmul.f32 %v3136_v62, %v9501_v37  ;;  %vm3106_vm13 = vcmp.ge.f32.partialorder %v3088_v53, 0.0 }
 0xb44   : > { %v3151_v54 = vmul.f32 %v3135_v2, %v9497_v17  ;;  %v3122_v58 = vmul.f32 0.01, %v3088_v53  ;;  %vm3105_vm15 = vcmp.ge.f32.partialorder %v3001_v20, 0.0  ;;  %v3121_v63 = vmul.f32 0.01, %v3001_v20  ;;  %v3429_v27 = vpop.f32.mrf.mxu1 }
 0xb45   : > { %v3158_v50 = vadd.f32 %v3157_v32, %v3152_v61  ;;  %vm3107_vm1 = vcmp.ge.f32.partialorder %v3090_v5, 0.0  ;;  %v3123_v40 = vmul.f32 0.01, %v3090_v5  ;;  %v3166_v13 = vadd.f32 %v3165_v55, %v3149_v6 }
 0xb46   : > { %v3138_v9 = vsel %vm3106_vm13, %v3088_v53, %v3122_v58  ;;  %v3357_v57 = vadd.f32 %v3356_v7, %v9317_v4  ;;  %v3428_v10 = vadd.f32 %v3427_v45, %v9317_v4  ;;  %v3137_v46 = vsel %vm3105_vm15, %v3001_v20, %v3121_v63 }
 0xb47   : > { %v3159_v39 = vrot.slane %v3158_v50, 4  ;;  %v3154_v49 = vmul.f32 %v3138_v9, %v9501_v37  ;;  %v3139_v14 = vsel %vm3107_vm1, %v3090_v5, %v3123_v40  ;;  %v3184_v34 = vadd.f32 %v3183_v28, %v3151_v54 }
 0xb48   : > { %v3153_v16 = vmul.f32 %v3137_v46, %v9501_v37  ;;  %v3155_v26 = vmul.f32 %v3139_v14, %v9501_v37  ;;  %v3432_v11 = vmul.f32 %v3357_v57, %v9172_v52  ;;  %v3359_v36 = vadd.f32 %v3358_v25, %v9317_v4 }
 0xb49   : > { %v3160_v55 = vadd.f32 %v3159_v39, %v3158_v50  ;;  %v3176_v18 = vadd.f32 %v3175_v24, %v3154_v49  ;;  %v3434_v32 = vmul.f32 %v3428_v10, %v9178_v30  ;;  %v3430_v3 = vadd.f32 %v3429_v27, %v9317_v4 }
 0xb4a   : > { %v3167_v41 = vadd.f32 %v3166_v13, %v3153_v16  ;;  %v3185_v51 = vadd.f32 %v3184_v34, %v3155_v26  ;;  %v3440_v6 = vmul.f32 0.01, %v3432_v11  ;;  %v3433_v56 = vmul.f32 %v3359_v36, %v9137_v19 }
 0xb4b   : > { %v3161_v44 = vrot.slane %v3160_v55, 2  ;;  %v3177_v23 = vrot.slane %v3176_v18, 4  ;;  %vm3436_vm2 = vcmp.ge.f32.partialorder %v3432_v11, 0.0  ;;  %vm3438_vm3 = vcmp.ge.f32.partialorder %v3434_v32, 0.0 }
 0xb4c   : > { %v3168_v48 = vrot.slane %v3167_v41, 4  ;;  %v3186_v38 = vrot.slane %v3185_v51, 4  ;;  %vm3437_vm4 = vcmp.ge.f32.partialorder %v3433_v56, 0.0  ;;  %v3442_v28 = vmul.f32 0.01, %v3434_v32 }
 0xb4d   : > { %v3162_v62 = vadd.f32 %v3161_v44, %v3160_v55  ;;  %v3178_v53 = vadd.f32 %v3177_v23, %v3176_v18  ;;  %v3441_v24 = vmul.f32 0.01, %v3433_v56  ;;  %v3435_v2 = vmul.f32 %v3430_v3, %v9140_v35 }
 0xb4e   : > { %v3169_v20 = vadd.f32 %v3168_v48, %v3167_v41  ;;  %v3187_v5 = vadd.f32 %v3186_v38, %v3185_v51  ;;  %v3444_v58 = vsel %vm3436_vm2, %v3432_v11, %v3440_v6  ;;  %v3446_v46 = vsel %vm3438_vm3, %v3434_v32, %v3442_v28 }
 0xb4f   : > { %v3179_v7 = vrot.slane %v3178_v53, 2  ;;  %v3163_v61 = vrot.slane %v3162_v62, 1  ;;  %v3445_v63 = vsel %vm3437_vm4, %v3433_v56, %v3441_v24  ;;  %vm3439_vm5 = vcmp.ge.f32.partialorder %v3435_v2, 0.0 }
 0xb50   : > { %v3170_v45 = vrot.slane %v3169_v20, 2  ;;  %v3188_v54 = vrot.slane %v3187_v5, 2  ;;  %v3449_v9 = vadd.f32 %v3445_v63, %v3359_v36  ;;  %v3443_v25 = vmul.f32 0.01, %v3435_v2  ;;  %v9814_v36 = vld [vmem:[%s10525_s1 + $0x10] sm:$0xff] }
 0xb51   : > { %v3180_v50 = vadd.f32 %v3179_v7, %v3178_v53  ;;  %v3448_v49 = vadd.f32 %v3444_v58, %v3357_v57  ;;  %v3164_v14 = vadd.f32 %v3163_v61, %v3162_v62  ;;  %v3450_v41 = vadd.f32 %v3446_v46, %v3428_v10 }
 0xb52   : > { %v3171_v40 = vadd.f32 %v3170_v45, %v3169_v20  ;;  %v3189_v13 = vadd.f32 %v3188_v54, %v3187_v5  ;;  %v3447_v26 = vsel %vm3439_vm5, %v3435_v2, %v3443_v25  ;;  %3482 = vmatprep.subr.mxu0 %v3449_v9 }
 0xb53   : > { %v3181_v39 = vrot.slane %v3180_v50, 1  ;;  %v3451_v55 = vadd.f32 %v3447_v26, %v3430_v3  ;;  %3483 = vmatpush1.msra.mxu0 %v3448_v49  ;;  %v3192_v57 = vadd.f32 %v3164_v14, %v9529_v47 }
 0xb54   : > { %v3172_v34 = vrot.slane %v3171_v40, 1  ;;  %v3190_v16 = vrot.slane %v3189_v13, 1  ;;  %8321 = vmatmul.mubr.msk.f32.vlgmr.msra.gmra.mxu0 %vm253_vm0, %v9814_v36 }
 0xb55   : > { %v3182_v27 = vadd.f32 %v3181_v39, %v3180_v50  ;;  %3553 = vmatprep.subr.mxu1 %v3451_v55  ;;  %3662 = vmatprep.mubr.f32.mxu0 %v10563_v22 }
 0xb56   : > { %v3173_v11 = vadd.f32 %v3172_v34, %v3171_v40  ;;  %v3191_v18 = vadd.f32 %v3190_v16, %v3189_v13  ;;  %3554 = vmatpush1.msra.mxu1 %v3450_v41 }
 0xb57   : > { %v3194_v51 = vadd.f32 %v3182_v27, %v9529_v47  ;;  %8322 = vmatmul.mubr.msk.f32.vlgmr.msra.gmra.mxu1 %vm253_vm0, %v9814_v36 }
 0xb58   : > { %v3193_v32 = vadd.f32 %v3173_v11, %v9529_v47  ;;  %v3195_v10 = vadd.f32 %v3191_v18, %v9529_v47  ;;  %3733 = vmatprep.mubr.f32.mxu1 %v10563_v22 }
 0xb5a   : > { %v3200_v44 = vcombine.low %v3192_v57, %v3193_v32  ;;  %v3201_v23 = vcombine.low %v3194_v51, %v3195_v10 }
 0xb5c   : > { %v3208_v3 = vrot.slane %v3200_v44, %v9532_v59  ;;  %v3215_v48 = vrot.slane %v3201_v23, %v9532_v59 }
 0xb5e   : > { %v3216_v38 = vcombine.low %v3208_v3, %v3215_v48 }
 0xb60   : > { %v3223_v6 = vrot.slane %v3216_v38, %v9532_v59 }
 0xb62   : > { %8316 = vst.msk [vmem:[%s9547_s17 + $0x2] ss:$8 sm:$0xf] %vm9542_vm14, %v3223_v6  ;;  %v10614_v6 = vld [vmem:[#allocation9_spill] sm:$0xff] }
 0xc14   : > { %v3518_v56 = vpop.f32.mrf.mxu0 }
 0xc15   : > { %v3519_v62 = vadd.f32 %v3518_v56, %v9333_v42  ;;  %v10615_v56 = vld [vmem:[#allocation8_spill] sm:$0xff] }
 0xc16   : > { %v3520_v53 = vpop.f32.mrf.mxu0 }
 0xc17   : > { %v3589_v20 = vpop.f32.mrf.mxu1  ;;  %v3521_v5 = vadd.f32 %v3520_v53, %v9333_v42  ;;  %v3594_v2 = vmul.f32 %v3519_v62, %v9172_v52  ;;  %v10616_v62 = vld [vmem:[#allocation10_spill] sm:$0xff]  ;;  %v9882_v53 = vld [vmem:[%s10525_s1 + $0x28] sm:$0xff] }
 0xc18   : > { %v3590_v7 = vadd.f32 %v3589_v20, %v9333_v42  ;;  %v9899_v20 = vld [vmem:[%s10525_s1 + $0x38] sm:$0xff] }
 0xc19   : > { %v3595_v28 = vmul.f32 %v3521_v5, %v9137_v19  ;;  %v3591_v24 = vpop.f32.mrf.mxu1 }
 0xc1a   : > { %v3592_v61 = vadd.f32 %v3591_v24, %v9333_v42  ;;  %v3596_v54 = vmul.f32 %v3590_v7, %v9178_v30 }
 0xc1b   : > { %3628 = vmatprep.subr.mxu0 %v3595_v28 }
 0xc1c   : > { %v3597_v45 = vmul.f32 %v3592_v61, %v9140_v35  ;;  %3629 = vmatpush1.msra.mxu0 %v3594_v2 }
 0xc1d   : > { %8323 = vmatmul.mubr.msk.f32.vlgmr.msra.gmra.mxu0 %vm253_vm0, %v9814_v36 }
 0xc1e   : > { %3699 = vmatprep.subr.mxu1 %v3597_v45  ;;  %3824 = vmatprep.mubr.f32.mxu0 %v10563_v22 }
 0xc1f   : > { %3700 = vmatpush1.msra.mxu1 %v3596_v54 }
 0xc20   : > { %8324 = vmatmul.mubr.msk.f32.vlgmr.msra.gmra.mxu1 %vm253_vm0, %v9814_v36 }
 0xc21   : > { %3895 = vmatprep.mubr.f32.mxu1 %v10563_v22 }
 0xcdd   : > { %v3664_v58 = vpop.f32.mrf.mxu0 }
 0xcde   : > { %v3665_v50 = vadd.f32 %v3664_v58, %v9333_v42 }
 0xcdf   : > { %v3666_v63 = vpop.f32.mrf.mxu0 }
 0xce0   : > { %v3740_v40 = vmul.f32 %v3665_v50, %v9172_v52  ;;  %v3735_v13 = vpop.f32.mrf.mxu1  ;;  %v3667_v9 = vadd.f32 %v3666_v63, %v9333_v42 }
 0xce1   : > { %v3736_v25 = vadd.f32 %v3735_v13, %v9333_v42 }
 0xce2   : > { %vm3744_vm6 = vcmp.ge.f32.partialorder %v3740_v40, 0.0  ;;  %v3748_v39 = vmul.f32 0.01, %v3740_v40  ;;  %v3741_v49 = vmul.f32 %v3667_v9, %v9137_v19  ;;  %v3737_v46 = vpop.f32.mrf.mxu1 }
 0xce3   : > { %v3742_v14 = vmul.f32 %v3736_v25, %v9178_v30  ;;  %v3738_v34 = vadd.f32 %v3737_v46, %v9333_v42 }
 0xce4   : > { %vm3745_vm7 = vcmp.ge.f32.partialorder %v3741_v49, 0.0  ;;  %v3749_v16 = vmul.f32 0.01, %v3741_v49  ;;  %v3752_v26 = vsel %vm3744_vm6, %v3740_v40, %v3748_v39 }
 0xce5   : > { %vm3746_vm8 = vcmp.ge.f32.partialorder %v3742_v14, 0.0  ;;  %v3750_v27 = vmul.f32 0.01, %v3742_v14  ;;  %v3743_v52 = vmul.f32 %v3738_v34, %v9140_v35  ;;  %v3756_v41 = vadd.f32 %v3752_v26, %v3665_v50 }
 0xce6   : > { %v3753_v55 = vsel %vm3745_vm7, %v3741_v49, %v3749_v16 }
 0xce7   : > { %v3757_v11 = vadd.f32 %v3753_v55, %v3667_v9  ;;  %vm3747_vm9 = vcmp.ge.f32.partialorder %v3743_v52, 0.0  ;;  %v3751_v18 = vmul.f32 0.01, %v3743_v52  ;;  %v3754_v57 = vsel %vm3746_vm8, %v3742_v14, %v3750_v27 }
 0xce8   : > { %v3758_v30 = vadd.f32 %v3754_v57, %v3736_v25 }
 0xce9   : > { %v3755_v51 = vsel %vm3747_vm9, %v3743_v52, %v3751_v18  ;;  %3790 = vmatprep.subr.mxu0 %v3757_v11 }
 0xcea   : > { %v3759_v19 = vadd.f32 %v3755_v51, %v3738_v34  ;;  %3791 = vmatpush1.msra.mxu0 %v3756_v41 }
 0xceb   : > { %8325 = vmatmul.mubr.msk.f32.vlgmr.msra.gmra.mxu0 %vm253_vm0, %v9719_v33 }
 0xcec   : > { %3861 = vmatprep.subr.mxu1 %v3759_v19  ;;  %3966 = vmatprep.mubr.f32.mxu0 %v10563_v22 }
 0xced   : > { %3862 = vmatpush1.msra.mxu1 %v3758_v30 }
 0xcee   : > { %8326 = vmatmul.mubr.msk.f32.vlgmr.msra.gmra.mxu1 %vm253_vm0, %v9719_v33  ;;  %v9867_v33 = vld [vmem:[%s10525_s1 + $0x20] sm:$0xff] }
 0xcef   : > { %4055 = vmatprep.mubr.f32.mxu1 %v10563_v22 }
 0xdab   : > { %v3826_v35 = vpop.f32.mrf.mxu0 }
 0xdac   : > { %v3827_v23 = vadd.f32 %v3826_v35, %v9393_v21 }
 0xdad   : > { %v3828_v32 = vpop.f32.mrf.mxu0 }
 0xdae   : > { %v3897_v10 = vpop.f32.mrf.mxu1  ;;  %v3829_v44 = vadd.f32 %v3828_v32, %v9393_v21 }
 0xdaf   : > { %v3898_v38 = vadd.f32 %v3897_v10, %v9393_v21 }
 0xdb0   : > { %v3899_v3 = vpop.f32.mrf.mxu1  ;;  %3932 = vmatprep.subr.mxu0 %v3829_v44 }
 0xdb1   : > { %v3900_v48 = vadd.f32 %v3899_v3, %v9393_v21  ;;  %3933 = vmatpush1.msra.mxu0 %v3827_v23 }
 0xdb2   : > { %8327 = vmatmul.mubr.msk.f32.vlgmr.msra.gmra.mxu0 %vm253_vm0, %v9867_v33  ;;  %4308 = vmatprep.subr.mxu0 %v9186_v31 }
 0xdb3   : > { %4021 = vmatprep.subr.mxu1 %v3900_v48  ;;  %4309 = vmatpush1.msra.mxu0 %v10614_v6 }
 0xdb4   : > { %4022 = vmatpush1.msra.mxu1 %v3898_v38  ;;  %3972 = vmatprep.mubr.f32.mxu0 %v10563_v22 }
 0xdb5   : > { %8331 = vmatmul.mubr.msk.f32.vlgmr.msra.gmra.mxu1 %vm253_vm0, %v9867_v33  ;;  %4379 = vmatprep.subr.mxu1 %v10615_v56 }
 0xdb6   : > { %4380 = vmatpush1.msra.mxu1 %v10616_v62  ;;  %4061 = vmatprep.mubr.f32.mxu1 %v10563_v22 }
 0xdb7   : > { %8328 = vmatmul.mubr.msk.f32.gmra.mxu0 %vm253_vm0, %v9882_v53 }
 0xdb8   : > { %3978 = vmatprep.mubr.f32.mxu0 %v10563_v22 }
 0xdb9   : > { %8332 = vmatmul.mubr.msk.f32.gmra.mxu1 %vm253_vm0, %v9882_v53 }
 0xdba   : > { %4067 = vmatprep.mubr.f32.mxu1 %v10563_v22 }
 0xdbb   : > { %8329 = vmatmul.mubr.msk.f32.gmra.mxu0 %vm253_vm0, %v9747_v29 }
 0xdbc   : > { %3984 = vmatprep.mubr.f32.mxu0 %v10563_v22 }
 0xdbd   : > { %8333 = vmatmul.mubr.msk.f32.gmra.mxu1 %vm253_vm0, %v9747_v29  ;;  %v9910_v29 = vld [vmem:[%s10525_s1 + $0x8] sm:$0xff] }
 0xdbe   : > { %4073 = vmatprep.mubr.f32.mxu1 %v10563_v22 }
 0xdbf   : > { %8330 = vmatmul.mubr.msk.f32.gmra.mxu0 %vm253_vm0, %v9899_v20 }
 0xdc0   : > { %4342 = vmatprep.mubr.f32.mxu0 %v10563_v22 }
 0xdc1   : > { %8334 = vmatmul.mubr.msk.f32.gmra.mxu1 %vm253_vm0, %v9899_v20 }
 0xdc2   : > { %4413 = vmatprep.mubr.f32.mxu1 %v10563_v22 }
 0xdc3   : > { %8338 = vmatmul.mubr.msk.f32.vlgmr.msra.gmra.mxu0 %vm253_vm0, %v9910_v29 }
 0xdc4   : > { %4504 = vmatprep.mubr.f32.mxu0 %v10563_v22 }
 0xdc5   : > { %8339 = vmatmul.mubr.msk.f32.vlgmr.msra.gmra.mxu1 %vm253_vm0, %v9910_v29 }
 0xdc6   : > { %4575 = vmatprep.mubr.f32.mxu1 %v10563_v22 }
 0xe72   : > { %v3968_v5 = vpop.f32.mrf.mxu0 }
 0xe73   : > { %v3969_v7 = vadd.f32 %v3968_v5, %v9433_v8 }
 0xe74   : > { %v3970_v28 = vpop.f32.mrf.mxu0 }
 0xe75   : > { %vm4080_vm10 = vcmp.ge.f32.partialorder %v3969_v7, 0.0  ;;  %v4096_v24 = vmul.f32 0.01, %v3969_v7  ;;  %v4057_v2 = vpop.f32.mrf.mxu1  ;;  %v3971_v61 = vadd.f32 %v3970_v28, %v9433_v8 }
 0xe76   : > { %v4058_v45 = vadd.f32 %v4057_v2, %v9433_v8 }
 0xe77   : > { %v4112_v54 = vsel %vm4080_vm10, %v3969_v7, %v4096_v24  ;;  %vm4081_vm11 = vcmp.ge.f32.partialorder %v3971_v61, 0.0  ;;  %v4097_v58 = vmul.f32 0.01, %v3971_v61  ;;  %v4059_v50 = vpop.f32.mrf.mxu1  ;;  %v3974_v63 = vpop.f32.mrf.mxu0 }
 0xe78   : > { %vm4082_vm12 = vcmp.ge.f32.partialorder %v4058_v45, 0.0  ;;  %v4098_v40 = vmul.f32 0.01, %v4058_v45  ;;  %v4060_v13 = vadd.f32 %v4059_v50, %v9433_v8  ;;  %v3975_v25 = vadd.f32 %v3974_v63, %v9438_v60 }
 0xe79   : > { %v4113_v9 = vsel %vm4081_vm11, %v3971_v61, %v4097_v58  ;;  %v4063_v39 = vpop.f32.mrf.mxu1  ;;  %v3976_v49 = vpop.f32.mrf.mxu0  ;;  %v4128_v46 = vmul.f32 %v4112_v54, %v9475_v0 }
 0xe7a   : > { %v4114_v14 = vsel %vm4082_vm12, %v4058_v45, %v4098_v40  ;;  %vm4083_vm13 = vcmp.ge.f32.partialorder %v4060_v13, 0.0  ;;  %v4099_v34 = vmul.f32 0.01, %v4060_v13  ;;  %v4129_v16 = vmul.f32 %v4113_v9, %v9475_v0 }
 0xe7b   : > { %vm4084_vm15 = vcmp.ge.f32.partialorder %v3975_v25, 0.0  ;;  %v4100_v26 = vmul.f32 0.01, %v3975_v25  ;;  %v4064_v27 = vadd.f32 %v4063_v39, %v9438_v60  ;;  %v4065_v52 = vpop.f32.mrf.mxu1  ;;  %v3980_v55 = vpop.f32.mrf.mxu0  ;;  %v4130_v11 = vmul.f32 %v4114_v14, %v9475_v0 }
 0xe7c   : > { %v3977_v18 = vadd.f32 %v3976_v49, %v9438_v60  ;;  %v4066_v41 = vadd.f32 %v4065_v52, %v9438_v60  ;;  %v3981_v57 = vadd.f32 %v3980_v55, %v9448_v15  ;;  %v4115_v51 = vsel %vm4083_vm13, %v4060_v13, %v4099_v34 }
 0xe7d   : > { %v4116_v19 = vsel %vm4084_vm15, %v3975_v25, %v4100_v26  ;;  %vm4086_vm1 = vcmp.ge.f32.partialorder %v4064_v27, 0.0  ;;  %v4102_v30 = vmul.f32 0.01, %v4064_v27  ;;  %v4069_v35 = vpop.f32.mrf.mxu1  ;;  %v3982_v32 = vpop.f32.mrf.mxu0  ;;  %v4131_v7 = vmul.f32 %v4115_v51, %v9475_v0 }
 0xe7e   : > { %v4132_v10 = vmul.f32 %v4116_v19, %v9478_v1  ;;  %vm4085_vm2 = vcmp.ge.f32.partialorder %v3977_v18, 0.0  ;;  %v4101_v44 = vmul.f32 0.01, %v3977_v18  ;;  %vm4087_vm3 = vcmp.ge.f32.partialorder %v4066_v41, 0.0 }
 0xe7f   : > { %v4118_v23 = vsel %vm4086_vm1, %v4064_v27, %v4102_v30  ;;  %v4103_v3 = vmul.f32 0.01, %v4066_v41  ;;  %vm4088_vm4 = vcmp.ge.f32.partialorder %v3981_v57, 0.0  ;;  %v4104_v48 = vmul.f32 0.01, %v3981_v57  ;;  %v4071_v38 = vpop.f32.mrf.mxu1  ;;  %v3986_v5 = vpop.f32.mrf.mxu0 }
 0xe80   : > { %v4134_v28 = vmul.f32 %v4118_v23, %v9478_v1  ;;  %v4117_v24 = vsel %vm4085_vm2, %v3977_v18, %v4101_v44  ;;  %v4070_v2 = vadd.f32 %v4069_v35, %v9448_v15  ;;  %v3983_v58 = vadd.f32 %v3982_v32, %v9448_v15 }
 0xe81   : > { %v4133_v61 = vmul.f32 %v4117_v24, %v9478_v1  ;;  %v4119_v45 = vsel %vm4087_vm3, %v4066_v41, %v4103_v3  ;;  %v4120_v54 = vsel %vm4088_vm4, %v3981_v57, %v4104_v48  ;;  %v4075_v50 = vpop.f32.mrf.mxu1  ;;  %v3988_v63 = vpop.f32.mrf.mxu0  ;;  %v4144_v40 = vadd.f32 %v4132_v10, %v4128_v46 }
 0xe82   : > { %v4162_v13 = vadd.f32 %v4134_v28, %v4130_v11  ;;  %v4135_v9 = vmul.f32 %v4119_v45, %v9478_v1  ;;  %vm4090_vm5 = vcmp.ge.f32.partialorder %v4070_v2, 0.0  ;;  %v4136_v25 = vmul.f32 %v4120_v54, %v9497_v17 }
 0xe83   : > { %v4106_v39 = vmul.f32 0.01, %v4070_v2  ;;  %vm4089_vm6 = vcmp.ge.f32.partialorder %v3983_v58, 0.0  ;;  %v4105_v49 = vmul.f32 0.01, %v3983_v58  ;;  %v4153_v14 = vadd.f32 %v4133_v61, %v4129_v16  ;;  %v4077_v52 = vpop.f32.mrf.mxu1  ;;  %v4344_v55 = vpop.f32.mrf.mxu0 }
 0xe84   : > { %v4171_v34 = vadd.f32 %v4135_v9, %v4131_v7  ;;  %v4072_v26 = vadd.f32 %v4071_v38, %v9448_v15  ;;  %v3987_v27 = vadd.f32 %v3986_v5, %v9462_v43  ;;  %v4076_v46 = vadd.f32 %v4075_v50, %v9462_v43 }
 0xe85   : > { %v4122_v18 = vsel %vm4090_vm5, %v4070_v2, %v4106_v39  ;;  %v4121_v41 = vsel %vm4089_vm6, %v3983_v58, %v4105_v49  ;;  %v3989_v11 = vadd.f32 %v3988_v63, %v9462_v43  ;;  %v4145_v35 = vadd.f32 %v4144_v40, %v4136_v25  ;;  %v4415_v44 = vpop.f32.mrf.mxu1  ;;  %v4346_v23 = vpop.f32.mrf.mxu0 }
 0xe86   : > { %v4138_v57 = vmul.f32 %v4122_v18, %v9497_v17  ;;  %v4137_v51 = vmul.f32 %v4121_v41, %v9497_v17  ;;  %vm4091_vm7 = vcmp.ge.f32.partialorder %v4072_v26, 0.0  ;;  %v4107_v19 = vmul.f32 0.01, %v4072_v26 }
 0xe87   : > { %vm4092_vm8 = vcmp.ge.f32.partialorder %v3987_v27, 0.0  ;;  %v4108_v16 = vmul.f32 0.01, %v3987_v27  ;;  %vm4094_vm9 = vcmp.ge.f32.partialorder %v4076_v46, 0.0  ;;  %v4110_v30 = vmul.f32 0.01, %v4076_v46 }
 0xe88   : > { %v4163_v32 = vadd.f32 %v4162_v13, %v4138_v57  ;;  %v4123_v10 = vsel %vm4091_vm7, %v4072_v26, %v4107_v19  ;;  %vm4093_vm10 = vcmp.ge.f32.partialorder %v3989_v11, 0.0  ;;  %v4109_v5 = vmul.f32 0.01, %v3989_v11  ;;  %v4417_v13 = vpop.f32.mrf.mxu1 }
 0xe89   : > { %v4139_v3 = vmul.f32 %v4123_v10, %v9497_v17  ;;  %v4124_v48 = vsel %vm4092_vm8, %v3987_v27, %v4108_v16  ;;  %v4126_v38 = vsel %vm4094_vm9, %v4076_v46, %v4110_v30  ;;  %v4078_v24 = vadd.f32 %v4077_v52, %v9462_v43 }
 0xe8a   : > { %v4140_v7 = vmul.f32 %v4124_v48, %v9501_v37  ;;  %v4142_v28 = vmul.f32 %v4126_v38, %v9501_v37  ;;  %v4345_v2 = vadd.f32 %v4344_v55, %v9317_v4  ;;  %v4154_v61 = vadd.f32 %v4153_v14, %v4137_v51 }
 0xe8b   : > { %v4125_v45 = vsel %vm4093_vm10, %v3989_v11, %v4109_v5  ;;  %v4416_v54 = vadd.f32 %v4415_v44, %v9317_v4  ;;  %v4347_v58 = vadd.f32 %v4346_v23, %v9317_v4  ;;  %vm4095_vm11 = vcmp.ge.f32.partialorder %v4078_v24, 0.0 }
 0xe8c   : > { %v4146_v50 = vadd.f32 %v4145_v35, %v4140_v7  ;;  %v4164_v63 = vadd.f32 %v4163_v32, %v4142_v28  ;;  %v4141_v40 = vmul.f32 %v4125_v45, %v9501_v37  ;;  %v4111_v9 = vmul.f32 0.01, %v4078_v24 }
 0xe8d   : > { %v4420_v25 = vmul.f32 %v4345_v2, %v10614_v6  ;;  %v4422_v39 = vmul.f32 %v4416_v54, %v10616_v62  ;;  %v4421_v49 = vmul.f32 %v4347_v58, %v9186_v31  ;;  %v4172_v26 = vadd.f32 %v4171_v34, %v4139_v3 }
 0xe8e   : > { %v4147_v14 = vrot.slane %v4146_v50, 4  ;;  %v4165_v27 = vrot.slane %v4164_v63, 4  ;;  %v4155_v52 = vadd.f32 %v4154_v61, %v4141_v40  ;;  %v4127_v55 = vsel %vm4095_vm11, %v4078_v24, %v4111_v9 }
 0xe8f   : > { %vm4424_vm12 = vcmp.ge.f32.partialorder %v4420_v25, 0.0  ;;  %v4428_v18 = vmul.f32 0.01, %v4420_v25  ;;  %v4418_v41 = vadd.f32 %v4417_v13, %v9317_v4  ;;  %v4143_v51 = vmul.f32 %v4127_v55, %v9501_v37 }
 0xe90   : > { %v4148_v46 = vadd.f32 %v4147_v14, %v4146_v50  ;;  %v4166_v11 = vadd.f32 %v4165_v27, %v4164_v63  ;;  %v4156_v57 = vrot.slane %v4155_v52, 4  ;;  %vm4426_vm13 = vcmp.ge.f32.partialorder %v4422_v39, 0.0 }
 0xe91   : > { %vm4425_vm15 = vcmp.ge.f32.partialorder %v4421_v49, 0.0  ;;  %v4429_v19 = vmul.f32 0.01, %v4421_v49  ;;  %v4173_v34 = vadd.f32 %v4172_v26, %v4143_v51  ;;  %v4432_v32 = vsel %vm4424_vm12, %v4420_v25, %v4428_v18 }
 0xe92   : > { %v4149_v16 = vrot.slane %v4148_v46, 2  ;;  %v4167_v30 = vrot.slane %v4166_v11, 2  ;;  %v4157_v35 = vadd.f32 %v4156_v57, %v4155_v52  ;;  %v4430_v10 = vmul.f32 0.01, %v4422_v39 }
 0xe93   : > { %v4433_v44 = vsel %vm4425_vm15, %v4421_v49, %v4429_v19  ;;  %v4423_v23 = vmul.f32 %v4418_v41, %v10615_v56  ;;  %v4174_v5 = vrot.slane %v4173_v34, 4  ;;  %v4436_v50 = vadd.f32 %v4432_v32, %v4345_v2 }
 0xe94   : > { %v4150_v3 = vadd.f32 %v4149_v16, %v4148_v46  ;;  %v4168_v48 = vadd.f32 %v4167_v30, %v4166_v11  ;;  %v4158_v38 = vrot.slane %v4157_v35, 2  ;;  %v4437_v7 = vadd.f32 %v4433_v44, %v4347_v58 }
 0xe95   : > { %vm4427_vm1 = vcmp.ge.f32.partialorder %v4423_v23, 0.0  ;;  %v4431_v28 = vmul.f32 0.01, %v4423_v23  ;;  %v4175_v45 = vadd.f32 %v4174_v5, %v4173_v34  ;;  %v4434_v63 = vsel %vm4426_vm13, %v4422_v39, %v4430_v10 }
 0xe96   : > { %v4151_v24 = vrot.slane %v4150_v3, 1  ;;  %v4159_v61 = vadd.f32 %v4158_v38, %v4157_v35  ;;  %4470 = vmatprep.subr.mxu0 %v4437_v7  ;;  %v4169_v9 = vrot.slane %v4168_v48, 1  ;;  %v4438_v27 = vadd.f32 %v4434_v63, %v4416_v54 }
 0xe97   : > { %v4435_v40 = vsel %vm4427_vm1, %v4423_v23, %v4431_v28  ;;  %v4176_v49 = vrot.slane %v4175_v45, 2  ;;  %4471 = vmatpush1.msra.mxu0 %v4436_v50 }
 0xe98   : > { %v4152_v13 = vadd.f32 %v4151_v24, %v4150_v3  ;;  %v4160_v25 = vrot.slane %v4159_v61, 1  ;;  %v4439_v26 = vadd.f32 %v4435_v40, %v4418_v41  ;;  %8340 = vmatmul.mubr.msk.f32.vlgmr.msra.gmra.mxu0 %vm253_vm0, %v9814_v36  ;;  %v4170_v39 = vadd.f32 %v4169_v9, %v4168_v48 }
 0xe99   : > { %v4177_v14 = vadd.f32 %v4176_v49, %v4175_v45  ;;  %4650 = vmatprep.mubr.f32.mxu0 %v10563_v22 }
 0xe9a   : > { %v4161_v58 = vadd.f32 %v4160_v25, %v4159_v61  ;;  %4541 = vmatprep.subr.mxu1 %v4439_v26  ;;  %v4180_v2 = vadd.f32 %v4152_v13, %v9529_v47  ;;  %v4182_v54 = vadd.f32 %v4170_v39, %v9529_v47 }
 0xe9b   : > { %v4178_v55 = vrot.slane %v4177_v14, 1  ;;  %4542 = vmatpush1.msra.mxu1 %v4438_v27 }
 0xe9c   : > { %v4181_v52 = vadd.f32 %v4161_v58, %v9529_v47  ;;  %8341 = vmatmul.mubr.msk.f32.vlgmr.msra.gmra.mxu1 %vm253_vm0, %v9814_v36 }
 0xe9d   : > { %v4179_v41 = vadd.f32 %v4178_v55, %v4177_v14  ;;  %4721 = vmatprep.mubr.f32.mxu1 %v10563_v22 }
 0xe9e   : > { %v4188_v18 = vcombine.low %v4180_v2, %v4181_v52 }
 0xe9f   : > { %v4183_v46 = vadd.f32 %v4179_v41, %v9529_v47 }
 0xea0   : > { %v4196_v11 = vrot.slane %v4188_v18, %v9532_v59 }
 0xea1   : > { %v4189_v57 = vcombine.low %v4182_v54, %v4183_v46 }
 0xea3   : > { %v4203_v51 = vrot.slane %v4189_v57, %v9532_v59 }
 0xea5   : > { %v4204_v19 = vcombine.low %v4196_v11, %v4203_v51 }
 0xea7   : > { %v4211_v16 = vrot.slane %v4204_v19, %v9532_v59  ;;  %v10617_v19 = vld [vmem:[#allocation11_spill] sm:$0xff] }
 0xea9   : > { %8335 = vst.msk [vmem:[%s9547_s17 + $0x3] ss:$8 sm:$0xf] %vm9542_vm14, %v4211_v16 }
 0xf58   : > { %v4506_v30 = vpop.f32.mrf.mxu0 }
 0xf59   : > { %v4507_v35 = vadd.f32 %v4506_v30, %v9333_v42  ;;  %v10618_v30 = vld [vmem:[#allocation13_spill] sm:$0xff] }
 0xf5a   : > { %v4508_v34 = vpop.f32.mrf.mxu0 }
 0xf5b   : > { %v4509_v32 = vadd.f32 %v4508_v34, %v9333_v42  ;;  %v4582_v23 = vmul.f32 %v4507_v35, %v10614_v6  ;;  %v10619_v34 = vld [vmem:[#allocation12_spill] sm:$0xff] }
 0xf5c   : > { %v4577_v10 = vpop.f32.mrf.mxu1 }
 0xf5d   : > { %v4583_v44 = vmul.f32 %v4509_v32, %v9186_v31  ;;  %v4578_v3 = vadd.f32 %v4577_v10, %v9333_v42  ;;  %v10620_v32 = vld [vmem:[#allocation14_spill] sm:$0xff] }
 0xf5e   : > { %v4579_v48 = vpop.f32.mrf.mxu1  ;;  %v10028_v10 = vld [vmem:[%s10525_s1 + $0x30] sm:$0xff] }
 0xf5f   : > { %v4580_v38 = vadd.f32 %v4579_v48, %v9333_v42  ;;  %4616 = vmatprep.subr.mxu0 %v4583_v44  ;;  %v4584_v7 = vmul.f32 %v4578_v3, %v10616_v62 }
 0xf60   : > { %4617 = vmatpush1.msra.mxu0 %v4582_v23 }
 0xf61   : > { %v4585_v5 = vmul.f32 %v4580_v38, %v10615_v56  ;;  %8342 = vmatmul.mubr.msk.f32.vlgmr.msra.gmra.mxu0 %vm253_vm0, %v9814_v36 }
 0xf62   : > { %4812 = vmatprep.mubr.f32.mxu0 %v10563_v22 }
 0xf63   : > { %4687 = vmatprep.subr.mxu1 %v4585_v5 }
 0xf64   : > { %4688 = vmatpush1.msra.mxu1 %v4584_v7 }
 0xf65   : > { %8343 = vmatmul.mubr.msk.f32.vlgmr.msra.gmra.mxu1 %vm253_vm0, %v9814_v36 }
 0xf66   : > { %4883 = vmatprep.mubr.f32.mxu1 %v10563_v22 }
0x1021   : > { %v4652_v28 = vpop.f32.mrf.mxu0 }
0x1022   : > { %v4653_v24 = vadd.f32 %v4652_v28, %v9333_v42 }
0x1023   : > { %v4654_v61 = vpop.f32.mrf.mxu0 }
0x1024   : > { %v4728_v45 = vmul.f32 %v4653_v24, %v10614_v6  ;;  %v4655_v50 = vadd.f32 %v4654_v61, %v9333_v42 }
0x1025   : > { %v4723_v63 = vpop.f32.mrf.mxu1 }
0x1026   : > { %vm4732_vm2 = vcmp.ge.f32.partialorder %v4728_v45, 0.0  ;;  %v4736_v40 = vmul.f32 0.01, %v4728_v45  ;;  %v4724_v13 = vadd.f32 %v4723_v63, %v9333_v42  ;;  %v4729_v9 = vmul.f32 %v4655_v50, %v9186_v31 }
0x1027   : > { %v4725_v25 = vpop.f32.mrf.mxu1 }
0x1028   : > { %v4730_v36 = vmul.f32 %v4724_v13, %v10616_v62  ;;  %vm4733_vm3 = vcmp.ge.f32.partialorder %v4729_v9, 0.0  ;;  %v4737_v49 = vmul.f32 0.01, %v4729_v9  ;;  %v4740_v26 = vsel %vm4732_vm2, %v4728_v45, %v4736_v40  ;;  %v10000_v62 = vld [vmem:[%s10525_s1 + $0x18] sm:$0xff] }
0x1029   : > { %v4726_v58 = vadd.f32 %v4725_v25, %v9333_v42  ;;  %v4744_v39 = vadd.f32 %v4740_v26, %v4653_v24 }
0x102a   : > { %v4738_v14 = vmul.f32 0.01, %v4730_v36  ;;  %v4741_v27 = vsel %vm4733_vm3, %v4729_v9, %v4737_v49  ;;  %vm4734_vm4 = vcmp.ge.f32.partialorder %v4730_v36, 0.0 }
0x102b   : > { %v4745_v6 = vadd.f32 %v4741_v27, %v4655_v50  ;;  %v4731_v2 = vmul.f32 %v4726_v58, %v10615_v56 }
0x102c   : > { %v4742_v55 = vsel %vm4734_vm4, %v4730_v36, %v4738_v14 }
0x102d   : > { %vm4735_vm5 = vcmp.ge.f32.partialorder %v4731_v2, 0.0  ;;  %v4739_v52 = vmul.f32 0.01, %v4731_v2  ;;  %4778 = vmatprep.subr.mxu0 %v4745_v6  ;;  %v4746_v41 = vadd.f32 %v4742_v55, %v4724_v13 }
0x102e   : > { %4779 = vmatpush1.msra.mxu0 %v4744_v39 }
0x102f   : > { %v4743_v31 = vsel %vm4735_vm5, %v4731_v2, %v4739_v52  ;;  %8344 = vmatmul.mubr.msk.f32.vlgmr.msra.gmra.mxu0 %vm253_vm0, %v10000_v62 }
0x1030   : > { %v4747_v18 = vadd.f32 %v4743_v31, %v4726_v58  ;;  %4954 = vmatprep.mubr.f32.mxu0 %v10563_v22 }
0x1032   : > { %4849 = vmatprep.subr.mxu1 %v4747_v18 }
0x1033   : > { %4850 = vmatpush1.msra.mxu1 %v4746_v41 }
0x1034   : > { %8345 = vmatmul.mubr.msk.f32.vlgmr.msra.gmra.mxu1 %vm253_vm0, %v10000_v62 }
0x1035   : > { %5043 = vmatprep.mubr.f32.mxu1 %v10563_v22 }
0x10ef   : > { %v4814_v56 = vpop.f32.mrf.mxu0 }
0x10f0   : > { %v4815_v11 = vadd.f32 %v4814_v56, %v9393_v21 }
0x10f1   : > { %v4816_v54 = vpop.f32.mrf.mxu0 }
0x10f2   : > { %v4817_v46 = vadd.f32 %v4816_v54, %v9393_v21 }
0x10f4   : > { %v4885_v57 = vpop.f32.mrf.mxu1  ;;  %4920 = vmatprep.subr.mxu0 %v4817_v46 }
0x10f5   : > { %4921 = vmatpush1.msra.mxu0 %v4815_v11  ;;  %v4886_v35 = vadd.f32 %v4885_v57, %v9393_v21 }
0x10f6   : > { %v4887_v51 = vpop.f32.mrf.mxu1  ;;  %8346 = vmatmul.mubr.msk.f32.vlgmr.msra.gmra.mxu0 %vm253_vm0, %v9867_v33  ;;  %5296 = vmatprep.subr.mxu0 %v10617_v19 }
0x10f7   : > { %v4888_v16 = vadd.f32 %v4887_v51, %v9393_v21  ;;  %5297 = vmatpush1.msra.mxu0 %v10618_v30  ;;  %4960 = vmatprep.mubr.f32.mxu0 %v10563_v22 }
0x10f9   : > { %5009 = vmatprep.subr.mxu1 %v4888_v16 }
0x10fa   : > { %5010 = vmatpush1.msra.mxu1 %v4886_v35  ;;  %8347 = vmatmul.mubr.msk.f32.gmra.mxu0 %vm253_vm0, %v9882_v53 }
0x10fb   : > { %8350 = vmatmul.mubr.msk.f32.vlgmr.msra.gmra.mxu1 %vm253_vm0, %v9867_v33  ;;  %5367 = vmatprep.subr.mxu1 %v10619_v34 }
0x10fc   : > { %5368 = vmatpush1.msra.mxu1 %v10620_v32  ;;  %5049 = vmatprep.mubr.f32.mxu1 %v10563_v22 }
0x10fd   : > { %4966 = vmatprep.mubr.f32.mxu0 %v10563_v22 }
0x10fe   : > { %8348 = vmatmul.mubr.msk.f32.gmra.mxu0 %vm253_vm0, %v10028_v10 }
0x10ff   : > { %8351 = vmatmul.mubr.msk.f32.gmra.mxu1 %vm253_vm0, %v9882_v53  ;;  %4972 = vmatprep.mubr.f32.mxu0 %v10563_v22 }
0x1100   : > { %5055 = vmatprep.mubr.f32.mxu1 %v10563_v22 }
0x1102   : > { %8349 = vmatmul.mubr.msk.f32.gmra.mxu0 %vm253_vm0, %v9899_v20 }
0x1103   : > { %8352 = vmatmul.mubr.msk.f32.gmra.mxu1 %vm253_vm0, %v10028_v10  ;;  %5330 = vmatprep.mubr.f32.mxu0 %v10563_v22 }
0x1104   : > { %5061 = vmatprep.mubr.f32.mxu1 %v10563_v22 }
0x1106   : > { %8357 = vmatmul.mubr.msk.f32.vlgmr.msra.gmra.mxu0 %vm253_vm0, %v9910_v29 }
0x1107   : > { %8353 = vmatmul.mubr.msk.f32.gmra.mxu1 %vm253_vm0, %v9899_v20  ;;  %5492 = vmatprep.mubr.f32.mxu0 %v10563_v22 }
0x1108   : > { %5401 = vmatprep.mubr.f32.mxu1 %v10563_v22 }
0x110b   : > { %8358 = vmatmul.mubr.msk.f32.vlgmr.msra.gmra.mxu1 %vm253_vm0, %v9910_v29 }
0x110c   : > { %5563 = vmatprep.mubr.f32.mxu1 %v10563_v22 }
0x11b6   : > { %v4956_v33 = vpop.f32.mrf.mxu0 }
0x11b7   : > { %v4957_v53 = vadd.f32 %v4956_v33, %v9433_v8 }
0x11b8   : > { %v4958_v44 = vpop.f32.mrf.mxu0 }
0x11b9   : > { %vm5068_vm6 = vcmp.ge.f32.partialorder %v4957_v53, 0.0  ;;  %v5084_v23 = vmul.f32 0.01, %v4957_v53  ;;  %v4959_v3 = vadd.f32 %v4958_v44, %v9433_v8 }
0x11ba   : > { %v4962_v48 = vpop.f32.mrf.mxu0 }
0x11bb   : > { %v5100_v38 = vsel %vm5068_vm6, %v4957_v53, %v5084_v23  ;;  %v5045_v20 = vpop.f32.mrf.mxu1  ;;  %vm5069_vm7 = vcmp.ge.f32.partialorder %v4959_v3, 0.0  ;;  %v5085_v5 = vmul.f32 0.01, %v4959_v3  ;;  %v4963_v7 = vadd.f32 %v4962_v48, %v9438_v60 }
0x11bc   : > { %v5046_v28 = vadd.f32 %v5045_v20, %v9433_v8  ;;  %v4964_v29 = vpop.f32.mrf.mxu0  ;;  %v5116_v24 = vmul.f32 %v5100_v38, %v9475_v0 }
0x11bd   : > { %v5047_v61 = vpop.f32.mrf.mxu1  ;;  %vm5072_vm8 = vcmp.ge.f32.partialorder %v4963_v7, 0.0  ;;  %v5088_v45 = vmul.f32 0.01, %v4963_v7  ;;  %v4965_v50 = vadd.f32 %v4964_v29, %v9438_v60  ;;  %v5101_v40 = vsel %vm5069_vm7, %v4959_v3, %v5085_v5 }
0x11be   : > { %vm5070_vm9 = vcmp.ge.f32.partialorder %v5046_v28, 0.0  ;;  %v5086_v63 = vmul.f32 0.01, %v5046_v28  ;;  %v5048_v13 = vadd.f32 %v5047_v61, %v9433_v8  ;;  %v4968_v9 = vpop.f32.mrf.mxu0  ;;  %v5117_v39 = vmul.f32 %v5101_v40, %v9475_v0 }
0x11bf   : > { %v5104_v25 = vsel %vm5072_vm8, %v4963_v7, %v5088_v45  ;;  %v5051_v36 = vpop.f32.mrf.mxu1  ;;  %vm5073_vm10 = vcmp.ge.f32.partialorder %v4965_v50, 0.0  ;;  %v5089_v49 = vmul.f32 0.01, %v4965_v50  ;;  %v4969_v26 = vadd.f32 %v4968_v9, %v9448_v15 }
0x11c0   : > { %v5102_v58 = vsel %vm5070_vm9, %v5046_v28, %v5086_v63  ;;  %vm5071_vm11 = vcmp.ge.f32.partialorder %v5048_v13, 0.0  ;;  %v5087_v14 = vmul.f32 0.01, %v5048_v13  ;;  %v5120_v27 = vmul.f32 %v5104_v25, %v9478_v1  ;;  %v4970_v6 = vpop.f32.mrf.mxu0 }
0x11c1   : > { %v5118_v2 = vmul.f32 %v5102_v58, %v9475_v0  ;;  %v5052_v52 = vadd.f32 %v5051_v36, %v9438_v60  ;;  %v5105_v55 = vsel %vm5073_vm10, %v4965_v50, %v5089_v49  ;;  %v5053_v31 = vpop.f32.mrf.mxu1  ;;  %vm5076_vm12 = vcmp.ge.f32.partialorder %v4969_v26, 0.0 }
0x11c2   : > { %v5103_v18 = vsel %vm5071_vm11, %v5048_v13, %v5087_v14  ;;  %v5132_v41 = vadd.f32 %v5120_v27, %v5116_v24  ;;  %v5054_v56 = vadd.f32 %v5053_v31, %v9438_v60  ;;  %v4974_v54 = vpop.f32.mrf.mxu0  ;;  %v5121_v11 = vmul.f32 %v5105_v55, %v9478_v1 }
0x11c3   : > { %vm5074_vm13 = vcmp.ge.f32.partialorder %v5052_v52, 0.0  ;;  %v5090_v46 = vmul.f32 0.01, %v5052_v52  ;;  %v5092_v57 = vmul.f32 0.01, %v4969_v26  ;;  %v5057_v51 = vpop.f32.mrf.mxu1  ;;  %v5119_v16 = vmul.f32 %v5103_v18, %v9475_v0 }
0x11c4   : > { %vm5075_vm15 = vcmp.ge.f32.partialorder %v5054_v56, 0.0  ;;  %v5091_v35 = vmul.f32 0.01, %v5054_v56  ;;  %v5058_v33 = vadd.f32 %v5057_v51, %v9448_v15  ;;  %v4971_v23 = vadd.f32 %v4970_v6, %v9448_v15  ;;  %v4976_v61 = vpop.f32.mrf.mxu0 }
0x11c5   : > { %v5106_v53 = vsel %vm5074_vm13, %v5052_v52, %v5090_v46  ;;  %v5108_v44 = vsel %vm5076_vm12, %v4969_v26, %v5092_v57  ;;  %v5059_v3 = vpop.f32.mrf.mxu1  ;;  %v4975_v48 = vadd.f32 %v4974_v54, %v9462_v43  ;;  %v5141_v7 = vadd.f32 %v5121_v11, %v5117_v39 }
0x11c6   : > { %v5122_v38 = vmul.f32 %v5106_v53, %v9478_v1  ;;  %v5107_v20 = vsel %vm5075_vm15, %v5054_v56, %v5091_v35  ;;  %v5124_v5 = vmul.f32 %v5108_v44, %v9497_v17  ;;  %vm5078_vm1 = vcmp.ge.f32.partialorder %v5058_v33, 0.0  ;;  %v5332_v39 = vpop.f32.mrf.mxu0 }
0x11c7   : > { %v5094_v28 = vmul.f32 0.01, %v5058_v33  ;;  %vm5077_vm2 = vcmp.ge.f32.partialorder %v4971_v23, 0.0  ;;  %v5093_v29 = vmul.f32 0.01, %v4971_v23  ;;  %v5063_v24 = vpop.f32.mrf.mxu1  ;;  %v5123_v50 = vmul.f32 %v5107_v20, %v9478_v1 }
0x11c8   : > { %v5150_v45 = vadd.f32 %v5122_v38, %v5118_v2  ;;  %v5060_v63 = vadd.f32 %v5059_v3, %v9448_v15  ;;  %vm5080_vm3 = vcmp.ge.f32.partialorder %v4975_v48, 0.0  ;;  %v5133_v40 = vadd.f32 %v5132_v41, %v5124_v5  ;;  %v5334_v53 = vpop.f32.mrf.mxu0 }
0x11c9   : > { %v5110_v13 = vsel %vm5078_vm1, %v5058_v33, %v5094_v28  ;;  %v5109_v9 = vsel %vm5077_vm2, %v4971_v23, %v5093_v29  ;;  %v5096_v25 = vmul.f32 0.01, %v4975_v48  ;;  %v5065_v36 = vpop.f32.mrf.mxu1  ;;  %v5064_v27 = vadd.f32 %v5063_v24, %v9462_v43 }
0x11ca   : > { %v5126_v49 = vmul.f32 %v5110_v13, %v9497_v17  ;;  %v5125_v26 = vmul.f32 %v5109_v9, %v9497_v17  ;;  %vm5079_vm4 = vcmp.ge.f32.partialorder %v5060_v63, 0.0  ;;  %v5095_v58 = vmul.f32 0.01, %v5060_v63 }
0x11cb   : > { %v5112_v14 = vsel %vm5080_vm3, %v4975_v48, %v5096_v25  ;;  %v4977_v6 = vadd.f32 %v4976_v61, %v9462_v43  ;;  %v5066_v2 = vadd.f32 %v5065_v36, %v9462_v43  ;;  %v5159_v52 = vadd.f32 %v5123_v50, %v5119_v16  ;;  %v5403_v41 = vpop.f32.mrf.mxu1 }
0x11cc   : > { %v5151_v55 = vadd.f32 %v5150_v45, %v5126_v49  ;;  %v5111_v31 = vsel %vm5079_vm4, %v5060_v63, %v5095_v58  ;;  %v5128_v18 = vmul.f32 %v5112_v14, %v9501_v37  ;;  %vm5082_vm5 = vcmp.ge.f32.partialorder %v5064_v27, 0.0 }
0x11cd   : > { %v5127_v56 = vmul.f32 %v5111_v31, %v9497_v17  ;;  %v5098_v54 = vmul.f32 0.01, %v5064_v27  ;;  %vm5081_vm6 = vcmp.ge.f32.partialorder %v4977_v6, 0.0  ;;  %v5097_v11 = vmul.f32 0.01, %v4977_v6  ;;  %v5405_v29 = vpop.f32.mrf.mxu1 }
0x11ce   : > { %v5134_v46 = vadd.f32 %v5133_v40, %v5128_v18  ;;  %vm5083_vm7 = vcmp.ge.f32.partialorder %v5066_v2, 0.0  ;;  %v5099_v57 = vmul.f32 0.01, %v5066_v2  ;;  %v5142_v51 = vadd.f32 %v5141_v7, %v5125_v26 }
0x11cf   : > { %v5114_v35 = vsel %vm5082_vm5, %v5064_v27, %v5098_v54  ;;  %v5333_v33 = vadd.f32 %v5332_v39, %v9317_v4  ;;  %v5404_v16 = vadd.f32 %v5403_v41, %v9317_v4  ;;  %v5113_v3 = vsel %vm5081_vm6, %v4977_v6, %v5097_v11 }
0x11d0   : > { %v5135_v44 = vrot.slane %v5134_v46, 4  ;;  %v5130_v23 = vmul.f32 %v5114_v35, %v9501_v37  ;;  %v5115_v48 = vsel %vm5083_vm7, %v5066_v2, %v5099_v57  ;;  %v5160_v38 = vadd.f32 %v5159_v52, %v5127_v56 }
0x11d1   : > { %v5129_v20 = vmul.f32 %v5113_v3, %v9501_v37  ;;  %v5131_v5 = vmul.f32 %v5115_v48, %v9501_v37  ;;  %v5408_v28 = vmul.f32 %v5333_v33, %v10618_v30  ;;  %v5335_v61 = vadd.f32 %v5334_v53, %v9317_v4 }
0x11d2   : > { %v5136_v7 = vadd.f32 %v5135_v44, %v5134_v46  ;;  %v5152_v24 = vadd.f32 %v5151_v55, %v5130_v23  ;;  %v5410_v63 = vmul.f32 %v5404_v16, %v10620_v32  ;;  %v5406_v9 = vadd.f32 %v5405_v29, %v9317_v4 }
0x11d3   : > { %v5143_v45 = vadd.f32 %v5142_v51, %v5129_v20  ;;  %v5161_v50 = vadd.f32 %v5160_v38, %v5131_v5  ;;  %v5416_v49 = vmul.f32 0.01, %v5408_v28  ;;  %v5409_v26 = vmul.f32 %v5335_v61, %v10617_v19 }
0x11d4   : > { %v5137_v40 = vrot.slane %v5136_v7, 2  ;;  %v5153_v13 = vrot.slane %v5152_v24, 4  ;;  %vm5412_vm8 = vcmp.ge.f32.partialorder %v5408_v28, 0.0  ;;  %vm5414_vm9 = vcmp.ge.f32.partialorder %v5410_v63, 0.0 }
0x11d5   : > { %v5144_v25 = vrot.slane %v5143_v45, 4  ;;  %v5162_v36 = vrot.slane %v5161_v50, 4  ;;  %vm5413_vm10 = vcmp.ge.f32.partialorder %v5409_v26, 0.0  ;;  %v5418_v39 = vmul.f32 0.01, %v5410_v63 }
0x11d6   : > { %v5138_v58 = vadd.f32 %v5137_v40, %v5136_v7  ;;  %v5154_v14 = vadd.f32 %v5153_v13, %v5152_v24  ;;  %v5417_v52 = vmul.f32 0.01, %v5409_v26  ;;  %v5411_v55 = vmul.f32 %v5406_v9, %v10619_v34 }
0x11d7   : > { %v5145_v27 = vadd.f32 %v5144_v25, %v5143_v45  ;;  %v5163_v6 = vadd.f32 %v5162_v36, %v5161_v50  ;;  %v5420_v56 = vsel %vm5412_vm8, %v5408_v28, %v5416_v49  ;;  %v5422_v23 = vsel %vm5414_vm9, %v5410_v63, %v5418_v39 }
0x11d8   : > { %v5155_v2 = vrot.slane %v5154_v14, 2  ;;  %v5139_v31 = vrot.slane %v5138_v58, 1  ;;  %v5421_v46 = vsel %vm5413_vm10, %v5409_v26, %v5417_v52  ;;  %vm5415_vm11 = vcmp.ge.f32.partialorder %v5411_v55, 0.0 }
0x11d9   : > { %v5146_v18 = vrot.slane %v5145_v27, 2  ;;  %v5164_v41 = vrot.slane %v5163_v6, 2  ;;  %v5425_v51 = vadd.f32 %v5421_v46, %v5335_v61  ;;  %v5419_v35 = vmul.f32 0.01, %v5411_v55  ;;  %v10095_v61 = vld [vmem:[%s10525_s1 + $0x10] sm:$0xff] }
0x11da   : > { %v5156_v54 = vadd.f32 %v5155_v2, %v5154_v14  ;;  %v5424_v44 = vadd.f32 %v5420_v56, %v5333_v33  ;;  %v5140_v3 = vadd.f32 %v5139_v31, %v5138_v58  ;;  %v5426_v24 = vadd.f32 %v5422_v23, %v5404_v16 }
0x11db   : > { %v5147_v11 = vadd.f32 %v5146_v18, %v5145_v27  ;;  %v5165_v57 = vadd.f32 %v5164_v41, %v5163_v6  ;;  %v5423_v20 = vsel %vm5415_vm11, %v5411_v55, %v5419_v35  ;;  %5458 = vmatprep.subr.mxu0 %v5425_v51 }
0x11dc   : > { %v5157_v53 = vrot.slane %v5156_v54, 1  ;;  %v5427_v29 = vadd.f32 %v5423_v20, %v5406_v9  ;;  %5459 = vmatpush1.msra.mxu0 %v5424_v44  ;;  %v5168_v33 = vadd.f32 %v5140_v3, %v9529_v47 }
0x11dd   : > { %v5148_v48 = vrot.slane %v5147_v11, 1  ;;  %v5166_v38 = vrot.slane %v5165_v57, 1  ;;  %8359 = vmatmul.mubr.msk.f32.vlgmr.msra.gmra.mxu0 %vm253_vm0, %v10095_v61 }
0x11de   : > { %v5158_v5 = vadd.f32 %v5157_v53, %v5156_v54  ;;  %5529 = vmatprep.subr.mxu1 %v5427_v29  ;;  %5638 = vmatprep.mubr.f32.mxu0 %v10563_v22 }
0x11df   : > { %v5149_v28 = vadd.f32 %v5148_v48, %v5147_v11  ;;  %v5167_v7 = vadd.f32 %v5166_v38, %v5165_v57  ;;  %5530 = vmatpush1.msra.mxu1 %v5426_v24 }
0x11e0   : > { %v5170_v45 = vadd.f32 %v5158_v5, %v9529_v47  ;;  %8360 = vmatmul.mubr.msk.f32.vlgmr.msra.gmra.mxu1 %vm253_vm0, %v10095_v61 }
0x11e1   : > { %v5169_v50 = vadd.f32 %v5149_v28, %v9529_v47  ;;  %v5171_v16 = vadd.f32 %v5167_v7, %v9529_v47  ;;  %5709 = vmatprep.mubr.f32.mxu1 %v10563_v22 }
0x11e3   : > { %v5176_v63 = vcombine.low %v5168_v33, %v5169_v50  ;;  %v5177_v40 = vcombine.low %v5170_v45, %v5171_v16 }
0x11e5   : > { %v5184_v13 = vrot.slane %v5176_v63, %v9532_v59  ;;  %v5191_v9 = vrot.slane %v5177_v40, %v9532_v59 }
0x11e7   : > { %v5192_v25 = vcombine.low %v5184_v13, %v5191_v9 }
0x11e9   : > { %v5199_v36 = vrot.slane %v5192_v25, %v9532_v59  ;;  %v10621_v25 = vld [vmem:[#allocation15_spill] sm:$0xff] }
0x11eb   : > { %8354 = vst.msk [vmem:[%s9547_s17 + $0x4] ss:$8 sm:$0xf] %vm9542_vm14, %v5199_v36  ;;  %v10622_v36 = vld [vmem:[#allocation17_spill] sm:$0xff] }
0x129d   : > { %v5494_v49 = vpop.f32.mrf.mxu0 }
0x129e   : > { %v5495_v26 = vadd.f32 %v5494_v49, %v9333_v42  ;;  %v10623_v49 = vld [vmem:[#allocation16_spill] sm:$0xff] }
0x129f   : > { %v5496_v58 = vpop.f32.mrf.mxu0 }
0x12a0   : > { %v5565_v14 = vpop.f32.mrf.mxu1  ;;  %v5497_v27 = vadd.f32 %v5496_v58, %v9333_v42  ;;  %v5570_v52 = vmul.f32 %v5495_v26, %v10618_v30  ;;  %v10624_v26 = vld [vmem:[#allocation18_spill] sm:$0xff]  ;;  %v10163_v58 = vld [vmem:[%s10525_s1 + $0x28] sm:$0xff] }
0x12a1   : > { %v5566_v6 = vadd.f32 %v5565_v14, %v9333_v42  ;;  %v10180_v14 = vld [vmem:[%s10525_s1 + $0x38] sm:$0xff] }
0x12a2   : > { %v5571_v2 = vmul.f32 %v5497_v27, %v10617_v19  ;;  %v5567_v39 = vpop.f32.mrf.mxu1 }
0x12a3   : > { %v5568_v55 = vadd.f32 %v5567_v39, %v9333_v42  ;;  %v5572_v18 = vmul.f32 %v5566_v6, %v10620_v32 }
0x12a4   : > { %5604 = vmatprep.subr.mxu0 %v5571_v2 }
0x12a5   : > { %v5573_v31 = vmul.f32 %v5568_v55, %v10619_v34  ;;  %5605 = vmatpush1.msra.mxu0 %v5570_v52 }
0x12a6   : > { %8361 = vmatmul.mubr.msk.f32.vlgmr.msra.gmra.mxu0 %vm253_vm0, %v10095_v61 }
0x12a7   : > { %5675 = vmatprep.subr.mxu1 %v5573_v31  ;;  %5800 = vmatprep.mubr.f32.mxu0 %v10563_v22 }
0x12a8   : > { %5676 = vmatpush1.msra.mxu1 %v5572_v18 }
0x12a9   : > { %8362 = vmatmul.mubr.msk.f32.vlgmr.msra.gmra.mxu1 %vm253_vm0, %v10095_v61 }
0x12aa   : > { %5871 = vmatprep.mubr.f32.mxu1 %v10563_v22 }
0x1366   : > { %v5640_v41 = vpop.f32.mrf.mxu0 }
0x1367   : > { %v5641_v56 = vadd.f32 %v5640_v41, %v9333_v42 }
0x1368   : > { %v5642_v54 = vpop.f32.mrf.mxu0 }
0x1369   : > { %v5716_v46 = vmul.f32 %v5641_v56, %v10618_v30  ;;  %v5711_v11 = vpop.f32.mrf.mxu1  ;;  %v5643_v57 = vadd.f32 %v5642_v54, %v9333_v42 }
0x136a   : > { %v5712_v51 = vadd.f32 %v5711_v11, %v9333_v42 }
0x136b   : > { %vm5720_vm12 = vcmp.ge.f32.partialorder %v5716_v46, 0.0  ;;  %v5724_v35 = vmul.f32 0.01, %v5716_v46  ;;  %v5717_v53 = vmul.f32 %v5643_v57, %v10617_v19  ;;  %v5713_v44 = vpop.f32.mrf.mxu1 }
0x136c   : > { %v5718_v23 = vmul.f32 %v5712_v51, %v10620_v32  ;;  %v5714_v3 = vadd.f32 %v5713_v44, %v9333_v42 }
0x136d   : > { %vm5721_vm13 = vcmp.ge.f32.partialorder %v5717_v53, 0.0  ;;  %v5725_v48 = vmul.f32 0.01, %v5717_v53  ;;  %v5728_v38 = vsel %vm5720_vm12, %v5716_v46, %v5724_v35 }
0x136e   : > { %vm5722_vm15 = vcmp.ge.f32.partialorder %v5718_v23, 0.0  ;;  %v5726_v20 = vmul.f32 0.01, %v5718_v23  ;;  %v5719_v30 = vmul.f32 %v5714_v3, %v10619_v34  ;;  %v5732_v7 = vadd.f32 %v5728_v38, %v5641_v56 }
0x136f   : > { %v5729_v5 = vsel %vm5721_vm13, %v5717_v53, %v5725_v48 }
0x1370   : > { %v5733_v29 = vadd.f32 %v5729_v5, %v5643_v57  ;;  %vm5723_vm1 = vcmp.ge.f32.partialorder %v5719_v30, 0.0  ;;  %v5727_v28 = vmul.f32 0.01, %v5719_v30  ;;  %v5730_v24 = vsel %vm5722_vm15, %v5718_v23, %v5726_v20 }
0x1371   : > { %v5734_v32 = vadd.f32 %v5730_v24, %v5712_v51 }
0x1372   : > { %v5731_v33 = vsel %vm5723_vm1, %v5719_v30, %v5727_v28  ;;  %5766 = vmatprep.subr.mxu0 %v5733_v29 }
0x1373   : > { %v5735_v19 = vadd.f32 %v5731_v33, %v5714_v3  ;;  %5767 = vmatpush1.msra.mxu0 %v5732_v7 }
0x1374   : > { %8363 = vmatmul.mubr.msk.f32.vlgmr.msra.gmra.mxu0 %vm253_vm0, %v10000_v62 }
0x1375   : > { %5837 = vmatprep.subr.mxu1 %v5735_v19  ;;  %5942 = vmatprep.mubr.f32.mxu0 %v10563_v22 }
0x1376   : > { %5838 = vmatpush1.msra.mxu1 %v5734_v32 }
0x1377   : > { %8364 = vmatmul.mubr.msk.f32.vlgmr.msra.gmra.mxu1 %vm253_vm0, %v10000_v62  ;;  %v10148_v62 = vld [vmem:[%s10525_s1 + $0x20] sm:$0xff] }
0x1378   : > { %6031 = vmatprep.mubr.f32.mxu1 %v10563_v22 }
0x1434   : > { %v5802_v34 = vpop.f32.mrf.mxu0 }
0x1435   : > { %v5803_v63 = vadd.f32 %v5802_v34, %v9393_v21 }
0x1436   : > { %v5804_v45 = vpop.f32.mrf.mxu0 }
0x1437   : > { %v5873_v50 = vpop.f32.mrf.mxu1  ;;  %v5805_v16 = vadd.f32 %v5804_v45, %v9393_v21 }
0x1438   : > { %v5874_v9 = vadd.f32 %v5873_v50, %v9393_v21 }
0x1439   : > { %v5875_v40 = vpop.f32.mrf.mxu1  ;;  %5908 = vmatprep.subr.mxu0 %v5805_v16 }
0x143a   : > { %v5876_v13 = vadd.f32 %v5875_v40, %v9393_v21  ;;  %5909 = vmatpush1.msra.mxu0 %v5803_v63 }
0x143b   : > { %8365 = vmatmul.mubr.msk.f32.vlgmr.msra.gmra.mxu0 %vm253_vm0, %v10148_v62  ;;  %6284 = vmatprep.subr.mxu0 %v10621_v25 }
0x143c   : > { %5997 = vmatprep.subr.mxu1 %v5876_v13  ;;  %6285 = vmatpush1.msra.mxu0 %v10622_v36 }
0x143d   : > { %5998 = vmatpush1.msra.mxu1 %v5874_v9  ;;  %5948 = vmatprep.mubr.f32.mxu0 %v10563_v22 }
0x143e   : > { %8369 = vmatmul.mubr.msk.f32.vlgmr.msra.gmra.mxu1 %vm253_vm0, %v10148_v62  ;;  %6355 = vmatprep.subr.mxu1 %v10623_v49 }
0x143f   : > { %6356 = vmatpush1.msra.mxu1 %v10624_v26  ;;  %6037 = vmatprep.mubr.f32.mxu1 %v10563_v22 }
0x1440   : > { %8366 = vmatmul.mubr.msk.f32.gmra.mxu0 %vm253_vm0, %v10163_v58 }
0x1441   : > { %5954 = vmatprep.mubr.f32.mxu0 %v10563_v22 }
0x1442   : > { %8370 = vmatmul.mubr.msk.f32.gmra.mxu1 %vm253_vm0, %v10163_v58 }
0x1443   : > { %6043 = vmatprep.mubr.f32.mxu1 %v10563_v22 }
0x1444   : > { %8367 = vmatmul.mubr.msk.f32.gmra.mxu0 %vm253_vm0, %v10028_v10 }
0x1445   : > { %5960 = vmatprep.mubr.f32.mxu0 %v10563_v22 }
0x1446   : > { %8371 = vmatmul.mubr.msk.f32.gmra.mxu1 %vm253_vm0, %v10028_v10  ;;  %v10191_v10 = vld [vmem:[%s10525_s1 + $0x8] sm:$0xff] }
0x1447   : > { %6049 = vmatprep.mubr.f32.mxu1 %v10563_v22 }
0x1448   : > { %8368 = vmatmul.mubr.msk.f32.gmra.mxu0 %vm253_vm0, %v10180_v14 }
0x1449   : > { %6318 = vmatprep.mubr.f32.mxu0 %v10563_v22 }
0x144a   : > { %8372 = vmatmul.mubr.msk.f32.gmra.mxu1 %vm253_vm0, %v10180_v14 }
0x144b   : > { %6389 = vmatprep.mubr.f32.mxu1 %v10563_v22 }
0x144c   : > { %8376 = vmatmul.mubr.msk.f32.vlgmr.msra.gmra.mxu0 %vm253_vm0, %v10191_v10 }
0x144d   : > { %6480 = vmatprep.mubr.f32.mxu0 %v10563_v22 }
0x144e   : > { %8377 = vmatmul.mubr.msk.f32.vlgmr.msra.gmra.mxu1 %vm253_vm0, %v10191_v10 }
0x144f   : > { %6551 = vmatprep.mubr.f32.mxu1 %v10563_v22 }
0x14fb   : > { %v5944_v27 = vpop.f32.mrf.mxu0 }
0x14fc   : > { %v5945_v6 = vadd.f32 %v5944_v27, %v9433_v8 }
0x14fd   : > { %v5946_v2 = vpop.f32.mrf.mxu0 }
0x14fe   : > { %vm6056_vm2 = vcmp.ge.f32.partialorder %v5945_v6, 0.0  ;;  %v6072_v39 = vmul.f32 0.01, %v5945_v6  ;;  %v6033_v52 = vpop.f32.mrf.mxu1  ;;  %v5947_v55 = vadd.f32 %v5946_v2, %v9433_v8 }
0x14ff   : > { %v6034_v31 = vadd.f32 %v6033_v52, %v9433_v8 }
0x1500   : > { %v6088_v18 = vsel %vm6056_vm2, %v5945_v6, %v6072_v39  ;;  %vm6057_vm3 = vcmp.ge.f32.partialorder %v5947_v55, 0.0  ;;  %v6073_v41 = vmul.f32 0.01, %v5947_v55  ;;  %v6035_v56 = vpop.f32.mrf.mxu1  ;;  %v5950_v54 = vpop.f32.mrf.mxu0 }
0x1501   : > { %vm6058_vm4 = vcmp.ge.f32.partialorder %v6034_v31, 0.0  ;;  %v6074_v46 = vmul.f32 0.01, %v6034_v31  ;;  %v6036_v11 = vadd.f32 %v6035_v56, %v9433_v8  ;;  %v5951_v51 = vadd.f32 %v5950_v54, %v9438_v60 }
0x1502   : > { %v6089_v57 = vsel %vm6057_vm3, %v5947_v55, %v6073_v41  ;;  %v6039_v35 = vpop.f32.mrf.mxu1  ;;  %v5952_v53 = vpop.f32.mrf.mxu0  ;;  %v6104_v44 = vmul.f32 %v6088_v18, %v9475_v0 }
0x1503   : > { %v6090_v23 = vsel %vm6058_vm4, %v6034_v31, %v6074_v46  ;;  %vm6059_vm5 = vcmp.ge.f32.partialorder %v6036_v11, 0.0  ;;  %v6075_v3 = vmul.f32 0.01, %v6036_v11  ;;  %v6105_v48 = vmul.f32 %v6089_v57, %v9475_v0 }
0x1504   : > { %vm6060_vm6 = vcmp.ge.f32.partialorder %v5951_v51, 0.0  ;;  %v6076_v38 = vmul.f32 0.01, %v5951_v51  ;;  %v6040_v20 = vadd.f32 %v6039_v35, %v9438_v60  ;;  %v6041_v30 = vpop.f32.mrf.mxu1  ;;  %v5956_v5 = vpop.f32.mrf.mxu0  ;;  %v6106_v29 = vmul.f32 %v6090_v23, %v9475_v0 }
0x1505   : > { %v5953_v28 = vadd.f32 %v5952_v53, %v9438_v60  ;;  %v6042_v7 = vadd.f32 %v6041_v30, %v9438_v60  ;;  %v5957_v24 = vadd.f32 %v5956_v5, %v9448_v15  ;;  %v6091_v33 = vsel %vm6059_vm5, %v6036_v11, %v6075_v3 }
0x1506   : > { %v6092_v19 = vsel %vm6060_vm6, %v5951_v51, %v6076_v38  ;;  %vm6062_vm7 = vcmp.ge.f32.partialorder %v6040_v20, 0.0  ;;  %v6078_v32 = vmul.f32 0.01, %v6040_v20  ;;  %v6045_v34 = vpop.f32.mrf.mxu1  ;;  %v5958_v45 = vpop.f32.mrf.mxu0  ;;  %v6107_v6 = vmul.f32 %v6091_v33, %v9475_v0 }
0x1507   : > { %v6108_v50 = vmul.f32 %v6092_v19, %v9478_v1  ;;  %vm6061_vm8 = vcmp.ge.f32.partialorder %v5953_v28, 0.0  ;;  %v6077_v16 = vmul.f32 0.01, %v5953_v28  ;;  %vm6063_vm9 = vcmp.ge.f32.partialorder %v6042_v7, 0.0 }
0x1508   : > { %v6094_v63 = vsel %vm6062_vm7, %v6040_v20, %v6078_v32  ;;  %v6079_v40 = vmul.f32 0.01, %v6042_v7  ;;  %vm6064_vm10 = vcmp.ge.f32.partialorder %v5957_v24, 0.0  ;;  %v6080_v13 = vmul.f32 0.01, %v5957_v24  ;;  %v6047_v9 = vpop.f32.mrf.mxu1  ;;  %v5962_v27 = vpop.f32.mrf.mxu0 }
0x1509   : > { %v6110_v2 = vmul.f32 %v6094_v63, %v9478_v1  ;;  %v6093_v39 = vsel %vm6061_vm8, %v5953_v28, %v6077_v16  ;;  %v6046_v52 = vadd.f32 %v6045_v34, %v9448_v15  ;;  %v5959_v41 = vadd.f32 %v5958_v45, %v9448_v15 }
0x150a   : > { %v6109_v55 = vmul.f32 %v6093_v39, %v9478_v1  ;;  %v6095_v31 = vsel %vm6063_vm9, %v6042_v7, %v6079_v40  ;;  %v6096_v18 = vsel %vm6064_vm10, %v5957_v24, %v6080_v13  ;;  %v6051_v56 = vpop.f32.mrf.mxu1  ;;  %v5964_v54 = vpop.f32.mrf.mxu0  ;;  %v6120_v46 = vadd.f32 %v6108_v50, %v6104_v44 }
0x150b   : > { %v6138_v11 = vadd.f32 %v6110_v2, %v6106_v29  ;;  %v6111_v57 = vmul.f32 %v6095_v31, %v9478_v1  ;;  %vm6066_vm11 = vcmp.ge.f32.partialorder %v6046_v52, 0.0  ;;  %v6112_v51 = vmul.f32 %v6096_v18, %v9497_v17 }
0x150c   : > { %v6082_v35 = vmul.f32 0.01, %v6046_v52  ;;  %vm6065_vm12 = vcmp.ge.f32.partialorder %v5959_v41, 0.0  ;;  %v6081_v53 = vmul.f32 0.01, %v5959_v41  ;;  %v6129_v23 = vadd.f32 %v6109_v55, %v6105_v48  ;;  %v6053_v30 = vpop.f32.mrf.mxu1  ;;  %v6320_v5 = vpop.f32.mrf.mxu0 }
0x150d   : > { %v6147_v3 = vadd.f32 %v6111_v57, %v6107_v6  ;;  %v6048_v38 = vadd.f32 %v6047_v9, %v9448_v15  ;;  %v5963_v20 = vadd.f32 %v5962_v27, %v9462_v43  ;;  %v6052_v44 = vadd.f32 %v6051_v56, %v9462_v43 }
0x150e   : > { %v6098_v28 = vsel %vm6066_vm11, %v6046_v52, %v6082_v35  ;;  %v6097_v7 = vsel %vm6065_vm12, %v5959_v41, %v6081_v53  ;;  %v5965_v29 = vadd.f32 %v5964_v54, %v9462_v43  ;;  %v6121_v34 = vadd.f32 %v6120_v46, %v6112_v51  ;;  %v6391_v16 = vpop.f32.mrf.mxu1  ;;  %v6322_v63 = vpop.f32.mrf.mxu0 }
0x150f   : > { %v6114_v24 = vmul.f32 %v6098_v28, %v9497_v17  ;;  %v6113_v33 = vmul.f32 %v6097_v7, %v9497_v17  ;;  %vm6067_vm13 = vcmp.ge.f32.partialorder %v6048_v38, 0.0  ;;  %v6083_v19 = vmul.f32 0.01, %v6048_v38 }
0x1510   : > { %vm6068_vm15 = vcmp.ge.f32.partialorder %v5963_v20, 0.0  ;;  %v6084_v48 = vmul.f32 0.01, %v5963_v20  ;;  %vm6070_vm1 = vcmp.ge.f32.partialorder %v6052_v44, 0.0  ;;  %v6086_v32 = vmul.f32 0.01, %v6052_v44 }
0x1511   : > { %v6139_v45 = vadd.f32 %v6138_v11, %v6114_v24  ;;  %v6099_v50 = vsel %vm6067_vm13, %v6048_v38, %v6083_v19  ;;  %vm6069_vm2 = vcmp.ge.f32.partialorder %v5965_v29, 0.0  ;;  %v6085_v27 = vmul.f32 0.01, %v5965_v29  ;;  %v6393_v11 = vpop.f32.mrf.mxu1 }
0x1512   : > { %v6115_v40 = vmul.f32 %v6099_v50, %v9497_v17  ;;  %v6100_v13 = vsel %vm6068_vm15, %v5963_v20, %v6084_v48  ;;  %v6102_v9 = vsel %vm6070_vm1, %v6052_v44, %v6086_v32  ;;  %v6054_v39 = vadd.f32 %v6053_v30, %v9462_v43 }
0x1513   : > { %v6116_v6 = vmul.f32 %v6100_v13, %v9501_v37  ;;  %v6118_v2 = vmul.f32 %v6102_v9, %v9501_v37  ;;  %v6321_v52 = vadd.f32 %v6320_v5, %v9317_v4  ;;  %v6130_v55 = vadd.f32 %v6129_v23, %v6113_v33 }
0x1514   : > { %v6101_v31 = vsel %vm6069_vm2, %v5965_v29, %v6085_v27  ;;  %v6392_v18 = vadd.f32 %v6391_v16, %v9317_v4  ;;  %v6323_v41 = vadd.f32 %v6322_v63, %v9317_v4  ;;  %vm6071_vm3 = vcmp.ge.f32.partialorder %v6054_v39, 0.0 }
0x1515   : > { %v6122_v56 = vadd.f32 %v6121_v34, %v6116_v6  ;;  %v6140_v54 = vadd.f32 %v6139_v45, %v6118_v2  ;;  %v6117_v46 = vmul.f32 %v6101_v31, %v9501_v37  ;;  %v6087_v57 = vmul.f32 0.01, %v6054_v39 }
0x1516   : > { %v6396_v51 = vmul.f32 %v6321_v52, %v10622_v36  ;;  %v6398_v35 = vmul.f32 %v6392_v18, %v10624_v26  ;;  %v6397_v53 = vmul.f32 %v6323_v41, %v10621_v25  ;;  %v6148_v38 = vadd.f32 %v6147_v3, %v6115_v40 }
0x1517   : > { %v6123_v23 = vrot.slane %v6122_v56, 4  ;;  %v6141_v20 = vrot.slane %v6140_v54, 4  ;;  %v6131_v30 = vadd.f32 %v6130_v55, %v6117_v46  ;;  %v6103_v5 = vsel %vm6071_vm3, %v6054_v39, %v6087_v57 }
0x1518   : > { %vm6400_vm4 = vcmp.ge.f32.partialorder %v6396_v51, 0.0  ;;  %v6404_v28 = vmul.f32 0.01, %v6396_v51  ;;  %v6394_v7 = vadd.f32 %v6393_v11, %v9317_v4  ;;  %v6119_v33 = vmul.f32 %v6103_v5, %v9501_v37 }
0x1519   : > { %v6124_v44 = vadd.f32 %v6123_v23, %v6122_v56  ;;  %v6142_v29 = vadd.f32 %v6141_v20, %v6140_v54  ;;  %v6132_v24 = vrot.slane %v6131_v30, 4  ;;  %vm6402_vm5 = vcmp.ge.f32.partialorder %v6398_v35, 0.0 }
0x151a   : > { %vm6401_vm6 = vcmp.ge.f32.partialorder %v6397_v53, 0.0  ;;  %v6405_v19 = vmul.f32 0.01, %v6397_v53  ;;  %v6149_v3 = vadd.f32 %v6148_v38, %v6119_v33  ;;  %v6408_v45 = vsel %vm6400_vm4, %v6396_v51, %v6404_v28 }
0x151b   : > { %v6125_v48 = vrot.slane %v6124_v44, 2  ;;  %v6143_v32 = vrot.slane %v6142_v29, 2  ;;  %v6133_v34 = vadd.f32 %v6132_v24, %v6131_v30  ;;  %v6406_v50 = vmul.f32 0.01, %v6398_v35 }
0x151c   : > { %v6409_v16 = vsel %vm6401_vm6, %v6397_v53, %v6405_v19  ;;  %v6399_v63 = vmul.f32 %v6394_v7, %v10623_v49  ;;  %v6150_v27 = vrot.slane %v6149_v3, 4  ;;  %v6412_v56 = vadd.f32 %v6408_v45, %v6321_v52 }
0x151d   : > { %v6126_v40 = vadd.f32 %v6125_v48, %v6124_v44  ;;  %v6144_v13 = vadd.f32 %v6143_v32, %v6142_v29  ;;  %v6134_v9 = vrot.slane %v6133_v34, 2  ;;  %v6413_v6 = vadd.f32 %v6409_v16, %v6323_v41 }
0x151e   : > { %vm6403_vm7 = vcmp.ge.f32.partialorder %v6399_v63, 0.0  ;;  %v6407_v2 = vmul.f32 0.01, %v6399_v63  ;;  %v6151_v31 = vadd.f32 %v6150_v27, %v6149_v3  ;;  %v6410_v54 = vsel %vm6402_vm5, %v6398_v35, %v6406_v50 }
0x151f   : > { %v6127_v39 = vrot.slane %v6126_v40, 1  ;;  %v6135_v55 = vadd.f32 %v6134_v9, %v6133_v34  ;;  %6446 = vmatprep.subr.mxu0 %v6413_v6  ;;  %v6145_v57 = vrot.slane %v6144_v13, 1  ;;  %v6414_v20 = vadd.f32 %v6410_v54, %v6392_v18 }
0x1520   : > { %v6411_v46 = vsel %vm6403_vm7, %v6399_v63, %v6407_v2  ;;  %v6152_v53 = vrot.slane %v6151_v31, 2  ;;  %6447 = vmatpush1.msra.mxu0 %v6412_v56 }
0x1521   : > { %v6128_v11 = vadd.f32 %v6127_v39, %v6126_v40  ;;  %v6136_v51 = vrot.slane %v6135_v55, 1  ;;  %v6415_v38 = vadd.f32 %v6411_v46, %v6394_v7  ;;  %8378 = vmatmul.mubr.msk.f32.vlgmr.msra.gmra.mxu0 %vm253_vm0, %v10095_v61  ;;  %v6146_v35 = vadd.f32 %v6145_v57, %v6144_v13 }
0x1522   : > { %v6153_v23 = vadd.f32 %v6152_v53, %v6151_v31  ;;  %6626 = vmatprep.mubr.f32.mxu0 %v10563_v22 }
0x1523   : > { %v6137_v41 = vadd.f32 %v6136_v51, %v6135_v55  ;;  %6517 = vmatprep.subr.mxu1 %v6415_v38  ;;  %v6156_v52 = vadd.f32 %v6128_v11, %v9529_v47  ;;  %v6158_v18 = vadd.f32 %v6146_v35, %v9529_v47 }
0x1524   : > { %v6154_v5 = vrot.slane %v6153_v23, 1  ;;  %6518 = vmatpush1.msra.mxu1 %v6414_v20 }
0x1525   : > { %v6157_v30 = vadd.f32 %v6137_v41, %v9529_v47  ;;  %8379 = vmatmul.mubr.msk.f32.vlgmr.msra.gmra.mxu1 %vm253_vm0, %v10095_v61 }
0x1526   : > { %v6155_v7 = vadd.f32 %v6154_v5, %v6153_v23  ;;  %6697 = vmatprep.mubr.f32.mxu1 %v10563_v22 }
0x1527   : > { %v6164_v28 = vcombine.low %v6156_v52, %v6157_v30 }
0x1528   : > { %v6159_v44 = vadd.f32 %v6155_v7, %v9529_v47 }
0x1529   : > { %v6172_v29 = vrot.slane %v6164_v28, %v9532_v59 }
0x152a   : > { %v6165_v24 = vcombine.low %v6158_v18, %v6159_v44 }
0x152c   : > { %v6179_v33 = vrot.slane %v6165_v24, %v9532_v59 }
0x152e   : > { %v6180_v19 = vcombine.low %v6172_v29, %v6179_v33 }
0x1530   : > { %v6187_v48 = vrot.slane %v6180_v19, %v9532_v59  ;;  %v10625_v19 = vld [vmem:[#allocation19_spill] sm:$0xff] }
0x1532   : > { %8373 = vst.msk [vmem:[%s9547_s17 + $0x5] ss:$8 sm:$0xf] %vm9542_vm14, %v6187_v48 }
0x15e1   : > { %v6482_v32 = vpop.f32.mrf.mxu0 }
0x15e2   : > { %v6483_v34 = vadd.f32 %v6482_v32, %v9333_v42  ;;  %v10626_v32 = vld [vmem:[#allocation21_spill] sm:$0xff] }
0x15e3   : > { %v6484_v3 = vpop.f32.mrf.mxu0 }
0x15e4   : > { %v6485_v45 = vadd.f32 %v6484_v3, %v9333_v42  ;;  %v6558_v63 = vmul.f32 %v6483_v34, %v10622_v36  ;;  %v10627_v3 = vld [vmem:[#allocation20_spill] sm:$0xff] }
0x15e5   : > { %v6553_v50 = vpop.f32.mrf.mxu1 }
0x15e6   : > { %v6559_v16 = vmul.f32 %v6485_v45, %v10621_v25  ;;  %v6554_v40 = vadd.f32 %v6553_v50, %v9333_v42  ;;  %v10628_v45 = vld [vmem:[#allocation22_spill] sm:$0xff] }
0x15e7   : > { %v6555_v13 = vpop.f32.mrf.mxu1  ;;  %v10309_v50 = vld [vmem:[%s10525_s1 + $0x30] sm:$0xff] }
0x15e8   : > { %v6556_v9 = vadd.f32 %v6555_v13, %v9333_v42  ;;  %6592 = vmatprep.subr.mxu0 %v6559_v16  ;;  %v6560_v6 = vmul.f32 %v6554_v40, %v10624_v26 }
0x15e9   : > { %6593 = vmatpush1.msra.mxu0 %v6558_v63 }
0x15ea   : > { %v6561_v27 = vmul.f32 %v6556_v9, %v10623_v49  ;;  %8380 = vmatmul.mubr.msk.f32.vlgmr.msra.gmra.mxu0 %vm253_vm0, %v10095_v61 }
0x15eb   : > { %6788 = vmatprep.mubr.f32.mxu0 %v10563_v22 }
0x15ec   : > { %6663 = vmatprep.subr.mxu1 %v6561_v27 }
0x15ed   : > { %6664 = vmatpush1.msra.mxu1 %v6560_v6 }
0x15ee   : > { %8381 = vmatmul.mubr.msk.f32.vlgmr.msra.gmra.mxu1 %vm253_vm0, %v10095_v61 }
0x15ef   : > { %6859 = vmatprep.mubr.f32.mxu1 %v10563_v22 }
0x16aa   : > { %v6628_v2 = vpop.f32.mrf.mxu0 }
0x16ab   : > { %v6629_v39 = vadd.f32 %v6628_v2, %v9333_v42 }
0x16ac   : > { %v6630_v55 = vpop.f32.mrf.mxu0 }
0x16ad   : > { %v6704_v31 = vmul.f32 %v6629_v39, %v10622_v36  ;;  %v6631_v56 = vadd.f32 %v6630_v55, %v9333_v42 }
0x16ae   : > { %v6699_v54 = vpop.f32.mrf.mxu1 }
0x16af   : > { %vm6708_vm8 = vcmp.ge.f32.partialorder %v6704_v31, 0.0  ;;  %v6712_v46 = vmul.f32 0.01, %v6704_v31  ;;  %v6700_v11 = vadd.f32 %v6699_v54, %v9333_v42  ;;  %v6705_v57 = vmul.f32 %v6631_v56, %v10621_v25 }
0x16b0   : > { %v6701_v51 = vpop.f32.mrf.mxu1 }
0x16b1   : > { %v6706_v61 = vmul.f32 %v6700_v11, %v10624_v26  ;;  %vm6709_vm9 = vcmp.ge.f32.partialorder %v6705_v57, 0.0  ;;  %v6713_v53 = vmul.f32 0.01, %v6705_v57  ;;  %v6716_v38 = vsel %vm6708_vm8, %v6704_v31, %v6712_v46  ;;  %v10281_v26 = vld [vmem:[%s10525_s1 + $0x18] sm:$0xff] }
0x16b2   : > { %v6702_v41 = vadd.f32 %v6701_v51, %v9333_v42  ;;  %v6720_v35 = vadd.f32 %v6716_v38, %v6629_v39 }
0x16b3   : > { %v6714_v23 = vmul.f32 0.01, %v6706_v61  ;;  %v6717_v20 = vsel %vm6709_vm9, %v6705_v57, %v6713_v53  ;;  %vm6710_vm10 = vcmp.ge.f32.partialorder %v6706_v61, 0.0 }
0x16b4   : > { %v6721_v36 = vadd.f32 %v6717_v20, %v6631_v56  ;;  %v6707_v52 = vmul.f32 %v6702_v41, %v10623_v49 }
0x16b5   : > { %v6718_v5 = vsel %vm6710_vm10, %v6706_v61, %v6714_v23 }
0x16b6   : > { %vm6711_vm11 = vcmp.ge.f32.partialorder %v6707_v52, 0.0  ;;  %v6715_v30 = vmul.f32 0.01, %v6707_v52  ;;  %6754 = vmatprep.subr.mxu0 %v6721_v36  ;;  %v6722_v7 = vadd.f32 %v6718_v5, %v6700_v11 }
0x16b7   : > { %6755 = vmatpush1.msra.mxu0 %v6720_v35 }
0x16b8   : > { %v6719_v25 = vsel %vm6711_vm11, %v6707_v52, %v6715_v30  ;;  %8382 = vmatmul.mubr.msk.f32.vlgmr.msra.gmra.mxu0 %vm253_vm0, %v10281_v26 }
0x16b9   : > { %v6723_v28 = vadd.f32 %v6719_v25, %v6702_v41  ;;  %6930 = vmatprep.mubr.f32.mxu0 %v10563_v22 }
0x16bb   : > { %6825 = vmatprep.subr.mxu1 %v6723_v28 }
0x16bc   : > { %6826 = vmatpush1.msra.mxu1 %v6722_v7 }
0x16bd   : > { %8383 = vmatmul.mubr.msk.f32.vlgmr.msra.gmra.mxu1 %vm253_vm0, %v10281_v26 }
0x16be   : > { %7019 = vmatprep.mubr.f32.mxu1 %v10563_v22 }
0x1778   : > { %v6790_v49 = vpop.f32.mrf.mxu0 }
0x1779   : > { %v6791_v29 = vadd.f32 %v6790_v49, %v9393_v21 }
0x177a   : > { %v6792_v18 = vpop.f32.mrf.mxu0 }
0x177b   : > { %v6793_v44 = vadd.f32 %v6792_v18, %v9393_v21 }
0x177d   : > { %v6861_v24 = vpop.f32.mrf.mxu1  ;;  %6896 = vmatprep.subr.mxu0 %v6793_v44 }
0x177e   : > { %6897 = vmatpush1.msra.mxu0 %v6791_v29  ;;  %v6862_v34 = vadd.f32 %v6861_v24, %v9393_v21 }
0x177f   : > { %v6863_v33 = vpop.f32.mrf.mxu1  ;;  %8384 = vmatmul.mubr.msk.f32.vlgmr.msra.gmra.mxu0 %vm253_vm0, %v10148_v62  ;;  %7272 = vmatprep.subr.mxu0 %v10625_v19 }
0x1780   : > { %v6864_v48 = vadd.f32 %v6863_v33, %v9393_v21  ;;  %7273 = vmatpush1.msra.mxu0 %v10626_v32  ;;  %6936 = vmatprep.mubr.f32.mxu0 %v10563_v22 }
0x1782   : > { %6985 = vmatprep.subr.mxu1 %v6864_v48 }
0x1783   : > { %6986 = vmatpush1.msra.mxu1 %v6862_v34  ;;  %8385 = vmatmul.mubr.msk.f32.gmra.mxu0 %vm253_vm0, %v10163_v58 }
0x1784   : > { %8388 = vmatmul.mubr.msk.f32.vlgmr.msra.gmra.mxu1 %vm253_vm0, %v10148_v62  ;;  %7343 = vmatprep.subr.mxu1 %v10627_v3 }
0x1785   : > { %7344 = vmatpush1.msra.mxu1 %v10628_v45  ;;  %7025 = vmatprep.mubr.f32.mxu1 %v10563_v22 }
0x1786   : > { %6942 = vmatprep.mubr.f32.mxu0 %v10563_v22 }
0x1787   : > { %8386 = vmatmul.mubr.msk.f32.gmra.mxu0 %vm253_vm0, %v10309_v50 }
0x1788   : > { %8389 = vmatmul.mubr.msk.f32.gmra.mxu1 %vm253_vm0, %v10163_v58  ;;  %6948 = vmatprep.mubr.f32.mxu0 %v10563_v22 }
0x1789   : > { %7031 = vmatprep.mubr.f32.mxu1 %v10563_v22 }
0x178b   : > { %8387 = vmatmul.mubr.msk.f32.gmra.mxu0 %vm253_vm0, %v10180_v14 }
0x178c   : > { %8390 = vmatmul.mubr.msk.f32.gmra.mxu1 %vm253_vm0, %v10309_v50  ;;  %7306 = vmatprep.mubr.f32.mxu0 %v10563_v22 }
0x178d   : > { %7037 = vmatprep.mubr.f32.mxu1 %v10563_v22 }
0x178f   : > { %8395 = vmatmul.mubr.msk.f32.vlgmr.msra.gmra.mxu0 %vm253_vm0, %v10191_v10 }
0x1790   : > { %8391 = vmatmul.mubr.msk.f32.gmra.mxu1 %vm253_vm0, %v10180_v14  ;;  %7468 = vmatprep.mubr.f32.mxu0 %v10563_v22 }
0x1791   : > { %7377 = vmatprep.mubr.f32.mxu1 %v10563_v22 }
0x1794   : > { %8396 = vmatmul.mubr.msk.f32.vlgmr.msra.gmra.mxu1 %vm253_vm0, %v10191_v10 }
0x1795   : > { %7539 = vmatprep.mubr.f32.mxu1 %v10563_v22 }
0x183f   : > { %v6932_v62 = vpop.f32.mrf.mxu0 }
0x1840   : > { %v6933_v58 = vadd.f32 %v6932_v62, %v9433_v8 }
0x1841   : > { %v6934_v16 = vpop.f32.mrf.mxu0 }
0x1842   : > { %vm7044_vm12 = vcmp.ge.f32.partialorder %v6933_v58, 0.0  ;;  %v7060_v63 = vmul.f32 0.01, %v6933_v58  ;;  %v6935_v40 = vadd.f32 %v6934_v16, %v9433_v8 }
0x1843   : > { %v6938_v13 = vpop.f32.mrf.mxu0 }
0x1844   : > { %v7076_v9 = vsel %vm7044_vm12, %v6933_v58, %v7060_v63  ;;  %v7021_v14 = vpop.f32.mrf.mxu1  ;;  %vm7045_vm13 = vcmp.ge.f32.partialorder %v6935_v40, 0.0  ;;  %v7061_v27 = vmul.f32 0.01, %v6935_v40  ;;  %v6939_v6 = vadd.f32 %v6938_v13, %v9438_v60 }
0x1845   : > { %v7022_v2 = vadd.f32 %v7021_v14, %v9433_v8  ;;  %v6940_v10 = vpop.f32.mrf.mxu0  ;;  %v7092_v39 = vmul.f32 %v7076_v9, %v9475_v0 }
0x1846   : > { %v7023_v55 = vpop.f32.mrf.mxu1  ;;  %vm7048_vm15 = vcmp.ge.f32.partialorder %v6939_v6, 0.0  ;;  %v7064_v31 = vmul.f32 0.01, %v6939_v6  ;;  %v6941_v56 = vadd.f32 %v6940_v10, %v9438_v60  ;;  %v7077_v46 = vsel %vm7045_vm13, %v6935_v40, %v7061_v27 }
0x1847   : > { %vm7046_vm1 = vcmp.ge.f32.partialorder %v7022_v2, 0.0  ;;  %v7062_v54 = vmul.f32 0.01, %v7022_v2  ;;  %v7024_v11 = vadd.f32 %v7023_v55, %v9433_v8  ;;  %v6944_v57 = vpop.f32.mrf.mxu0  ;;  %v7093_v35 = vmul.f32 %v7077_v46, %v9475_v0 }
0x1848   : > { %v7080_v51 = vsel %vm7048_vm15, %v6939_v6, %v7064_v31  ;;  %v7027_v61 = vpop.f32.mrf.mxu1  ;;  %vm7049_vm2 = vcmp.ge.f32.partialorder %v6941_v56, 0.0  ;;  %v7065_v53 = vmul.f32 0.01, %v6941_v56  ;;  %v6945_v38 = vadd.f32 %v6944_v57, %v9448_v15 }
0x1849   : > { %v7078_v41 = vsel %vm7046_vm1, %v7022_v2, %v7062_v54  ;;  %vm7047_vm3 = vcmp.ge.f32.partialorder %v7024_v11, 0.0  ;;  %v7063_v23 = vmul.f32 0.01, %v7024_v11  ;;  %v7096_v20 = vmul.f32 %v7080_v51, %v9478_v1  ;;  %v6946_v36 = vpop.f32.mrf.mxu0 }
0x184a   : > { %v7094_v52 = vmul.f32 %v7078_v41, %v9475_v0  ;;  %v7028_v30 = vadd.f32 %v7027_v61, %v9438_v60  ;;  %v7081_v5 = vsel %vm7049_vm2, %v6941_v56, %v7065_v53  ;;  %v7029_v25 = vpop.f32.mrf.mxu1  ;;  %vm7052_vm4 = vcmp.ge.f32.partialorder %v6945_v38, 0.0 }
0x184b   : > { %v7079_v28 = vsel %vm7047_vm3, %v7024_v11, %v7063_v23  ;;  %v7108_v7 = vadd.f32 %v7096_v20, %v7092_v39  ;;  %v7030_v49 = vadd.f32 %v7029_v25, %v9438_v60  ;;  %v6950_v18 = vpop.f32.mrf.mxu0  ;;  %v7097_v29 = vmul.f32 %v7081_v5, %v9478_v1 }
0x184c   : > { %vm7050_vm5 = vcmp.ge.f32.partialorder %v7028_v30, 0.0  ;;  %v7066_v44 = vmul.f32 0.01, %v7028_v30  ;;  %v7068_v24 = vmul.f32 0.01, %v6945_v38  ;;  %v7033_v33 = vpop.f32.mrf.mxu1  ;;  %v7095_v48 = vmul.f32 %v7079_v28, %v9475_v0 }
0x184d   : > { %vm7051_vm6 = vcmp.ge.f32.partialorder %v7030_v49, 0.0  ;;  %v7067_v34 = vmul.f32 0.01, %v7030_v49  ;;  %v7034_v62 = vadd.f32 %v7033_v33, %v9448_v15  ;;  %v6947_v63 = vadd.f32 %v6946_v36, %v9448_v15  ;;  %v6952_v55 = vpop.f32.mrf.mxu0 }
0x184e   : > { %v7082_v58 = vsel %vm7050_vm5, %v7028_v30, %v7066_v44  ;;  %v7084_v16 = vsel %vm7052_vm4, %v6945_v38, %v7068_v24  ;;  %v7035_v40 = vpop.f32.mrf.mxu1  ;;  %v6951_v13 = vadd.f32 %v6950_v18, %v9462_v43  ;;  %v7117_v6 = vadd.f32 %v7097_v29, %v7093_v35 }
0x184f   : > { %v7098_v9 = vmul.f32 %v7082_v58, %v9478_v1  ;;  %v7083_v14 = vsel %vm7051_vm6, %v7030_v49, %v7067_v34  ;;  %v7100_v27 = vmul.f32 %v7084_v16, %v9497_v17  ;;  %vm7054_vm7 = vcmp.ge.f32.partialorder %v7034_v62, 0.0  ;;  %v7308_v35 = vpop.f32.mrf.mxu0 }
0x1850   : > { %v7070_v2 = vmul.f32 0.01, %v7034_v62  ;;  %vm7053_vm8 = vcmp.ge.f32.partialorder %v6947_v63, 0.0  ;;  %v7069_v10 = vmul.f32 0.01, %v6947_v63  ;;  %v7039_v39 = vpop.f32.mrf.mxu1  ;;  %v7099_v56 = vmul.f32 %v7083_v14, %v9478_v1 }
0x1851   : > { %v7126_v31 = vadd.f32 %v7098_v9, %v7094_v52  ;;  %v7036_v54 = vadd.f32 %v7035_v40, %v9448_v15  ;;  %vm7056_vm9 = vcmp.ge.f32.partialorder %v6951_v13, 0.0  ;;  %v7109_v46 = vadd.f32 %v7108_v7, %v7100_v27  ;;  %v7310_v58 = vpop.f32.mrf.mxu0 }
0x1852   : > { %v7086_v11 = vsel %vm7054_vm7, %v7034_v62, %v7070_v2  ;;  %v7085_v57 = vsel %vm7053_vm8, %v6947_v63, %v7069_v10  ;;  %v7072_v51 = vmul.f32 0.01, %v6951_v13  ;;  %v7041_v61 = vpop.f32.mrf.mxu1  ;;  %v7040_v20 = vadd.f32 %v7039_v39, %v9462_v43 }
0x1853   : > { %v7102_v53 = vmul.f32 %v7086_v11, %v9497_v17  ;;  %v7101_v38 = vmul.f32 %v7085_v57, %v9497_v17  ;;  %vm7055_vm10 = vcmp.ge.f32.partialorder %v7036_v54, 0.0  ;;  %v7071_v41 = vmul.f32 0.01, %v7036_v54 }
0x1854   : > { %v7088_v23 = vsel %vm7056_vm9, %v6951_v13, %v7072_v51  ;;  %v6953_v36 = vadd.f32 %v6952_v55, %v9462_v43  ;;  %v7042_v52 = vadd.f32 %v7041_v61, %v9462_v43  ;;  %v7135_v30 = vadd.f32 %v7099_v56, %v7095_v48  ;;  %v7379_v7 = vpop.f32.mrf.mxu1 }
0x1855   : > { %v7127_v5 = vadd.f32 %v7126_v31, %v7102_v53  ;;  %v7087_v25 = vsel %vm7055_vm10, %v7036_v54, %v7071_v41  ;;  %v7104_v28 = vmul.f32 %v7088_v23, %v9501_v37  ;;  %vm7058_vm11 = vcmp.ge.f32.partialorder %v7040_v20, 0.0 }
0x1856   : > { %v7103_v49 = vmul.f32 %v7087_v25, %v9497_v17  ;;  %v7074_v18 = vmul.f32 0.01, %v7040_v20  ;;  %vm7057_vm12 = vcmp.ge.f32.partialorder %v6953_v36, 0.0  ;;  %v7073_v29 = vmul.f32 0.01, %v6953_v36  ;;  %v7381_v10 = vpop.f32.mrf.mxu1 }
0x1857   : > { %v7110_v44 = vadd.f32 %v7109_v46, %v7104_v28  ;;  %vm7059_vm13 = vcmp.ge.f32.partialorder %v7042_v52, 0.0  ;;  %v7075_v24 = vmul.f32 0.01, %v7042_v52  ;;  %v7118_v33 = vadd.f32 %v7117_v6, %v7101_v38 }
0x1858   : > { %v7090_v34 = vsel %vm7058_vm11, %v7040_v20, %v7074_v18  ;;  %v7309_v62 = vadd.f32 %v7308_v35, %v9317_v4  ;;  %v7380_v48 = vadd.f32 %v7379_v7, %v9317_v4  ;;  %v7089_v40 = vsel %vm7057_vm12, %v6953_v36, %v7073_v29 }
0x1859   : > { %v7111_v16 = vrot.slane %v7110_v44, 4  ;;  %v7106_v63 = vmul.f32 %v7090_v34, %v9501_v37  ;;  %v7091_v13 = vsel %vm7059_vm13, %v7042_v52, %v7075_v24  ;;  %v7136_v9 = vadd.f32 %v7135_v30, %v7103_v49 }
0x185a   : > { %v7105_v14 = vmul.f32 %v7089_v40, %v9501_v37  ;;  %v7107_v27 = vmul.f32 %v7091_v13, %v9501_v37  ;;  %v7384_v2 = vmul.f32 %v7309_v62, %v10626_v32  ;;  %v7311_v55 = vadd.f32 %v7310_v58, %v9317_v4 }
0x185b   : > { %v7112_v6 = vadd.f32 %v7111_v16, %v7110_v44  ;;  %v7128_v39 = vadd.f32 %v7127_v5, %v7106_v63  ;;  %v7386_v54 = vmul.f32 %v7380_v48, %v10628_v45  ;;  %v7382_v57 = vadd.f32 %v7381_v10, %v9317_v4 }
0x185c   : > { %v7119_v31 = vadd.f32 %v7118_v33, %v7105_v14  ;;  %v7137_v56 = vadd.f32 %v7136_v9, %v7107_v27  ;;  %v7392_v53 = vmul.f32 0.01, %v7384_v2  ;;  %v7385_v38 = vmul.f32 %v7311_v55, %v10625_v19 }
0x185d   : > { %v7113_v46 = vrot.slane %v7112_v6, 2  ;;  %v7129_v11 = vrot.slane %v7128_v39, 4  ;;  %vm7388_vm15 = vcmp.ge.f32.partialorder %v7384_v2, 0.0  ;;  %vm7390_vm1 = vcmp.ge.f32.partialorder %v7386_v54, 0.0 }
0x185e   : > { %v7120_v51 = vrot.slane %v7119_v31, 4  ;;  %v7138_v61 = vrot.slane %v7137_v56, 4  ;;  %vm7389_vm2 = vcmp.ge.f32.partialorder %v7385_v38, 0.0  ;;  %v7394_v35 = vmul.f32 0.01, %v7386_v54 }
0x185f   : > { %v7114_v41 = vadd.f32 %v7113_v46, %v7112_v6  ;;  %v7130_v23 = vadd.f32 %v7129_v11, %v7128_v39  ;;  %v7393_v30 = vmul.f32 0.01, %v7385_v38  ;;  %v7387_v5 = vmul.f32 %v7382_v57, %v10627_v3  ;;  %v8501_v39 = vld [vmem:[%s10525_s1 + $0x10] sm:$0xff] }
0x1860   : > { %v7121_v20 = vadd.f32 %v7120_v51, %v7119_v31  ;;  %v7139_v36 = vadd.f32 %v7138_v61, %v7137_v56  ;;  %v7396_v7 = vsel %vm7388_vm15, %v7384_v2, %v7392_v53  ;;  %v7398_v16 = vsel %vm7390_vm1, %v7386_v54, %v7394_v35 }
0x1861   : > { %v7131_v52 = vrot.slane %v7130_v23, 2  ;;  %v7115_v25 = vrot.slane %v7114_v41, 1  ;;  %v7397_v18 = vsel %vm7389_vm2, %v7385_v38, %v7393_v30  ;;  %vm7391_vm3 = vcmp.ge.f32.partialorder %v7387_v5, 0.0 }
0x1862   : > { %v7122_v28 = vrot.slane %v7121_v20, 2  ;;  %v7140_v4 = vrot.slane %v7139_v36, 2  ;;  %v7401_v24 = vadd.f32 %v7397_v18, %v7311_v55  ;;  %v7395_v33 = vmul.f32 0.01, %v7387_v5 }
0x1863   : > { %v7132_v49 = vadd.f32 %v7131_v52, %v7130_v23  ;;  %v7400_v58 = vadd.f32 %v7396_v7, %v7309_v62  ;;  %v7116_v63 = vadd.f32 %v7115_v25, %v7114_v41  ;;  %v7402_v6 = vadd.f32 %v7398_v16, %v7380_v48 }
0x1864   : > { %v7123_v44 = vadd.f32 %v7122_v28, %v7121_v20  ;;  %v7141_v29 = vadd.f32 %v7140_v4, %v7139_v36  ;;  %v7399_v9 = vsel %vm7391_vm3, %v7387_v5, %v7395_v33  ;;  %7434 = vmatprep.subr.mxu0 %v7401_v24 }
0x1865   : > { %v7133_v34 = vrot.slane %v7132_v49, 1  ;;  %v7403_v27 = vadd.f32 %v7399_v9, %v7382_v57  ;;  %7435 = vmatpush1.msra.mxu0 %v7400_v58  ;;  %v7144_v62 = vadd.f32 %v7116_v63, %v9529_v47 }
0x1866   : > { %v7124_v40 = vrot.slane %v7123_v44, 1  ;;  %v7142_v13 = vrot.slane %v7141_v29, 1  ;;  %8397 = vmatmul.mubr.msk.f32.vlgmr.msra.gmra.mxu0 %vm253_vm0, %v8501_v39 }
0x1867   : > { %v7134_v14 = vadd.f32 %v7133_v34, %v7132_v49  ;;  %7505 = vmatprep.subr.mxu1 %v7403_v27  ;;  %7614 = vmatprep.mubr.f32.mxu0 %v10563_v22 }
0x1868   : > { %v7125_v2 = vadd.f32 %v7124_v40, %v7123_v44  ;;  %v7143_v10 = vadd.f32 %v7142_v13, %v7141_v29  ;;  %7506 = vmatpush1.msra.mxu1 %v7402_v6 }
0x1869   : > { %v7146_v55 = vadd.f32 %v7134_v14, %v9529_v47  ;;  %8398 = vmatmul.mubr.msk.f32.vlgmr.msra.gmra.mxu1 %vm253_vm0, %v8501_v39 }
0x186a   : > { %v7145_v31 = vadd.f32 %v7125_v2, %v9529_v47  ;;  %v7147_v56 = vadd.f32 %v7143_v10, %v9529_v47  ;;  %7685 = vmatprep.mubr.f32.mxu1 %v10563_v22 }
0x186c   : > { %v7152_v48 = vcombine.low %v7144_v62, %v7145_v31  ;;  %v7153_v54 = vcombine.low %v7146_v55, %v7147_v56 }
0x186e   : > { %v7160_v46 = vrot.slane %v7152_v48, %v9532_v59  ;;  %v7167_v11 = vrot.slane %v7153_v54, %v9532_v59  ;;  %v8503_v54 = vld [vmem:[%s10525_s1 + $0x28] sm:$0xff] }
0x1870   : > { %v7168_v57 = vcombine.low %v7160_v46, %v7167_v11 }
0x1872   : > { %v7175_v51 = vrot.slane %v7168_v57, %v9532_v59 }
0x1874   : > { %8392 = vst.msk [vmem:[%s9547_s17 + $0x6] ss:$8 sm:$0xf] %vm9542_vm14, %v7175_v51 }
0x1926   : > { %v7470_v61 = vpop.f32.mrf.mxu0 }
0x1927   : > { %v7471_v53 = vadd.f32 %v7470_v61, %v9333_v42 }
0x1928   : > { %v7472_v38 = vpop.f32.mrf.mxu0 }
0x1929   : > { %v7541_v41 = vpop.f32.mrf.mxu1  ;;  %v7473_v23 = vadd.f32 %v7472_v38, %v9333_v42  ;;  %v7546_v35 = vmul.f32 %v7471_v53, %v10626_v32 }
0x192a   : > { %v7542_v20 = vadd.f32 %v7541_v41, %v9333_v42 }
0x192b   : > { %v7547_v36 = vmul.f32 %v7473_v23, %v10625_v19  ;;  %v7543_v52 = vpop.f32.mrf.mxu1 }
0x192c   : > { %v7544_v30 = vadd.f32 %v7543_v52, %v9333_v42  ;;  %v7548_v25 = vmul.f32 %v7542_v20, %v10628_v45 }
0x192d   : > { %7580 = vmatprep.subr.mxu0 %v7547_v36 }
0x192e   : > { %v7549_v5 = vmul.f32 %v7544_v30, %v10627_v3  ;;  %7581 = vmatpush1.msra.mxu0 %v7546_v35 }
0x192f   : > { %8399 = vmatmul.mubr.msk.f32.vlgmr.msra.gmra.mxu0 %vm253_vm0, %v8501_v39 }
0x1930   : > { %7651 = vmatprep.subr.mxu1 %v7549_v5  ;;  %7776 = vmatprep.mubr.f32.mxu0 %v10563_v22 }
0x1931   : > { %7652 = vmatpush1.msra.mxu1 %v7548_v25 }
0x1932   : > { %8400 = vmatmul.mubr.msk.f32.vlgmr.msra.gmra.mxu1 %vm253_vm0, %v8501_v39 }
0x1933   : > { %7847 = vmatprep.mubr.f32.mxu1 %v10563_v22 }
0x19ef   : > { %v7616_v28 = vpop.f32.mrf.mxu0 }
0x19f0   : > { %v7617_v4 = vadd.f32 %v7616_v28, %v9333_v42 }
0x19f1   : > { %v7618_v7 = vpop.f32.mrf.mxu0 }
0x19f2   : > { %v7692_v49 = vmul.f32 %v7617_v4, %v10626_v32  ;;  %v7687_v18 = vpop.f32.mrf.mxu1  ;;  %v7619_v44 = vadd.f32 %v7618_v7, %v9333_v42 }
0x19f3   : > { %v7688_v29 = vadd.f32 %v7687_v18, %v9333_v42 }
0x19f4   : > { %vm7696_vm4 = vcmp.ge.f32.partialorder %v7692_v49, 0.0  ;;  %v7700_v24 = vmul.f32 0.01, %v7692_v49  ;;  %v7693_v33 = vmul.f32 %v7619_v44, %v10625_v19  ;;  %v7689_v34 = vpop.f32.mrf.mxu1 }
0x19f5   : > { %v7694_v58 = vmul.f32 %v7688_v29, %v10628_v45  ;;  %v7690_v16 = vadd.f32 %v7689_v34, %v9333_v42 }
0x19f6   : > { %vm7697_vm5 = vcmp.ge.f32.partialorder %v7693_v33, 0.0  ;;  %v7701_v63 = vmul.f32 0.01, %v7693_v33  ;;  %v7704_v40 = vsel %vm7696_vm4, %v7692_v49, %v7700_v24 }
0x19f7   : > { %vm7698_vm6 = vcmp.ge.f32.partialorder %v7694_v58, 0.0  ;;  %v7702_v13 = vmul.f32 0.01, %v7694_v58  ;;  %v7695_v32 = vmul.f32 %v7690_v16, %v10627_v3  ;;  %v7708_v2 = vadd.f32 %v7704_v40, %v7617_v4 }
0x19f8   : > { %v7705_v9 = vsel %vm7697_vm5, %v7693_v33, %v7701_v63 }
0x19f9   : > { %v7709_v14 = vadd.f32 %v7705_v9, %v7619_v44  ;;  %vm7699_vm7 = vcmp.ge.f32.partialorder %v7695_v32, 0.0  ;;  %v7703_v27 = vmul.f32 0.01, %v7695_v32  ;;  %v7706_v10 = vsel %vm7698_vm6, %v7694_v58, %v7702_v13 }
0x19fa   : > { %v7710_v45 = vadd.f32 %v7706_v10, %v7688_v29 }
0x19fb   : > { %v7707_v6 = vsel %vm7699_vm7, %v7695_v32, %v7703_v27  ;;  %7742 = vmatprep.subr.mxu0 %v7709_v14 }
0x19fc   : > { %v7711_v19 = vadd.f32 %v7707_v6, %v7690_v16  ;;  %7743 = vmatpush1.msra.mxu0 %v7708_v2 }
0x19fd   : > { %8401 = vmatmul.mubr.msk.f32.vlgmr.msra.gmra.mxu0 %vm253_vm0, %v10281_v26 }
0x19fe   : > { %7813 = vmatprep.subr.mxu1 %v7711_v19  ;;  %7918 = vmatprep.mubr.f32.mxu0 %v10563_v22 }
0x19ff   : > { %7814 = vmatpush1.msra.mxu1 %v7710_v45 }
0x1a00   : > { %8402 = vmatmul.mubr.msk.f32.vlgmr.msra.gmra.mxu1 %vm253_vm0, %v10281_v26  ;;  %v8502_v26 = vld [vmem:[%s10525_s1 + $0x20] sm:$0xff] }
0x1a01   : > { %8007 = vmatprep.mubr.f32.mxu1 %v10563_v22 }
0x1abd   : > { %v7778_v42 = vpop.f32.mrf.mxu0 }
0x1abe   : > { %v7779_v55 = vadd.f32 %v7778_v42, %v9393_v21 }
0x1abf   : > { %v7780_v3 = vpop.f32.mrf.mxu0 }
0x1ac0   : > { %v7849_v39 = vpop.f32.mrf.mxu1  ;;  %v7781_v62 = vadd.f32 %v7780_v3, %v9393_v21 }
0x1ac1   : > { %v7850_v48 = vadd.f32 %v7849_v39, %v9393_v21 }
0x1ac2   : > { %v7851_v31 = vpop.f32.mrf.mxu1  ;;  %7884 = vmatprep.subr.mxu0 %v7781_v62 }
0x1ac3   : > { %v7852_v56 = vadd.f32 %v7851_v31, %v9393_v21  ;;  %7885 = vmatpush1.msra.mxu0 %v7779_v55  ;;  %v8504_v21 = vld [vmem:[%s10525_s1 + $0x38] sm:$0xff] }
0x1ac4   : > { %8403 = vmatmul.mubr.msk.f32.vlgmr.msra.gmra.mxu0 %vm253_vm0, %v8502_v26 }
0x1ac5   : > { %7973 = vmatprep.subr.mxu1 %v7852_v56  ;;  %7924 = vmatprep.mubr.f32.mxu0 %v10563_v22 }
0x1ac6   : > { %7974 = vmatpush1.msra.mxu1 %v7850_v48 }
0x1ac7   : > { %8407 = vmatmul.mubr.msk.f32.vlgmr.msra.gmra.mxu1 %vm253_vm0, %v8502_v26 }
0x1ac8   : > { %8013 = vmatprep.mubr.f32.mxu1 %v10563_v22  ;;  %8404 = vmatmul.mubr.msk.f32.gmra.mxu0 %vm253_vm0, %v8503_v54 }
0x1ac9   : > { %7930 = vmatprep.mubr.f32.mxu0 %v10563_v22 }
0x1acb   : > { %8408 = vmatmul.mubr.msk.f32.gmra.mxu1 %vm253_vm0, %v8503_v54 }
0x1acc   : > { %8019 = vmatprep.mubr.f32.mxu1 %v10563_v22  ;;  %8405 = vmatmul.mubr.msk.f32.gmra.mxu0 %vm253_vm0, %v10309_v50 }
0x1acd   : > { %7936 = vmatprep.mubr.f32.mxu0 %v10563_v22 }
0x1acf   : > { %8409 = vmatmul.mubr.msk.f32.gmra.mxu1 %vm253_vm0, %v10309_v50 }
0x1ad0   : > { %8025 = vmatprep.mubr.f32.mxu1 %v10563_v22  ;;  %8406 = vmatmul.mubr.msk.f32.gmra.mxu0 %vm253_vm0, %v8504_v21 }
0x1ad3   : > { %8410 = vmatmul.mubr.msk.f32.gmra.mxu1 %vm253_vm0, %v8504_v21 }
0x1b84   : > { %v7920_v46 = vpop.f32.mrf.mxu0 }
0x1b85   : > { %v7921_v11 = vadd.f32 %v7920_v46, %v9433_v8 }
0x1b86   : > { %v7922_v57 = vpop.f32.mrf.mxu0 }
0x1b87   : > { %vm8032_vm8 = vcmp.ge.f32.partialorder %v7921_v11, 0.0  ;;  %v8048_v51 = vmul.f32 0.01, %v7921_v11  ;;  %v8009_v61 = vpop.f32.mrf.mxu1  ;;  %v7923_v53 = vadd.f32 %v7922_v57, %v9433_v8 }
0x1b88   : > { %v8010_v50 = vadd.f32 %v8009_v61, %v9433_v8  ;;  %v7926_v22 = vpop.f32.mrf.mxu0 }
0x1b89   : > { %v8064_v38 = vsel %vm8032_vm8, %v7921_v11, %v8048_v51  ;;  %v8011_v41 = vpop.f32.mrf.mxu1  ;;  %v7927_v23 = vadd.f32 %v7926_v22, %v9438_v60  ;;  %vm8033_vm9 = vcmp.ge.f32.partialorder %v7923_v53, 0.0  ;;  %v8049_v36 = vmul.f32 0.01, %v7923_v53 }
0x1b8a   : > { %v8050_v20 = vmul.f32 0.01, %v8010_v50  ;;  %v8012_v52 = vadd.f32 %v8011_v41, %v9433_v8  ;;  %v7928_v35 = vpop.f32.mrf.mxu0  ;;  %vm8034_vm0 = vcmp.ge.f32.partialorder %v8010_v50, 0.0  ;;  %v8080_v28 = vmul.f32 %v8064_v38, %v9475_v0 }
0x1b8b   : > { %vm8036_vm10 = vcmp.ge.f32.partialorder %v7927_v23, 0.0  ;;  %v8052_v30 = vmul.f32 0.01, %v7927_v23  ;;  %v8015_v5 = vpop.f32.mrf.mxu1  ;;  %v7929_v25 = vadd.f32 %v7928_v35, %v9438_v60  ;;  %v8065_v8 = vsel %vm8033_vm9, %v7923_v53, %v8049_v36 }
0x1b8c   : > { %v8051_v4 = vmul.f32 0.01, %v8012_v52  ;;  %v7932_v7 = vpop.f32.mrf.mxu0  ;;  %vm8035_vm11 = vcmp.ge.f32.partialorder %v8012_v52, 0.0  ;;  %v8016_v18 = vadd.f32 %v8015_v5, %v9438_v60  ;;  %v8066_v29 = vsel %vm8034_vm0, %v8010_v50, %v8050_v20 }
0x1b8d   : > { %v8068_v49 = vsel %vm8036_vm10, %v7927_v23, %v8052_v30  ;;  %vm8037_vm12 = vcmp.ge.f32.partialorder %v7929_v25, 0.0  ;;  %v8017_v44 = vpop.f32.mrf.mxu1  ;;  %v8053_v24 = vmul.f32 0.01, %v7929_v25  ;;  %v7933_v63 = vadd.f32 %v7932_v7, %v9448_v15 }
0x1b8e   : > { %v8018_v33 = vadd.f32 %v8017_v44, %v9438_v60  ;;  %v7934_v34 = vpop.f32.mrf.mxu0  ;;  %v8084_v58 = vmul.f32 %v8068_v49, %v9478_v1  ;;  %vm8038_vm13 = vcmp.ge.f32.partialorder %v8016_v18, 0.0  ;;  %v8054_v16 = vmul.f32 0.01, %v8016_v18 }
0x1b8f   : > { %v8021_v40 = vpop.f32.mrf.mxu1  ;;  %v8067_v13 = vsel %vm8035_vm11, %v8012_v52, %v8051_v4  ;;  %v8069_v32 = vsel %vm8037_vm12, %v7929_v25, %v8053_v24  ;;  %vm8040_vm1 = vcmp.ge.f32.partialorder %v7933_v63, 0.0  ;;  %v8056_v10 = vmul.f32 0.01, %v7933_v63 }
0x1b90   : > { %vm8039_vm15 = vcmp.ge.f32.partialorder %v8018_v33, 0.0  ;;  %v8055_v9 = vmul.f32 0.01, %v8018_v33  ;;  %v7938_v14 = vpop.f32.mrf.mxu0  ;;  %v8070_v27 = vsel %vm8038_vm13, %v8016_v18, %v8054_v16  ;;  %v8085_v2 = vmul.f32 %v8069_v32, %v9478_v1 }
0x1b91   : > { %v8023_v6 = vpop.f32.mrf.mxu1  ;;  %v8082_v60 = vmul.f32 %v8066_v29, %v9475_v0  ;;  %v8081_v19 = vmul.f32 %v8065_v8, %v9475_v0  ;;  %v8022_v45 = vadd.f32 %v8021_v40, %v9448_v15  ;;  %v7935_v42 = vadd.f32 %v7934_v34, %v9448_v15 }
0x1b92   : > { %v8083_v3 = vmul.f32 %v8067_v13, %v9475_v0  ;;  %v8096_v39 = vadd.f32 %v8084_v58, %v8080_v28  ;;  %v8072_v62 = vsel %vm8040_vm1, %v7933_v63, %v8056_v10  ;;  %v8024_v55 = vadd.f32 %v8023_v6, %v9448_v15  ;;  %v7940_v54 = vpop.f32.mrf.mxu0 }
0x1b93   : > { %v8086_v31 = vmul.f32 %v8070_v27, %v9478_v1  ;;  %v8071_v56 = vsel %vm8039_vm15, %v8018_v33, %v8055_v9  ;;  %vm8042_vm2 = vcmp.ge.f32.partialorder %v8022_v45, 0.0  ;;  %v8058_v48 = vmul.f32 0.01, %v8022_v45  ;;  %v8027_v26 = vpop.f32.mrf.mxu1 }
0x1b94   : > { %v8105_v21 = vadd.f32 %v8085_v2, %v8081_v19  ;;  %v8088_v46 = vmul.f32 %v8072_v62, %v9497_v17  ;;  %vm8041_vm3 = vcmp.ge.f32.partialorder %v7935_v42, 0.0  ;;  %v8057_v11 = vmul.f32 0.01, %v7935_v42 }
0x1b95   : > { %v8074_v57 = vsel %vm8042_vm2, %v8022_v45, %v8058_v48  ;;  %vm8043_vm4 = vcmp.ge.f32.partialorder %v8024_v55, 0.0  ;;  %v8059_v0 = vmul.f32 0.01, %v8024_v55  ;;  %v7939_v51 = vadd.f32 %v7938_v14, %v9462_v43  ;;  %v8029_v23 = vpop.f32.mrf.mxu1 }
0x1b96   : > { %v8090_v15 = vmul.f32 %v8074_v57, %v9497_v17  ;;  %v8073_v61 = vsel %vm8041_vm3, %v7935_v42, %v8057_v11  ;;  %v8028_v53 = vadd.f32 %v8027_v26, %v9462_v43  ;;  %v7941_v50 = vadd.f32 %v7940_v54, %v9462_v43 }
0x1b97   : > { %v8087_v22 = vmul.f32 %v8071_v56, %v9478_v1  ;;  %v8089_v38 = vmul.f32 %v8073_v61, %v9497_v17  ;;  %vm8044_vm5 = vcmp.ge.f32.partialorder %v7939_v51, 0.0  ;;  %v8060_v41 = vmul.f32 0.01, %v7939_v51 }
0x1b98   : > { %v8114_v20 = vadd.f32 %v8086_v31, %v8082_v60  ;;  %v8075_v36 = vsel %vm8043_vm4, %v8024_v55, %v8059_v0  ;;  %vm8046_vm6 = vcmp.ge.f32.partialorder %v8028_v53, 0.0  ;;  %v8062_v52 = vmul.f32 0.01, %v8028_v53 }
0x1b99   : > { %v8097_v35 = vadd.f32 %v8096_v39, %v8088_v46  ;;  %v8076_v30 = vsel %vm8044_vm5, %v7939_v51, %v8060_v41  ;;  %vm8045_vm7 = vcmp.ge.f32.partialorder %v7941_v50, 0.0  ;;  %v8061_v5 = vmul.f32 0.01, %v7941_v50 }
0x1b9a   : > { %v8115_v25 = vadd.f32 %v8114_v20, %v8090_v15  ;;  %v8092_v28 = vmul.f32 %v8076_v30, %v9501_v37  ;;  %v8078_v4 = vsel %vm8046_vm6, %v8028_v53, %v8062_v52  ;;  %v8030_v7 = vadd.f32 %v8029_v23, %v9462_v43 }
0x1b9b   : > { %v8106_v1 = vadd.f32 %v8105_v21, %v8089_v38  ;;  %v8091_v49 = vmul.f32 %v8075_v36, %v9497_v17  ;;  %v8094_v18 = vmul.f32 %v8078_v4, %v9501_v37  ;;  %v8077_v44 = vsel %vm8045_vm7, %v7941_v50, %v8061_v5 }
0x1b9c   : > { %v8098_v29 = vadd.f32 %v8097_v35, %v8092_v28  ;;  %v8093_v8 = vmul.f32 %v8077_v44, %v9501_v37  ;;  %vm8047_vm8 = vcmp.ge.f32.partialorder %v8030_v7, 0.0  ;;  %v8063_v24 = vmul.f32 0.01, %v8030_v7 }
0x1b9d   : > { %v8123_v33 = vadd.f32 %v8087_v22, %v8083_v3  ;;  %v8116_v34 = vadd.f32 %v8115_v25, %v8094_v18 }
0x1b9e   : > { %v8099_v58 = vrot.slane %v8098_v29, 4  ;;  %v8107_v16 = vadd.f32 %v8106_v1, %v8093_v8  ;;  %v8079_v63 = vsel %vm8047_vm8, %v8030_v7, %v8063_v24 }
0x1b9f   : > { %v8124_v40 = vadd.f32 %v8123_v33, %v8091_v49  ;;  %v8117_v13 = vrot.slane %v8116_v34, 4  ;;  %v8095_v43 = vmul.f32 %v8079_v63, %v9501_v37 }
0x1ba0   : > { %v8100_v32 = vadd.f32 %v8099_v58, %v8098_v29  ;;  %v8108_v9 = vrot.slane %v8107_v16, 4 }
0x1ba1   : > { %v8118_v17 = vadd.f32 %v8117_v13, %v8116_v34  ;;  %v8125_v14 = vadd.f32 %v8124_v40, %v8095_v43 }
0x1ba2   : > { %v8101_v27 = vrot.slane %v8100_v32, 2  ;;  %v8109_v2 = vadd.f32 %v8108_v9, %v8107_v16 }
0x1ba3   : > { %v8119_v10 = vrot.slane %v8118_v17, 2  ;;  %v8126_v6 = vrot.slane %v8125_v14, 4 }
0x1ba4   : > { %v8102_v60 = vadd.f32 %v8101_v27, %v8100_v32  ;;  %v8110_v19 = vrot.slane %v8109_v2, 2 }
0x1ba5   : > { %v8120_v45 = vadd.f32 %v8119_v10, %v8118_v17  ;;  %v8127_v42 = vadd.f32 %v8126_v6, %v8125_v14 }
0x1ba6   : > { %v8103_v3 = vrot.slane %v8102_v60, 1  ;;  %v8111_v39 = vadd.f32 %v8110_v19, %v8109_v2 }
0x1ba7   : > { %v8121_v62 = vrot.slane %v8120_v45, 1  ;;  %v8128_v55 = vrot.slane %v8127_v42, 2 }
0x1ba8   : > { %v8104_v31 = vadd.f32 %v8103_v3, %v8102_v60  ;;  %v8112_v37 = vrot.slane %v8111_v39, 1 }
0x1ba9   : > { %v8129_v56 = vadd.f32 %v8128_v55, %v8127_v42  ;;  %v8122_v26 = vadd.f32 %v8121_v62, %v8120_v45 }
0x1baa   : > { %v8113_v48 = vadd.f32 %v8112_v37, %v8111_v39  ;;  %v8132_v21 = vadd.f32 %v8104_v31, %v9529_v47 }
0x1bab   : > { %v8130_v54 = vrot.slane %v8129_v56, 1  ;;  %v8134_v0 = vadd.f32 %v8122_v26, %v9529_v47 }
0x1bac   : > { %v8133_v46 = vadd.f32 %v8113_v48, %v9529_v47 }
0x1bad   : > { %v8131_v11 = vadd.f32 %v8130_v54, %v8129_v56 }
0x1bae   : > { %v8140_v57 = vcombine.low %v8132_v21, %v8133_v46 }
0x1baf   : > { %v8135_v51 = vadd.f32 %v8131_v11, %v9529_v47 }
0x1bb0   : > { %v8148_v15 = vrot.slane %v8140_v57, %v9532_v59 }
0x1bb1   : > { %v8141_v61 = vcombine.low %v8134_v0, %v8135_v51 }
0x1bb3   : > { %v8155_v53 = vrot.slane %v8141_v61, %v9532_v59 }
0x1bb5   : > { %v8156_v50 = vcombine.low %v8148_v15, %v8155_v53 }
0x1bb7   : > { %v8163_v22 = vrot.slane %v8156_v50, %v9532_v59 }
0x1bb9   : > { %8411 = vst.msk [vmem:[%s9547_s17 + $0x7] ss:$8 sm:$0xf] %vm9542_vm14, %v8163_v22 }
0x1bba   : > { %8546 = shalt.err (!%p8543_p9)
}
0x1bbb   : > { %s8547_s28 = scalar_lea.hbm %s8181_s23, 512  ;;  %s8551_s30 = scalar_lea.hbm %s10526_s2, 2048 }
0x1bbc   : > { %p8548_p1 = scmp.ne.s32.totalorder %s8181_s23, %s8547_s28  ;;  %p8552_p5 = scmp.lt.s32.totalorder %s8181_s23, %s10526_s2 }
0x1bbd   : > { %p8553_p13 = scmp.lt.s32.totalorder %s8551_s30, %s8547_s28 }
0x1bbe   : > { %p8549_p3 = pnand %p8548_p1, %p10629_p11 }
0x1bbf   : > { %p8554_p6 = por %p8553_p13, %p8552_p5 }
0x1bc0   : > { %p8550_p4 = pneg %p8549_p3 }
0x1bc2   : > { %p8555_p10 = pnand %p8554_p6, %p8550_p4 }
0x1bc4   : > { %8558 = shalt.err (!%p8555_p10)
}
0x1bc5   : > { %8421 = dma.vmem_to_hbm [thread:$0]  (%p10629_p11), %s8184_s14, 512, %s8181_s23, %s8169_s24  }
0x1bc6 PF: > { %p8432_p12 = scmp.ge.s32.totalorder %s8597_s12, 2  ;;  %s8195_s4 = sand.u32 1, %s8585_s9  }
0x1bc7   : > { %p10630_p0 = scmp.ne.s32.totalorder %s10553_s22, 0  ;;  %s8196_s5 = scalar_lea.sflag [#allocation4], %s8195_s4 }
0x1bc9   : > { %p8428_p2 = pnand %p8432_p12, %p10630_p0 }
0x1bcb   : > { %p8429_p7 = pneg %p8428_p2 }
0x1bcd   : > { %8580 = dma.done.wait (%p8429_p7), %s8196_s5, 512  }
0x1bce   : > { %8582 = vsyncadd (%p8429_p7), %s8196_s5, 4294966784  ;;  %p15_p8 = scmp.ge.s32.totalorder %s8647_s15, 6   ;;  %s10631_s9 = smov %s8589_s10 }
0x1bcf   : > { %s10632_s10 = smov %s8593_s11  ;;  %s10633_s11 = smov %s8659_s18 }
0x1bd0   : > { %s10634_s12 = smov %s8647_s15  ;;  %17 = sbr.rel (!%p15_p8) target bundleno = 5 (0x5), region = 95 }
0x1bd5   :  { %8201 = vsyncpa [#allocation3], 1 }
0x1bd6   :  { %8203 = vsyncpa [#allocation3 + $0x1], 1 }
0x1bd7   :  { %8204 = vsyncpa [#allocation4], 1 }
0x1bd8   :  { %8206 = vsyncpa [#allocation4 + $0x1], 1 }

</bundles_post_ra>
